<compile_context>
chip_gen: v5e
topology: v5e:2x2
jax: 0.10.0
libtpu: 0.0.40
codegen_flags: <defaults>
</compile_context>

<pallas_src>
import functools
import math

import jax
import jax.numpy as jnp
import numpy as np
from jax import lax
from jax.experimental import pallas as pl
from jax.experimental.pallas import tpu as pltpu

KERNLEN = 7
PAD = KERNLEN // 2  # 3


def gkern(kernlen=21, nsig=3):
    """2D Gaussian kernel, same math as the reference (scipy.stats.norm.cdf)."""
    interval = (2 * nsig + 1.0) / kernlen
    x = np.linspace(-nsig - interval / 2.0, nsig + interval / 2.0, kernlen + 1)
    cdf = np.array([0.5 * (1.0 + math.erf(v / math.sqrt(2.0))) for v in x])
    kern1d = np.diff(cdf)
    kernel_raw = np.sqrt(np.outer(kern1d, kern1d))
    kernel = kernel_raw / kernel_raw.sum()
    return kernel


def gkern_separable(kernlen=7, nsig=3):
    """1D factor kv such that outer(kv, kv) == gkern(kernlen, nsig)."""
    interval = (2 * nsig + 1.0) / kernlen
    x = np.linspace(-nsig - interval / 2.0, nsig + interval / 2.0, kernlen + 1)
    cdf = np.array([0.5 * (1.0 + math.erf(v / math.sqrt(2.0))) for v in x])
    kern1d = np.diff(cdf)
    s = np.sqrt(kern1d)                 # kernel_raw = outer(s, s)
    return s / s.sum()                  # kernel = outer(kv, kv)


# Gaussian taps baked as compile-time Python float constants.
KV = tuple(float(v) for v in gkern_separable(KERNLEN).astype(np.float32))


def soft_iou_kernel(pred_pad_ref, target_ref, out_ref,
                    acc_min, acc_max, acc_tp, acc_st, acc_sp, *, n_valid):
    """One batch tile of Bt samples per grid step.

    pred_pad_ref: VMEM (hp, wp, Bt)  replicate-padded prediction slab
    target_ref:   VMEM (h,  w,  Bt)  binary target slab
    out_ref:      SMEM (1,)          F-measure (written at the last step)
    acc_*:        VMEM vector partial accumulators (reduced at the last step)
    n_valid:      static number of real (un-padded) batch samples
    """
    i = pl.program_id(0)
    last = pl.num_programs(0) - 1

    hp, wp, bt = pred_pad_ref.shape
    h, w, _ = target_ref.shape

    @pl.when(i == 0)
    def _init():
        acc_min[...] = jnp.full((w, bt), jnp.inf, jnp.float32)
        acc_max[...] = jnp.full((w, bt), -jnp.inf, jnp.float32)
        acc_tp[...] = jnp.zeros((w, bt), jnp.float32)
        acc_st[...] = jnp.zeros((w, bt), jnp.float32)
        acc_sp[...] = jnp.zeros((wp, bt), jnp.float32)

    pred_pad = pred_pad_ref[...]                        # (hp, wp, bt)
    target = target_ref[...]                            # (h,  w,  bt)

    # Separable 7x7 Gaussian "same" convolution.
    # Vertical pass: leading-axis slices -> pure vreg selection + VPU MACs.
    vert = KV[0] * pred_pad[0:h]
    for dy in range(1, KERNLEN):
        vert = vert + KV[dy] * pred_pad[dy:dy + h]      # (h, wp, bt)
    # Horizontal pass: sublane-offset slices, amortized over bt lanes.
    conv = KV[0] * vert[:, 0:w]
    for dx in range(1, KERNLEN):
        conv = conv + KV[dx] * vert[:, dx:dx + w]       # (h, w, bt)

    # Per-step partials: reduce only over the untiled leading H axis (VPU);
    # all cross-lane/sublane reductions are deferred to the final step.
    p_min = jnp.min(conv, axis=0)                       # (w, bt)
    p_max = jnp.max(conv, axis=0)                       # (w, bt)
    # target is assumed strictly {0,1} (same assumption as the reference's
    # `target == 1` mask), so conv*target == conv over the mask and
    # sum(target) == |mask|.
    p_tp = jnp.sum(conv * target, axis=0)               # (w, bt)
    p_st = jnp.sum(target, axis=0)                      # (w, bt)
    p_sp = jnp.sum(pred_pad[PAD:PAD + h], axis=0)       # (wp, bt) interior rows

    # Zero-padded batch lanes must not affect the global min/max.
    lane = lax.broadcasted_iota(jnp.int32, (w, bt), 1)
    valid = lane < (n_valid - i * bt)
    p_min = jnp.where(valid, p_min, jnp.inf)
    p_max = jnp.where(valid, p_max, -jnp.inf)

    acc_min[...] = jnp.minimum(acc_min[...], p_min)
    acc_max[...] = jnp.maximum(acc_max[...], p_max)
    acc_tp[...] = acc_tp[...] + p_tp
    acc_st[...] = acc_st[...] + p_st
    acc_sp[...] = acc_sp[...] + p_sp

    @pl.when(i == last)
    def _finalize():
        mn = jnp.min(acc_min[...])
        mx = jnp.max(acc_max[...])
        masked_acc = jnp.sum(acc_tp[...])
        sum_target = jnp.sum(acc_st[...])
        sp_full = acc_sp[...]
        sum_pred = jnp.sum(sp_full[PAD:PAD + w, :])     # interior cols, once

        # TP = sum_{target==1} (conv - mn) / (mx - mn); |mask| == sum_target.
        tp = (masked_acc - mn * sum_target) / (mx - mn)
        precise = tp / sum_pred
        recall = tp / sum_target
        fmeasure = 2.0 * (precise * recall) / (precise + recall)

        # mx <= mn reproduces the reference's NaN/zero-TP fallback paths.
        bad = jnp.logical_or(
            jnp.logical_or(sum_pred <= 0.0, mx <= mn),
            jnp.logical_or(jnp.isnan(tp), tp == 0.0),
        )
        out_ref[0] = jnp.where(bad, jnp.float32(0.0), fmeasure)


def soft_iou(pred_nchw, target_nchw):
    """pred/target: (N, 1, H, W) float32.  Returns (1,) float32 F-measure."""
    pred = jnp.squeeze(pred_nchw, axis=1).astype(jnp.float32)      # (N, H, W)
    target = jnp.squeeze(target_nchw, axis=1).astype(jnp.float32)  # (N, H, W)
    n, h, w = pred.shape

    # Replicate ('edge') padding on H, W — layout glue, not the hot path.
    pred_pad = jnp.pad(pred, ((0, 0), (PAD, PAD), (PAD, PAD)), mode="edge")
    hp, wp = h + 2 * PAD, w + 2 * PAD

    # Batch tile: >=128 lanes; grow while the double-buffered working set
    # (2 inputs x 2 pipeline buffers) stays well under v7x's 64 MiB VMEM.
    bt = 128
    while bt < 512 and n > bt and 8 * (2 * bt) * (hp * wp + h * w) <= (24 << 20):
        bt *= 2
    n_steps = (n + bt - 1) // bt
    n_pad = n_steps * bt

    # Lane-dense layout: batch on the lane axis, zero-padded up to n_pad.
    pred_pad_t = jnp.pad(jnp.transpose(pred_pad, (1, 2, 0)),
                         ((0, 0), (0, 0), (0, n_pad - n)))          # (hp, wp, n_pad)
    target_t = jnp.pad(jnp.transpose(target, (1, 2, 0)),
                       ((0, 0), (0, 0), (0, n_pad - n)))            # (h, w, n_pad)

    working = 8 * bt * (hp * wp + h * w)   # two pipeline buffers per input
    vmem_limit = max(32 << 20, min(2 * working, 96 << 20))

    return pl.pallas_call(
        functools.partial(soft_iou_kernel, n_valid=n),
        out_shape=jax.ShapeDtypeStruct((1,), jnp.float32),
        grid=(n_steps,),
        in_specs=[
            pl.BlockSpec((hp, wp, bt), lambda i: (0, 0, i)),  # padded pred slab
            pl.BlockSpec((h, w, bt), lambda i: (0, 0, i)),    # target slab
        ],
        out_specs=pl.BlockSpec(memory_space=pltpu.SMEM),      # scalar result
        scratch_shapes=[
            pltpu.VMEM((w, bt), jnp.float32),   # running min  (lane-masked)
            pltpu.VMEM((w, bt), jnp.float32),   # running max  (lane-masked)
            pltpu.VMEM((w, bt), jnp.float32),   # sum(conv * target)
            pltpu.VMEM((w, bt), jnp.float32),   # sum(target)
            pltpu.VMEM((wp, bt), jnp.float32),  # sum(pred) partial (interior rows)
        ],
        compiler_params=pltpu.CompilerParams(
            dimension_semantics=("arbitrary",),               # carried scratch
            vmem_limit_bytes=vmem_limit,
        ),
    )(pred_pad_t, target_t)


def soft_iou_ref(pred_nchw, target_nchw):
    """Pure-JAX reference (49-MAC 2D conv, materialized pred_soft)."""
    pred = jnp.squeeze(pred_nchw, axis=1).astype(jnp.float32)
    target = jnp.squeeze(target_nchw, axis=1).astype(jnp.float32)
    pred_pad = jnp.pad(pred, ((0, 0), (PAD, PAD), (PAD, PAD)), mode="edge")
    kern = jnp.asarray(gkern(kernlen=KERNLEN), dtype=jnp.float32)
    n, h, w = pred.shape
    acc = jnp.zeros((n, h, w), jnp.float32)
    for dy in range(KERNLEN):
        for dx in range(KERNLEN):
            acc = acc + kern[dy, dx] * pred_pad[:, dy:dy + h, dx:dx + w]
    ps = (acc - jnp.min(acc)) / (jnp.max(acc) - jnp.min(acc))
    tp = jnp.sum(jnp.where(target == 1.0, ps, 0.0))
    sp = jnp.sum(pred)
    st_ = jnp.sum(target)
    pr = tp / sp
    rc = tp / st_
    fm = 2.0 * pr * rc / (pr + rc)
    bad = jnp.logical_or(jnp.logical_or(sp <= 0.0, jnp.isnan(tp)), tp == 0.0)
    return jnp.where(bad, 0.0, fm)


if __name__ == "__main__":
    key = jax.random.PRNGKey(0)
    k_pred, k_tgt = jax.random.split(key)

    N, C, H, W = 2, 1, 16, 16
    pred = jax.random.uniform(k_pred, (N, C, H, W), dtype=jnp.float32)
    target = (jax.random.uniform(k_tgt, (N, C, H, W)) > 0.5).astype(jnp.float32)

    out = soft_iou(pred, target)
    out = jax.block_until_ready(out)

    ref = jax.block_until_ready(soft_iou_ref(pred, target))
    np.testing.assert_allclose(np.asarray(out)[0], np.asarray(ref),
                               rtol=1e-4, atol=1e-5)

    print("KERNEL_OK")
</pallas_src>

<mosaic_0001>
module attributes {stable_mosaic.version = 11 : i64} {
  func.func @soft_iou_kernel(%arg0: i32, %arg1: memref<22x22x128xf32, #tpu.memory_space<vmem>>, %arg2: memref<16x16x128xf32, #tpu.memory_space<vmem>>, %arg3: memref<1xf32, #tpu.memory_space<smem>>, %arg4: memref<16x128xf32, #tpu.memory_space<vmem>>, %arg5: memref<16x128xf32, #tpu.memory_space<vmem>>, %arg6: memref<16x128xf32, #tpu.memory_space<vmem>>, %arg7: memref<16x128xf32, #tpu.memory_space<vmem>>, %arg8: memref<22x128xf32, #tpu.memory_space<vmem>>) attributes {dimension_semantics = [#tpu.dimension_semantics<arbitrary>], iteration_bounds = array<i64: 1>, scalar_prefetch = 0 : i64, scratch_operands = 5 : i64, tpu.core_type = #tpu.core_type<tc>, window_params = [{transform_indices = @transform_0, window_bounds = array<i64: 22, 22, 128>}, {transform_indices = @transform_1, window_bounds = array<i64: 16, 16, 128>}, {transform_indices = @transform_2, window_bounds = array<i64: 1>}]} {
    %c0_i32 = arith.constant 0 : i32
    %0 = arith.cmpi eq, %arg0, %c0_i32 : i32
    %1 = arith.extui %0 : i1 to i32
    %c0_i32_0 = arith.constant 0 : i32
    %2 = arith.cmpi ne, %1, %c0_i32_0 : i32
    scf.if %2 {
      %cst_48 = arith.constant 0x7F800000 : f32
      %93 = vector.broadcast %cst_48 : f32 to vector<16x128xf32>
      %c0_49 = arith.constant 0 : index
      %c0_50 = arith.constant 0 : index
      %94 = vector.load %arg4[%c0_49, %c0_50] : memref<16x128xf32, #tpu.memory_space<vmem>>, vector<16x128xf32>
      tpu.vector_store %arg4[%c0_49, %c0_50], %93 {strides = array<i32>} : memref<16x128xf32, #tpu.memory_space<vmem>>, vector<16x128xf32>,
      %cst_51 = arith.constant 0xFF800000 : f32
      %95 = vector.broadcast %cst_51 : f32 to vector<16x128xf32>
      %c0_52 = arith.constant 0 : index
      %c0_53 = arith.constant 0 : index
      %96 = vector.load %arg5[%c0_52, %c0_53] : memref<16x128xf32, #tpu.memory_space<vmem>>, vector<16x128xf32>
      tpu.vector_store %arg5[%c0_52, %c0_53], %95 {strides = array<i32>} : memref<16x128xf32, #tpu.memory_space<vmem>>, vector<16x128xf32>,
      %cst_54 = arith.constant 0.000000e+00 : f32
      %97 = vector.broadcast %cst_54 : f32 to vector<16x128xf32>
      %c0_55 = arith.constant 0 : index
      %c0_56 = arith.constant 0 : index
      %98 = vector.load %arg6[%c0_55, %c0_56] : memref<16x128xf32, #tpu.memory_space<vmem>>, vector<16x128xf32>
      tpu.vector_store %arg6[%c0_55, %c0_56], %97 {strides = array<i32>} : memref<16x128xf32, #tpu.memory_space<vmem>>, vector<16x128xf32>,
      %cst_57 = arith.constant 0.000000e+00 : f32
      %99 = vector.broadcast %cst_57 : f32 to vector<16x128xf32>
      %c0_58 = arith.constant 0 : index
      %c0_59 = arith.constant 0 : index
      %100 = vector.load %arg7[%c0_58, %c0_59] : memref<16x128xf32, #tpu.memory_space<vmem>>, vector<16x128xf32>
      tpu.vector_store %arg7[%c0_58, %c0_59], %99 {strides = array<i32>} : memref<16x128xf32, #tpu.memory_space<vmem>>, vector<16x128xf32>,
      %cst_60 = arith.constant 0.000000e+00 : f32
      %101 = vector.broadcast %cst_60 : f32 to vector<22x128xf32>
      %c0_61 = arith.constant 0 : index
      %c0_62 = arith.constant 0 : index
      %102 = vector.load %arg8[%c0_61, %c0_62] : memref<22x128xf32, #tpu.memory_space<vmem>>, vector<22x128xf32>
      tpu.vector_store %arg8[%c0_61, %c0_62], %101 {strides = array<i32>} : memref<22x128xf32, #tpu.memory_space<vmem>>, vector<22x128xf32>,
    } else {
    }
    %c0 = arith.constant 0 : index
    %c0_1 = arith.constant 0 : index
    %c0_2 = arith.constant 0 : index
    %3 = vector.load %arg1[%c0, %c0_1, %c0_2] : memref<22x22x128xf32, #tpu.memory_space<vmem>>, vector<22x22x128xf32>
    %c0_3 = arith.constant 0 : index
    %c0_4 = arith.constant 0 : index
    %c0_5 = arith.constant 0 : index
    %4 = vector.load %arg2[%c0_3, %c0_4, %c0_5] : memref<16x16x128xf32, #tpu.memory_space<vmem>>, vector<16x16x128xf32>
    %5 = vector.extract_strided_slice %3 {offsets = [0, 0, 0], sizes = [16, 22, 128], strides = [1, 1, 1]} : vector<22x22x128xf32> to vector<16x22x128xf32>
    %cst = arith.constant 0.0343745574 : f32
    %6 = vector.broadcast %cst : f32 to vector<16x22x128xf32>
    %7 = arith.mulf %6, %5 : vector<16x22x128xf32>
    %8 = vector.extract_strided_slice %3 {offsets = [1, 0, 0], sizes = [16, 22, 128], strides = [1, 1, 1]} : vector<22x22x128xf32> to vector<16x22x128xf32>
    %cst_6 = arith.constant 0.10945148 : f32
    %9 = vector.broadcast %cst_6 : f32 to vector<16x22x128xf32>
    %10 = arith.mulf %9, %8 : vector<16x22x128xf32>
    %11 = arith.addf %7, %10 : vector<16x22x128xf32>
    %12 = vector.extract_strided_slice %3 {offsets = [2, 0, 0], sizes = [16, 22, 128], strides = [1, 1, 1]} : vector<22x22x128xf32> to vector<16x22x128xf32>
    %cst_7 = arith.constant 0.218604833 : f32
    %13 = vector.broadcast %cst_7 : f32 to vector<16x22x128xf32>
    %14 = arith.mulf %13, %12 : vector<16x22x128xf32>
    %15 = arith.addf %11, %14 : vector<16x22x128xf32>
    %16 = vector.extract_strided_slice %3 {offsets = [3, 0, 0], sizes = [16, 22, 128], strides = [1, 1, 1]} : vector<22x22x128xf32> to vector<16x22x128xf32>
    %cst_8 = arith.constant 0.275138259 : f32
    %17 = vector.broadcast %cst_8 : f32 to vector<16x22x128xf32>
    %18 = arith.mulf %17, %16 : vector<16x22x128xf32>
    %19 = arith.addf %15, %18 : vector<16x22x128xf32>
    %20 = vector.extract_strided_slice %3 {offsets = [4, 0, 0], sizes = [16, 22, 128], strides = [1, 1, 1]} : vector<22x22x128xf32> to vector<16x22x128xf32>
    %cst_9 = arith.constant 0.218604833 : f32
    %21 = vector.broadcast %cst_9 : f32 to vector<16x22x128xf32>
    %22 = arith.mulf %21, %20 : vector<16x22x128xf32>
    %23 = arith.addf %19, %22 : vector<16x22x128xf32>
    %24 = vector.extract_strided_slice %3 {offsets = [5, 0, 0], sizes = [16, 22, 128], strides = [1, 1, 1]} : vector<22x22x128xf32> to vector<16x22x128xf32>
    %cst_10 = arith.constant 0.10945148 : f32
    %25 = vector.broadcast %cst_10 : f32 to vector<16x22x128xf32>
    %26 = arith.mulf %25, %24 : vector<16x22x128xf32>
    %27 = arith.addf %23, %26 : vector<16x22x128xf32>
    %28 = vector.extract_strided_slice %3 {offsets = [6, 0, 0], sizes = [16, 22, 128], strides = [1, 1, 1]} : vector<22x22x128xf32> to vector<16x22x128xf32>
    %cst_11 = arith.constant 0.0343745574 : f32
    %29 = vector.broadcast %cst_11 : f32 to vector<16x22x128xf32>
    %30 = arith.mulf %29, %28 : vector<16x22x128xf32>
    %31 = arith.addf %27, %30 : vector<16x22x128xf32>
    %32 = vector.extract_strided_slice %31 {offsets = [0, 0, 0], sizes = [16, 16, 128], strides = [1, 1, 1]} : vector<16x22x128xf32> to vector<16x16x128xf32>
    %cst_12 = arith.constant 0.0343745574 : f32
    %33 = vector.broadcast %cst_12 : f32 to vector<16x16x128xf32>
    %34 = arith.mulf %33, %32 : vector<16x16x128xf32>
    %35 = vector.extract_strided_slice %31 {offsets = [0, 1, 0], sizes = [16, 16, 128], strides = [1, 1, 1]} : vector<16x22x128xf32> to vector<16x16x128xf32>
    %cst_13 = arith.constant 0.10945148 : f32
    %36 = vector.broadcast %cst_13 : f32 to vector<16x16x128xf32>
    %37 = arith.mulf %36, %35 : vector<16x16x128xf32>
    %38 = arith.addf %34, %37 : vector<16x16x128xf32>
    %39 = vector.extract_strided_slice %31 {offsets = [0, 2, 0], sizes = [16, 16, 128], strides = [1, 1, 1]} : vector<16x22x128xf32> to vector<16x16x128xf32>
    %cst_14 = arith.constant 0.218604833 : f32
    %40 = vector.broadcast %cst_14 : f32 to vector<16x16x128xf32>
    %41 = arith.mulf %40, %39 : vector<16x16x128xf32>
    %42 = arith.addf %38, %41 : vector<16x16x128xf32>
    %43 = vector.extract_strided_slice %31 {offsets = [0, 3, 0], sizes = [16, 16, 128], strides = [1, 1, 1]} : vector<16x22x128xf32> to vector<16x16x128xf32>
    %cst_15 = arith.constant 0.275138259 : f32
    %44 = vector.broadcast %cst_15 : f32 to vector<16x16x128xf32>
    %45 = arith.mulf %44, %43 : vector<16x16x128xf32>
    %46 = arith.addf %42, %45 : vector<16x16x128xf32>
    %47 = vector.extract_strided_slice %31 {offsets = [0, 4, 0], sizes = [16, 16, 128], strides = [1, 1, 1]} : vector<16x22x128xf32> to vector<16x16x128xf32>
    %cst_16 = arith.constant 0.218604833 : f32
    %48 = vector.broadcast %cst_16 : f32 to vector<16x16x128xf32>
    %49 = arith.mulf %48, %47 : vector<16x16x128xf32>
    %50 = arith.addf %46, %49 : vector<16x16x128xf32>
    %51 = vector.extract_strided_slice %31 {offsets = [0, 5, 0], sizes = [16, 16, 128], strides = [1, 1, 1]} : vector<16x22x128xf32> to vector<16x16x128xf32>
    %cst_17 = arith.constant 0.10945148 : f32
    %52 = vector.broadcast %cst_17 : f32 to vector<16x16x128xf32>
    %53 = arith.mulf %52, %51 : vector<16x16x128xf32>
    %54 = arith.addf %50, %53 : vector<16x16x128xf32>
    %55 = vector.extract_strided_slice %31 {offsets = [0, 6, 0], sizes = [16, 16, 128], strides = [1, 1, 1]} : vector<16x22x128xf32> to vector<16x16x128xf32>
    %cst_18 = arith.constant 0.0343745574 : f32
    %56 = vector.broadcast %cst_18 : f32 to vector<16x16x128xf32>
    %57 = arith.mulf %56, %55 : vector<16x16x128xf32>
    %58 = arith.addf %54, %57 : vector<16x16x128xf32>
    %cst_19 = arith.constant dense<0x7F800000> : vector<16x128xf32>
    %59 = vector.multi_reduction <minimumf>, %58, %cst_19 [0] : vector<16x16x128xf32> to vector<16x128xf32>
    %cst_20 = arith.constant dense<0xFF800000> : vector<16x128xf32>
    %60 = vector.multi_reduction <maximumf>, %58, %cst_20 [0] : vector<16x16x128xf32> to vector<16x128xf32>
    %61 = arith.mulf %58, %4 : vector<16x16x128xf32>
    %cst_21 = arith.constant dense<0.000000e+00> : vector<16x128xf32>
    %62 = vector.multi_reduction <add>, %61, %cst_21 [0] : vector<16x16x128xf32> to vector<16x128xf32>
    %cst_22 = arith.constant dense<0.000000e+00> : vector<16x128xf32>
    %63 = vector.multi_reduction <add>, %4, %cst_22 [0] : vector<16x16x128xf32> to vector<16x128xf32>
    %64 = vector.extract_strided_slice %3 {offsets = [3, 0, 0], sizes = [16, 22, 128], strides = [1, 1, 1]} : vector<22x22x128xf32> to vector<16x22x128xf32>
    %cst_23 = arith.constant dense<0.000000e+00> : vector<22x128xf32>
    %65 = vector.multi_reduction <add>, %64, %cst_23 [0] : vector<16x22x128xf32> to vector<22x128xf32>
    %66 = tpu.iota {dimensions = array<i32: 1>} : vector<16x128xi32>
    %c128_i32 = arith.constant 128 : i32
    %67 = arith.muli %arg0, %c128_i32 : i32
    %c2_i32 = arith.constant 2 : i32
    %68 = arith.subi %c2_i32, %67 : i32
    %69 = vector.broadcast %68 : i32 to vector<16x128xi32>
    %70 = arith.cmpi slt, %66, %69 : vector<16x128xi32>
    %cst_24 = arith.constant 0x7F800000 : f32
    %71 = vector.broadcast %cst_24 : f32 to vector<16x128xf32>
    %72 = arith.select %70, %59, %71 : vector<16x128xi1>, vector<16x128xf32>
    %cst_25 = arith.constant 0xFF800000 : f32
    %73 = vector.broadcast %cst_25 : f32 to vector<16x128xf32>
    %74 = arith.select %70, %60, %73 : vector<16x128xi1>, vector<16x128xf32>
    %c0_26 = arith.constant 0 : index
    %c0_27 = arith.constant 0 : index
    %75 = vector.load %arg4[%c0_26, %c0_27] : memref<16x128xf32, #tpu.memory_space<vmem>>, vector<16x128xf32>
    %76 = arith.minimumf %75, %72 : vector<16x128xf32>
    %c0_28 = arith.constant 0 : index
    %c0_29 = arith.constant 0 : index
    %77 = vector.load %arg4[%c0_28, %c0_29] : memref<16x128xf32, #tpu.memory_space<vmem>>, vector<16x128xf32>
    tpu.vector_store %arg4[%c0_28, %c0_29], %76 {strides = array<i32>} : memref<16x128xf32, #tpu.memory_space<vmem>>, vector<16x128xf32>,
    %c0_30 = arith.constant 0 : index
    %c0_31 = arith.constant 0 : index
    %78 = vector.load %arg5[%c0_30, %c0_31] : memref<16x128xf32, #tpu.memory_space<vmem>>, vector<16x128xf32>
    %79 = arith.maximumf %78, %74 : vector<16x128xf32>
    %c0_32 = arith.constant 0 : index
    %c0_33 = arith.constant 0 : index
    %80 = vector.load %arg5[%c0_32, %c0_33] : memref<16x128xf32, #tpu.memory_space<vmem>>, vector<16x128xf32>
    tpu.vector_store %arg5[%c0_32, %c0_33], %79 {strides = array<i32>} : memref<16x128xf32, #tpu.memory_space<vmem>>, vector<16x128xf32>,
    %c0_34 = arith.constant 0 : index
    %c0_35 = arith.constant 0 : index
    %81 = vector.load %arg6[%c0_34, %c0_35] : memref<16x128xf32, #tpu.memory_space<vmem>>, vector<16x128xf32>
    %82 = arith.addf %81, %62 : vector<16x128xf32>
    %c0_36 = arith.constant 0 : index
    %c0_37 = arith.constant 0 : index
    %83 = vector.load %arg6[%c0_36, %c0_37] : memref<16x128xf32, #tpu.memory_space<vmem>>, vector<16x128xf32>
    tpu.vector_store %arg6[%c0_36, %c0_37], %82 {strides = array<i32>} : memref<16x128xf32, #tpu.memory_space<vmem>>, vector<16x128xf32>,
    %c0_38 = arith.constant 0 : index
    %c0_39 = arith.constant 0 : index
    %84 = vector.load %arg7[%c0_38, %c0_39] : memref<16x128xf32, #tpu.memory_space<vmem>>, vector<16x128xf32>
    %85 = arith.addf %84, %63 : vector<16x128xf32>
    %c0_40 = arith.constant 0 : index
    %c0_41 = arith.constant 0 : index
    %86 = vector.load %arg7[%c0_40, %c0_41] : memref<16x128xf32, #tpu.memory_space<vmem>>, vector<16x128xf32>
    tpu.vector_store %arg7[%c0_40, %c0_41], %85 {strides = array<i32>} : memref<16x128xf32, #tpu.memory_space<vmem>>, vector<16x128xf32>,
    %c0_42 = arith.constant 0 : index
    %c0_43 = arith.constant 0 : index
    %87 = vector.load %arg8[%c0_42, %c0_43] : memref<22x128xf32, #tpu.memory_space<vmem>>, vector<22x128xf32>
    %88 = arith.addf %87, %65 : vector<22x128xf32>
    %c0_44 = arith.constant 0 : index
    %c0_45 = arith.constant 0 : index
    %89 = vector.load %arg8[%c0_44, %c0_45] : memref<22x128xf32, #tpu.memory_space<vmem>>, vector<22x128xf32>
    tpu.vector_store %arg8[%c0_44, %c0_45], %88 {strides = array<i32>} : memref<22x128xf32, #tpu.memory_space<vmem>>, vector<22x128xf32>,
    %c0_i32_46 = arith.constant 0 : i32
    %90 = arith.cmpi eq, %arg0, %c0_i32_46 : i32
    %91 = arith.extui %90 : i1 to i32
    %c0_i32_47 = arith.constant 0 : i32
    %92 = arith.cmpi ne, %91, %c0_i32_47 : i32
    scf.if %92 {
      %c0_48 = arith.constant 0 : index
      %c0_49 = arith.constant 0 : index
      %93 = vector.load %arg4[%c0_48, %c0_49] : memref<16x128xf32, #tpu.memory_space<vmem>>, vector<16x128xf32>
      %94 = vector.shape_cast %93 : vector<16x128xf32> to vector<1x16x128xf32>
      %cst_50 = arith.constant dense<0x7F800000> : vector<1xf32>
      %95 = vector.multi_reduction <minimumf>, %94, %cst_50 [1, 2] : vector<1x16x128xf32> to vector<1xf32>
      %96 = vector.shape_cast %95 : vector<1xf32> to vector<1x1x1xf32>
      %97 = vector.extract %96[0, 0, 0] : f32 from vector<1x1x1xf32>
      %c0_51 = arith.constant 0 : index
      %c0_52 = arith.constant 0 : index
      %98 = vector.load %arg5[%c0_51, %c0_52] : memref<16x128xf32, #tpu.memory_space<vmem>>, vector<16x128xf32>
      %99 = vector.shape_cast %98 : vector<16x128xf32> to vector<1x16x128xf32>
      %cst_53 = arith.constant dense<0xFF800000> : vector<1xf32>
      %100 = vector.multi_reduction <maximumf>, %99, %cst_53 [1, 2] : vector<1x16x128xf32> to vector<1xf32>
      %101 = vector.shape_cast %100 : vector<1xf32> to vector<1x1x1xf32>
      %102 = vector.extract %101[0, 0, 0] : f32 from vector<1x1x1xf32>
      %c0_54 = arith.constant 0 : index
      %c0_55 = arith.constant 0 : index
      %103 = vector.load %arg6[%c0_54, %c0_55] : memref<16x128xf32, #tpu.memory_space<vmem>>, vector<16x128xf32>
      %104 = vector.shape_cast %103 : vector<16x128xf32> to vector<1x16x128xf32>
      %cst_56 = arith.constant dense<0.000000e+00> : vector<1xf32>
      %105 = vector.multi_reduction <add>, %104, %cst_56 [1, 2] : vector<1x16x128xf32> to vector<1xf32>
      %106 = vector.shape_cast %105 : vector<1xf32> to vector<1x1x1xf32>
      %107 = vector.extract %106[0, 0, 0] : f32 from vector<1x1x1xf32>
      %c0_57 = arith.constant 0 : index
      %c0_58 = arith.constant 0 : index
      %108 = vector.load %arg7[%c0_57, %c0_58] : memref<16x128xf32, #tpu.memory_space<vmem>>, vector<16x128xf32>
      %109 = vector.shape_cast %108 : vector<16x128xf32> to vector<1x16x128xf32>
      %cst_59 = arith.constant dense<0.000000e+00> : vector<1xf32>
      %110 = vector.multi_reduction <add>, %109, %cst_59 [1, 2] : vector<1x16x128xf32> to vector<1xf32>
      %111 = vector.shape_cast %110 : vector<1xf32> to vector<1x1x1xf32>
      %112 = vector.extract %111[0, 0, 0] : f32 from vector<1x1x1xf32>
      %c0_60 = arith.constant 0 : index
      %c0_61 = arith.constant 0 : index
      %113 = vector.load %arg8[%c0_60, %c0_61] : memref<22x128xf32, #tpu.memory_space<vmem>>, vector<22x128xf32>
      %114 = vector.extract_strided_slice %113 {offsets = [3, 0], sizes = [16, 128], strides = [1, 1]} : vector<22x128xf32> to vector<16x128xf32>
      %115 = vector.shape_cast %114 : vector<16x128xf32> to vector<1x16x128xf32>
      %cst_62 = arith.constant dense<0.000000e+00> : vector<1xf32>
      %116 = vector.multi_reduction <add>, %115, %cst_62 [1, 2] : vector<1x16x128xf32> to vector<1xf32>
      %117 = vector.shape_cast %116 : vector<1xf32> to vector<1x1x1xf32>
      %118 = vector.extract %117[0, 0, 0] : f32 from vector<1x1x1xf32>
      %119 = arith.mulf %97, %112 : f32
      %120 = arith.subf %107, %119 : f32
      %121 = arith.subf %102, %97 : f32
      %122 = arith.divf %120, %121 : f32
      %123 = arith.divf %122, %118 : f32
      %124 = arith.divf %122, %112 : f32
      %125 = arith.mulf %123, %124 : f32
      %cst_63 = arith.constant 2.000000e+00 : f32
      %126 = arith.mulf %cst_63, %125 : f32
      %127 = arith.addf %123, %124 : f32
      %128 = arith.divf %126, %127 : f32
      %cst_64 = arith.constant 0.000000e+00 : f32
      %129 = arith.cmpf ole, %118, %cst_64 : f32
      %130 = arith.cmpf ole, %102, %97 : f32
      %131 = arith.ori %129, %130 : i1
      %132 = arith.cmpf one, %122, %122 : f32
      %cst_65 = arith.constant 0.000000e+00 : f32
      %133 = arith.cmpf oeq, %122, %cst_65 : f32
      %134 = arith.ori %132, %133 : i1
      %135 = arith.ori %131, %134 : i1
      %cst_66 = arith.constant 0.000000e+00 : f32
      %136 = arith.select %135, %cst_66, %128 : f32
      %c0_67 = arith.constant 0 : index
      %137 = memref.load %arg3[%c0_67] : memref<1xf32, #tpu.memory_space<smem>>
      memref.store %136, %arg3[%c0_67] : memref<1xf32, #tpu.memory_space<smem>>
    } else {
    }
    return
  }
  func.func @transform_0(%arg0: i32) -> (i32, i32, i32) {
    %c0_i32 = arith.constant 0 : i32
    %c0_i32_0 = arith.constant 0 : i32
    %c0_i32_1 = arith.constant 0 : i32
    return %c0_i32, %c0_i32_0, %arg0 : i32, i32, i32
  }
  func.func @transform_1(%arg0: i32) -> (i32, i32, i32) {
    %c0_i32 = arith.constant 0 : i32
    %c0_i32_0 = arith.constant 0 : i32
    %c0_i32_1 = arith.constant 0 : i32
    return %c0_i32, %c0_i32_0, %arg0 : i32, i32, i32
  }
  func.func @transform_2(%arg0: i32) -> i32 {
    %c0_i32 = arith.constant 0 : i32
    %c0_i32_0 = arith.constant 0 : i32
    return %c0_i32 : i32
  }
}

</mosaic_0001>

<bundles_post_ra>
// kernel: tpu_custom_call.1
= control target key start
LH: loop header
LB: loop body
LE: loop exit
PB: predicated region body
PF: predicated region fallthrough
CT: control target
= control target key end

     0   :  { %7 = vsyncpa [#allocation8], 0  ;;  %s5982_s0 = inlined_call_operand.hbm [shape: f32[22,22,128], index: 0, kind: input, shape index: {}]   ;;  %s5983_s1 = inlined_call_operand.hbm [shape: f32[16,16,128], index: 1, kind: input, shape index: {}]   ;;  %s5984_s2 = inlined_call_operand.hbm [shape: f32[1], index: 2, kind: output, shape index: {}]  }
   0x1   :  { %8 = vsyncpa [#allocation11], 0 }
   0x2   :  { %9 = vsyncpa [#allocation9], 0  ;;  %s14_s11 = sshll.u32 %s5982_s0, 4  ;;  %s2504_s12 = smov [#allocation7]   ;;  %s15_s11 = int_to_ptr.hbm [resolvable:$true] %s14_s11 }
   0x3   :  { %s16_s13 = sshll.u32 %s2504_s12, 4  ;;  %s27_s16 = sshll.u32 %s5983_s1, 4  ;;  %s17_s13 = int_to_ptr.vmem [resolvable:$true] %s16_s13  ;;  %s28_s16 = int_to_ptr.hbm [resolvable:$true] %s27_s16 }
   0x4   :  { %s2505_s17 = smov 128   ;;  %s2506_s18 = smov 8  }
   0x5   :  { %22 = dma.hbm_to_vmem [thread:$0]  %s15_s11, 8448, %s17_s13, [#allocation8], %s2505_s17, %s2505_s17, %s2506_s18  }
   0x6   :  { %s2507_s19 = smov [#allocation10]  }
   0x7   :  { %s29_s20 = sshll.u32 %s2507_s19, 4  ;;  %s30_s20 = int_to_ptr.vmem [resolvable:$true] %s29_s20 }
   0x8   :  { %35 = dma.hbm_to_vmem [thread:$0]  %s28_s16, 4096, %s30_s20, [#allocation11], %s2505_s17, %s2505_s17, %s2506_s18  }
   0x9   :  { %2498 = dma.done.wait [#allocation8], 8448  }
   0xa   :  { %2499 = vsyncadd [#allocation8], 4294958848 }
   0xb   :  { %2500 = dma.done.wait [#allocation11], 4096  }
   0xc   :  { %2501 = vsyncadd [#allocation11], 4294963200  ;;  %v59_v0 = vld [vmem:[#allocation7] sm:$0xff]  ;;  %v60_v1 = vld [vmem:[#allocation7 + $0x8] sm:$0xff]  ;;  %vm801_vm0 = vcmask 1046528   ;;  %vm1042_vm1 = vcmask 1045504  }
   0xd   :  { %v61_v2 = vld [vmem:[#allocation7 + $0x10] sm:$0x3f]  ;;  %v2531_v3 = vld [vmem:[#allocation7 + $0x18] sm:$0xff]  ;;  %v2533_v4 = vld [vmem:[#allocation7 + $0x20] sm:$0xff]  ;;  %v2537_v6 = vmul.f32 0.034374557, %v59_v0 }
   0xe   :  { %v2535_v5 = vld [vmem:[#allocation7 + $0x28] sm:$0x3f]  ;;  %v2539_v7 = vmul.f32 0.034374557, %v60_v1  ;;  %v2541_v8 = vld [vmem:[#allocation7 + $0x30] sm:$0xff]  ;;  %v2543_v9 = vld [vmem:[#allocation7 + $0x38] sm:$0xff] }
   0xf   :  { %6427 = vst [vmem:[#allocation16_spill] sm:$0xff] %v2541_v8  ;;  %v2545_v10 = vld [vmem:[#allocation7 + $0x48] sm:$0xff]  ;;  %v2547_v11 = vld [vmem:[#allocation7 + $0x50] sm:$0xff]  ;;  %v2549_v12 = vld [vmem:[#allocation7 + $0x58] sm:$0x3f]  ;;  %vm1283_vm2 = vcmask 1044480  }
  0x10   :  { %6428 = vst [vmem:[#allocation17_spill] sm:$0xff] %v2545_v10  ;;  %v2551_v13 = vmul.f32 0.034374557, %v61_v2  ;;  %v2553_v14 = vld [vmem:[#allocation7 + $0x40] sm:$0x3f]  ;;  %v2557_v16 = vld [vmem:[#allocation7 + $0x68] sm:$0xff] }
  0x11   :  { %6429 = vst [vmem:[#allocation18_spill] sm:$0xff] %v2547_v11  ;;  %v2555_v15 = vld [vmem:[#allocation7 + $0x60] sm:$0xff]  ;;  %v2559_v17 = vld [vmem:[#allocation7 + $0x70] sm:$0x3f]  ;;  %v2562_v18 = vmul.f32 0.034374557, %v2531_v3 }
  0x12   :  { %6430 = vst [vmem:[#allocation19_spill] sm:$0xff] %v2549_v12  ;;  %v2564_v19 = vld [vmem:[#allocation7 + $0x78] sm:$0xff]  ;;  %v2566_v20 = vld [vmem:[#allocation7 + $0x80] sm:$0xff]  ;;  %v2568_v21 = vld [vmem:[#allocation7 + $0x88] sm:$0x3f]  ;;  %vm1428_vm3 = vcmask 1043456  }
  0x13   :  { %6431 = vst [vmem:[#allocation20_spill] sm:$0xff] %v2553_v14  ;;  %v2571_v22 = vmul.f32 0.034374557, %v2533_v4  ;;  %v2574_v23 = vmul.f32 0.034374557, %v2535_v5  ;;  %v2582_v26 = vld [vmem:[#allocation7 + $0x90] sm:$0xff] }
  0x14   :  { %6432 = vst [vmem:[#allocation21_spill] sm:$0xff] %v2555_v15  ;;  %v2577_v24 = vmul.f32 0.034374557, %v2541_v8  ;;  %v2580_v25 = vmul.f32 0.034374557, %v2543_v9  ;;  %v2584_v27 = vld [vmem:[#allocation7 + $0x98] sm:$0xff] }
  0x15   :  { %6433 = vst [vmem:[#allocation22_spill] sm:$0xff] %v2557_v16  ;;  %v2587_v28 = vmul.f32 0.034374557, %v2553_v14  ;;  %v2590_v29 = vmul.f32 0.034374557, %v2545_v10  ;;  %v2597_v32 = vld [vmem:[#allocation7 + $0xa8] sm:$0xff] }
  0x16   :  { %6434 = vst [vmem:[#allocation23_spill] sm:$0xff] %v2559_v17  ;;  %v2593_v30 = vmul.f32 0.034374557, %v2547_v11  ;;  %v2595_v31 = vld [vmem:[#allocation7 + $0xa0] sm:$0x3f]  ;;  %v2599_v33 = vld [vmem:[#allocation7 + $0xb0] sm:$0xff] }
  0x17   :  { %6435 = vst [vmem:[#allocation24_spill] sm:$0xff] %v2564_v19  ;;  %v2602_v34 = vmul.f32 0.034374557, %v2549_v12  ;;  %v2605_v35 = vmul.f32 0.034374557, %v2555_v15  ;;  %v2612_v38 = vld [vmem:[#allocation7 + $0xc0] sm:$0xff] }
  0x18   :  { %6436 = vst [vmem:[#allocation25_spill] sm:$0xff] %v2566_v20  ;;  %v2608_v36 = vmul.f32 0.034374557, %v2557_v16  ;;  %v2610_v37 = vld [vmem:[#allocation7 + $0xb8] sm:$0x3f]  ;;  %v2614_v39 = vld [vmem:[#allocation7 + $0xc8] sm:$0xff] }
  0x19   :  { %6437 = vst [vmem:[#allocation26_spill] sm:$0xff] %v2568_v21  ;;  %v2617_v40 = vmul.f32 0.034374557, %v2559_v17  ;;  %v2620_v41 = vmul.f32 0.034374557, %v2564_v19  ;;  %v2627_v44 = vld [vmem:[#allocation7 + $0xd8] sm:$0xff] }
  0x1a   :  { %6438 = vst [vmem:[#allocation27_spill] sm:$0xff] %v2582_v26  ;;  %v2623_v42 = vmul.f32 0.034374557, %v2566_v20  ;;  %v2625_v43 = vld [vmem:[#allocation7 + $0xd0] sm:$0x3f]  ;;  %v2629_v45 = vld [vmem:[#allocation7 + $0xe0] sm:$0xff] }
  0x1b   :  { %6439 = vst [vmem:[#allocation28_spill] sm:$0xff] %v2584_v27  ;;  %v2631_v46 = vld [vmem:[#allocation7 + $0x108] sm:$0xff]  ;;  %v2633_v47 = vld [vmem:[#allocation7 + $0x110] sm:$0xff]  ;;  %v2636_v48 = vmul.f32 0.034374557, %v2568_v21  ;;  %v2648_v53 = vld [vmem:[#allocation7 + $0xf8] sm:$0xff] }
  0x1c   :  { %6440 = vst [vmem:[#allocation29_spill] sm:$0xff] %v2595_v31  ;;  %v2639_v49 = vmul.f32 0.034374557, %v2582_v26  ;;  %v2642_v50 = vmul.f32 0.034374557, %v2584_v27  ;;  %v2646_v52 = vld [vmem:[#allocation7 + $0xf0] sm:$0xff] }
  0x1d   :  { %6441 = vst [vmem:[#allocation30_spill] sm:$0xff] %v2597_v32  ;;  %v2644_v51 = vld [vmem:[#allocation7 + $0xe8] sm:$0x3f]  ;;  %v2650_v54 = vld [vmem:[#allocation7 + $0x118] sm:$0x3f]  ;;  %v2665_v60 = vld [vmem:[#allocation7 + $0x140] sm:$0xff] }
  0x1e   :  { %6442 = vst [vmem:[#allocation31_spill] sm:$0xff] %v2599_v33  ;;  %v2653_v55 = vmul.f32 0.034374557, %v2595_v31  ;;  %v2656_v56 = vmul.f32 0.034374557, %v2597_v32  ;;  %v2663_v59 = vld [vmem:[#allocation7 + $0x138] sm:$0xff] }
  0x1f   :  { %6443 = vst [vmem:[#allocation32_spill] sm:$0xff] %v2602_v34  ;;  %v2659_v57 = vmul.f32 0.034374557, %v2599_v33  ;;  %v2661_v58 = vld [vmem:[#allocation7 + $0x100] sm:$0x3f]  ;;  %v2678_v1 = vld [vmem:[#allocation7 + $0x128] sm:$0xff] }
  0x20   :  { %6444 = vst [vmem:[#allocation33_spill] sm:$0xff] %v2605_v35  ;;  %v2668_v61 = vmul.f32 0.034374557, %v2610_v37  ;;  %v2671_v62 = vmul.f32 0.034374557, %v2612_v38  ;;  %v2676_v0 = vld [vmem:[#allocation7 + $0x120] sm:$0xff] }
  0x21   :  { %6445 = vst [vmem:[#allocation34_spill] sm:$0xff] %v2608_v36  ;;  %v2674_v63 = vmul.f32 0.034374557, %v2614_v39  ;;  %v2680_v2 = vld [vmem:[#allocation7 + $0x148] sm:$0x3f]  ;;  %vm1573_vm4 = vcmask 1042432  }
  0x22   :  { %6446 = vst [vmem:[#allocation35_spill] sm:$0xff] %v2610_v37  ;;  %v2730_v36 = vmul.f32 0.034374557, %v2678_v1  ;;  %vm1782_vm5 = vcmask 1041408   ;;  %s2346_s12 = sshll.u32 %s5984_s2, 4  ;;  %s2509_s15 = smov [#allocation12]   ;;  %s2347_s12 = int_to_ptr.hbm [resolvable:$true] %s2346_s12 }
  0x23   :  { %6447 = vst [vmem:[#allocation36_spill] sm:$0xff] %v2612_v38 }
  0x24   :  { %6448 = vst [vmem:[#allocation37_spill] sm:$0xff] %v2614_v39 }
  0x25   :  { %6449 = vst [vmem:[#allocation38_spill] sm:$0xff] %v2617_v40  ;;  %v2727_v40 = vmul.f32 0.034374557, %v2676_v0 }
  0x26   :  { %6450 = vst [vmem:[#allocation39_spill] sm:$0xff] %v2620_v41  ;;  %v2716_v41 = vmul.f32 0.034374557, %v2631_v46 }
  0x27   :  { %6451 = vst [vmem:[#allocation40_spill] sm:$0xff] %v2623_v42  ;;  %v2713_v42 = vmul.f32 0.034374557, %v2661_v58 }
  0x28   :  { %6452 = vst [vmem:[#allocation41_spill] sm:$0xff] %v2625_v43 }
  0x29   :  { %6453 = vst [vmem:[#allocation42_spill] sm:$0xff] %v2627_v44 }
  0x2a   :  { %6454 = vst [vmem:[#allocation43_spill] sm:$0xff] %v2629_v45 }
  0x2b   :  { %6455 = vst [vmem:[#allocation44_spill] sm:$0xff] %v2631_v46 }
  0x2c   :  { %6456 = vst [vmem:[#allocation45_spill] sm:$0xff] %v2633_v47 }
  0x2d   :  { %6457 = vst [vmem:[#allocation46_spill] sm:$0xff] %v2636_v48  ;;  %v2706_v48 = vld [vmem:[#allocation7 + $0x158] sm:$0xff] }
  0x2e   :  { %6458 = vst [vmem:[#allocation47_spill] sm:$0xff] %v2639_v49  ;;  %v2702_v49 = vmul.f32 0.034374557, %v2648_v53 }
  0x2f   :  { %6459 = vst [vmem:[#allocation48_spill] sm:$0xff] %v2642_v50  ;;  %v2699_v50 = vmul.f32 0.034374557, %v2646_v52 }
  0x30   :  { %6460 = vst [vmem:[#allocation49_spill] sm:$0xff] %v2644_v51 }
  0x31   :  { %6461 = vst [vmem:[#allocation50_spill] sm:$0xff] %v2646_v52 }
  0x32   :  { %6462 = vst [vmem:[#allocation51_spill] sm:$0xff] %v2648_v53 }
  0x33   :  { %6463 = vst [vmem:[#allocation52_spill] sm:$0xff] %v2650_v54 }
  0x34   :  { %6464 = vst [vmem:[#allocation53_spill] sm:$0xff] %v2653_v55  ;;  %v2691_v55 = vld [vmem:[#allocation7 + $0x130] sm:$0x3f] }
  0x35   :  { %6465 = vst [vmem:[#allocation54_spill] sm:$0xff] %v2656_v56  ;;  %v2686_v56 = vmul.f32 0.034374557, %v2627_v44  ;;  %v2733_v35 = vmul.f32 0.034374557, %v2691_v55 }
  0x36   :  { %6466 = vst [vmem:[#allocation55_spill] sm:$0xff] %v2659_v57  ;;  %v2683_v57 = vmul.f32 0.034374557, %v2625_v43 }
  0x37   :  { %6467 = vst [vmem:[#allocation56_spill] sm:$0xff] %v2661_v58 }
  0x38   :  { %6468 = vst [vmem:[#allocation57_spill] sm:$0xff] %v2663_v59 }
  0x39   :  { %6469 = vst [vmem:[#allocation58_spill] sm:$0xff] %v2665_v60 }
  0x3a   :  { %6470 = vst [vmem:[#allocation59_spill] sm:$0xff] %v2668_v61  ;;  %v2689_v61 = vmul.f32 0.034374557, %v2629_v45 }
  0x3b   :  { %6471 = vst [vmem:[#allocation60_spill] sm:$0xff] %v2671_v62  ;;  %v2693_v62 = vld [vmem:[#allocation7 + $0x168] sm:$0xff] }
  0x3c   :  { %6472 = vst [vmem:[#allocation61_spill] sm:$0xff] %v2674_v63  ;;  %v2696_v63 = vmul.f32 0.034374557, %v2644_v51 }
  0x3d   :  { %6473 = vst [vmem:[#allocation62_spill] sm:$0xff] %v2676_v0 }
  0x3e   :  { %6474 = vst [vmem:[#allocation63_spill] sm:$0xff] %v2678_v1 }
  0x3f   :  { %6475 = vst [vmem:[#allocation64_spill] sm:$0xff] %v2680_v2 }
  0x40   :  { %6476 = vst [vmem:[#allocation65_spill] sm:$0xff] %v2683_v57  ;;  %v2704_v57 = vld [vmem:[#allocation7 + $0x150] sm:$0xff] }
  0x41   :  { %6477 = vst [vmem:[#allocation66_spill] sm:$0xff] %v2686_v56  ;;  %v2708_v56 = vld [vmem:[#allocation7 + $0x170] sm:$0xff] }
  0x42   :  { %6478 = vst [vmem:[#allocation67_spill] sm:$0xff] %v2689_v61  ;;  %v2710_v61 = vld [vmem:[#allocation7 + $0x178] sm:$0x3f]  ;;  %v2758_v34 = vmul.f32 0.034374557, %v2708_v56 }
  0x43   :  { %6479 = vst [vmem:[#allocation68_spill] sm:$0xff] %v2691_v55 }
  0x44   :  { %6480 = vst [vmem:[#allocation69_spill] sm:$0xff] %v2693_v62 }
  0x45   :  { %6481 = vst [vmem:[#allocation70_spill] sm:$0xff] %v2696_v63  ;;  %v2719_v63 = vmul.f32 0.034374557, %v2633_v47 }
  0x46   :  { %6482 = vst [vmem:[#allocation71_spill] sm:$0xff] %v2699_v50  ;;  %v2721_v50 = vld [vmem:[#allocation7 + $0x160] sm:$0x3f] }
  0x47   :  { %6483 = vst [vmem:[#allocation72_spill] sm:$0xff] %v2702_v49  ;;  %v2724_v49 = vmul.f32 0.034374557, %v2650_v54 }
  0x48   :  { %6484 = vst [vmem:[#allocation73_spill] sm:$0xff] %v2704_v57 }
  0x49   :  { %6485 = vst [vmem:[#allocation74_spill] sm:$0xff] %v2706_v48 }
  0x4a   :  { %6486 = vst [vmem:[#allocation75_spill] sm:$0xff] %v2708_v56  ;;  %v213_v56 = vmul.f32 0.10945148, %v2549_v12  ;;  %v2787_v12 = vmul.f32 0.10945148, %v2568_v21 }
  0x4b   :  { %6487 = vst [vmem:[#allocation76_spill] sm:$0xff] %v2710_v61 }
  0x4c   :  { %6488 = vst [vmem:[#allocation77_spill] sm:$0xff] %v2713_v42  ;;  %v2736_v42 = vmul.f32 0.034374557, %v2663_v59 }
  0x4d   :  { %6489 = vst [vmem:[#allocation78_spill] sm:$0xff] %v2716_v41  ;;  %v2739_v41 = vmul.f32 0.034374557, %v2665_v60 }
  0x4e   :  { %6490 = vst [vmem:[#allocation79_spill] sm:$0xff] %v2719_v63  ;;  %v2742_v63 = vmul.f32 0.034374557, %v2680_v2 }
  0x4f   :  { %6491 = vst [vmem:[#allocation80_spill] sm:$0xff] %v2721_v50 }
  0x50   :  { %6492 = vst [vmem:[#allocation81_spill] sm:$0xff] %v2724_v49  ;;  %v2745_v49 = vmul.f32 0.034374557, %v2704_v57 }
  0x51   :  { %6493 = vst [vmem:[#allocation82_spill] sm:$0xff] %v2727_v40  ;;  %v2748_v40 = vmul.f32 0.034374557, %v2706_v48 }
  0x52   :  { %6494 = vst [vmem:[#allocation83_spill] sm:$0xff] %v2730_v36  ;;  %v2751_v36 = vmul.f32 0.034374557, %v2721_v50  ;;  %v209_v50 = vmul.f32 0.10945148, %v2543_v9 }
  0x53   :  { %6495 = vst [vmem:[#allocation84_spill] sm:$0xff] %v2733_v35  ;;  %v2754_v35 = vmul.f32 0.034374557, %v2693_v62 }
  0x54   :  { %6496 = vst [vmem:[#allocation85_spill] sm:$0xff] %v2736_v42  ;;  %v205_v42 = vmul.f32 0.10945148, %v2531_v3  ;;  %v212_v3 = vmul.f32 0.10945148, %v2547_v11 }
  0x55   :  { %6497 = vst [vmem:[#allocation86_spill] sm:$0xff] %v2739_v41  ;;  %v2761_v41 = vmul.f32 0.034374557, %v2710_v61 }
  0x56   :  { %6498 = vst [vmem:[#allocation87_spill] sm:$0xff] %v2742_v63  ;;  %v206_v63 = vmul.f32 0.10945148, %v2533_v4  ;;  %v2774_v4 = vadd.f32 %v205_v42, %v2537_v6  ;;  %v2793_v6 = vmul.f32 0.10945148, %v2584_v27 }
  0x57   :  { %6499 = vst [vmem:[#allocation88_spill] sm:$0xff] %v2745_v49  ;;  %v207_v49 = vmul.f32 0.10945148, %v2535_v5  ;;  %v216_v5 = vmul.f32 0.10945148, %v2559_v17 }
  0x58   :  { %6500 = vst [vmem:[#allocation89_spill] sm:$0xff] %v2748_v40  ;;  %v208_v40 = vmul.f32 0.10945148, %v2541_v8  ;;  %v2778_v8 = vmul.f32 0.10945148, %v2564_v19 }
  0x59   :  { %6501 = vst [vmem:[#allocation90_spill] sm:$0xff] %v2751_v36  ;;  %v210_v36 = vmul.f32 0.10945148, %v2553_v14  ;;  %v2781_v14 = vmul.f32 0.10945148, %v2566_v20  ;;  %v2796_v42 = vadd.f32 %v207_v49, %v2551_v13  ;;  %v2820_v49 = vadd.f32 %v209_v50, %v2571_v22 }
  0x5a   :  { %6502 = vst [vmem:[#allocation91_spill] sm:$0xff] %v2754_v35  ;;  %v211_v35 = vmul.f32 0.10945148, %v2545_v10  ;;  %v2784_v10 = vadd.f32 %v206_v63, %v2539_v7  ;;  %v2799_v19 = vmul.f32 0.10945148, %v2595_v31  ;;  %v2808_v63 = vadd.f32 %v208_v40, %v2562_v18 }
  0x5b   :  { %6503 = vst [vmem:[#allocation92_spill] sm:$0xff] %v2758_v34  ;;  %v214_v34 = vmul.f32 0.10945148, %v2555_v15  ;;  %v2790_v15 = vmul.f32 0.10945148, %v2582_v26  ;;  %v2832_v40 = vadd.f32 %v210_v36, %v2574_v23 }
  0x5c   :  { %6504 = vst [vmem:[#allocation93_spill] sm:$0xff] %v2761_v41  ;;  %v215_v41 = vmul.f32 0.10945148, %v2557_v16  ;;  %v2802_v20 = vmul.f32 0.10945148, %v2597_v32  ;;  %v2844_v50 = vadd.f32 %v211_v35, %v2577_v24 }
  0x5d   :  { %6505 = vst [vmem:[#allocation94_spill] sm:$0xff] %v2778_v8  ;;  %v2805_v7 = vmul.f32 0.10945148, %v2599_v33  ;;  %v2811_v26 = vmul.f32 0.10945148, %v2610_v37 }
  0x5e   :  { %6506 = vst [vmem:[#allocation95_spill] sm:$0xff] %v2781_v14  ;;  %v2814_v27 = vmul.f32 0.10945148, %v2612_v38  ;;  %v2817_v13 = vmul.f32 0.10945148, %v2614_v39 }
  0x5f   :  { %6507 = vst [vmem:[#allocation96_spill] sm:$0xff] %v2787_v12  ;;  %v2823_v32 = vmul.f32 0.10945148, %v2625_v43  ;;  %v2826_v33 = vmul.f32 0.10945148, %v2627_v44  ;;  %v2846_v44 = vld [vmem:[#allocation7 + $0x180] sm:$0xff] }
  0x60   :  { %6508 = vst [vmem:[#allocation97_spill] sm:$0xff] %v2790_v15  ;;  %v2829_v18 = vmul.f32 0.10945148, %v2629_v45  ;;  %v2835_v38 = vmul.f32 0.10945148, %v2644_v51  ;;  %v2848_v43 = vld [vmem:[#allocation7 + $0x188] sm:$0xff] }
  0x61   :  { %6509 = vst [vmem:[#allocation98_spill] sm:$0xff] %v2793_v6  ;;  %v2838_v39 = vmul.f32 0.10945148, %v2646_v52  ;;  %v2841_v22 = vmul.f32 0.10945148, %v2648_v53  ;;  %v2860_v52 = vadd.f32 %v212_v3, %v2580_v25 }
  0x62   :  { %6510 = vst [vmem:[#allocation99_spill] sm:$0xff] %v2799_v19  ;;  %v2851_v45 = vmul.f32 0.10945148, %v2661_v58  ;;  %v2854_v23 = vmul.f32 0.10945148, %v2631_v46  ;;  %v2874_v46 = vadd.f32 %v213_v56, %v2587_v28  ;;  %v2898_v56 = vadd.f32 %v215_v41, %v2593_v30  ;;  %v6549_v41 = vld [vmem:[#allocation33_spill] sm:$0xff] }
  0x63   :  { %6511 = vst [vmem:[#allocation100_spill] sm:$0xff] %v2802_v20  ;;  %v2857_v36 = vmul.f32 0.10945148, %v2633_v47  ;;  %v2862_v53 = vld [vmem:[#allocation7 + $0x190] sm:$0x3f] }
  0x64   :  { %6512 = vst [vmem:[#allocation101_spill] sm:$0xff] %v2805_v7  ;;  %v2865_v24 = vmul.f32 0.10945148, %v2650_v54  ;;  %v2868_v35 = vmul.f32 0.10945148, %v2676_v0  ;;  %v2886_v54 = vadd.f32 %v214_v34, %v2590_v29  ;;  %v6542_v29 = vld [vmem:[#allocation75_spill] sm:$0xff] }
  0x65   :  { %6513 = vst [vmem:[#allocation102_spill] sm:$0xff] %v2811_v26  ;;  %v2871_v58 = vmul.f32 0.10945148, %v2678_v1  ;;  %v2877_v47 = vmul.f32 0.10945148, %v2691_v55 }
  0x66   :  { %6514 = vst [vmem:[#allocation103_spill] sm:$0xff] %v2814_v27  ;;  %v2880_v25 = vmul.f32 0.10945148, %v2663_v59  ;;  %v2883_v3 = vmul.f32 0.10945148, %v2665_v60  ;;  %v6539_v59 = vld [vmem:[#allocation80_spill] sm:$0xff] }
  0x67   :  { %6515 = vst [vmem:[#allocation104_spill] sm:$0xff] %v2817_v13  ;;  %v2889_v0 = vmul.f32 0.10945148, %v2680_v2  ;;  %v2892_v1 = vmul.f32 0.10945148, %v2704_v57  ;;  %v6544_v2 = vld [vmem:[#allocation32_spill] sm:$0xff] }
  0x68   :  { %6516 = vst [vmem:[#allocation105_spill] sm:$0xff] %v2823_v32  ;;  %v2895_v28 = vmul.f32 0.10945148, %v2706_v48  ;;  %v2901_v55 = vmul.f32 0.10945148, %v6539_v59  ;;  %v2923_v59 = vadd.f32 %v2778_v8, %v6549_v41  ;;  %v6555_v41 = vld [vmem:[#allocation46_spill] sm:$0xff] }
  0x69   :  { %6517 = vst [vmem:[#allocation106_spill] sm:$0xff] %v2826_v33  ;;  %v2904_v60 = vmul.f32 0.10945148, %v2693_v62  ;;  %v2907_v34 = vmul.f32 0.10945148, %v6542_v29  ;;  %v6551_v29 = vld [vmem:[#allocation34_spill] sm:$0xff]  ;;  %v2946_v8 = vadd.f32 %v2799_v19, %v6555_v41 }
  0x6a   :  { %6518 = vst [vmem:[#allocation107_spill] sm:$0xff] %v2829_v18  ;;  %v2913_v57 = vmul.f32 0.10945148, %v2710_v61  ;;  %v2916_v48 = vmul.f32 0.10945148, %v2846_v44  ;;  %v6561_v19 = vld [vmem:[#allocation59_spill] sm:$0xff] }
  0x6b   :  { %6519 = vst [vmem:[#allocation108_spill] sm:$0xff] %v2835_v38  ;;  %v2919_v30 = vmul.f32 0.10945148, %v2848_v43  ;;  %v2926_v62 = vmul.f32 0.10945148, %v2862_v53 }
  0x6c   :  { %6520 = vst [vmem:[#allocation109_spill] sm:$0xff] %v2838_v39 }
  0x6d   :  { %6521 = vst [vmem:[#allocation110_spill] sm:$0xff] %v2841_v22 }
  0x6e   :  { %6522 = vst [vmem:[#allocation111_spill] sm:$0xff] %v2846_v44  ;;  %v6553_v44 = vld [vmem:[#allocation39_spill] sm:$0xff] }
  0x6f   :  { %6523 = vst [vmem:[#allocation112_spill] sm:$0xff] %v2848_v43  ;;  %v6554_v43 = vld [vmem:[#allocation40_spill] sm:$0xff] }
  0x70   :  { %6524 = vst [vmem:[#allocation113_spill] sm:$0xff] %v2851_v45 }
  0x71   :  { %6525 = vst [vmem:[#allocation114_spill] sm:$0xff] %v2854_v23 }
  0x72   :  { %6526 = vst [vmem:[#allocation115_spill] sm:$0xff] %v2857_v36 }
  0x73   :  { %6527 = vst [vmem:[#allocation116_spill] sm:$0xff] %v2862_v53  ;;  %v6556_v53 = vld [vmem:[#allocation47_spill] sm:$0xff] }
  0x74   :  { %6528 = vst [vmem:[#allocation117_spill] sm:$0xff] %v2865_v24 }
  0x75   :  { %6529 = vst [vmem:[#allocation118_spill] sm:$0xff] %v2868_v35 }
  0x76   :  { %6530 = vst [vmem:[#allocation119_spill] sm:$0xff] %v2871_v58 }
  0x77   :  { %6531 = vst [vmem:[#allocation120_spill] sm:$0xff] %v2877_v47 }
  0x78   :  { %6532 = vst [vmem:[#allocation121_spill] sm:$0xff] %v2880_v25 }
  0x79   :  { %6533 = vst [vmem:[#allocation122_spill] sm:$0xff] %v2883_v3 }
  0x7a   :  { %6534 = vst [vmem:[#allocation123_spill] sm:$0xff] %v2886_v54  ;;  %v2910_v54 = vadd.f32 %v216_v5, %v6544_v2  ;;  %v2930_v2 = vadd.f32 %v2781_v14, %v6551_v29  ;;  %v6552_v5 = vld [vmem:[#allocation38_spill] sm:$0xff]  ;;  %v2950_v29 = vadd.f32 %v2802_v20, %v6556_v53  ;;  %v6557_v14 = vld [vmem:[#allocation48_spill] sm:$0xff]  ;;  %v2970_v53 = vadd.f32 %v2823_v32, %v6561_v19 }
  0x7b   :  { %6535 = vst [vmem:[#allocation124_spill] sm:$0xff] %v2889_v0  ;;  %v2934_v61 = vadd.f32 %v2787_v12, %v6552_v5  ;;  %v2954_v5 = vadd.f32 %v2805_v7, %v6557_v14  ;;  %v6558_v12 = vld [vmem:[#allocation53_spill] sm:$0xff]  ;;  %v6562_v20 = vld [vmem:[#allocation60_spill] sm:$0xff]  ;;  %v6567_v32 = vld [vmem:[#allocation70_spill] sm:$0xff] }
  0x7c   :  { %6536 = vst [vmem:[#allocation125_spill] sm:$0xff] %v2892_v1  ;;  %v2974_v14 = vadd.f32 %v2826_v33, %v6562_v20  ;;  %v6563_v7 = vld [vmem:[#allocation61_spill] sm:$0xff]  ;;  %v2994_v20 = vadd.f32 %v2851_v45, %v6567_v32  ;;  %v6568_v33 = vld [vmem:[#allocation71_spill] sm:$0xff] }
  0x7d   :  { %6537 = vst [vmem:[#allocation126_spill] sm:$0xff] %v2895_v28  ;;  %v6574_v45 = vld [vmem:[#allocation81_spill] sm:$0xff] }
  0x7e   :  { %6538 = vst [vmem:[#allocation127_spill] sm:$0xff] %v2898_v56  ;;  %v2942_v56 = vadd.f32 %v2793_v6, %v6554_v43  ;;  %v6560_v6 = vld [vmem:[#allocation55_spill] sm:$0xff] }
  0x7f   :  { %6540 = vst [vmem:[#allocation128_spill] sm:$0xff] %v2901_v55  ;;  %v2966_v41 = vadd.f32 %v2817_v13, %v6560_v6  ;;  %v6566_v13 = vld [vmem:[#allocation67_spill] sm:$0xff] }
  0x80   :  { %6541 = vst [vmem:[#allocation129_spill] sm:$0xff] %v2904_v60  ;;  %v2990_v19 = vadd.f32 %v2841_v22, %v6566_v13  ;;  %v6573_v22 = vld [vmem:[#allocation79_spill] sm:$0xff] }
  0x81   :  { %6543 = vst [vmem:[#allocation130_spill] sm:$0xff] %v2907_v34  ;;  %v3014_v32 = vadd.f32 %v2871_v58, %v6573_v22  ;;  %v6583_v22 = vld [vmem:[#allocation85_spill] sm:$0xff] }
  0x82   :  { %6545 = vst [vmem:[#allocation32_spill] sm:$0xff] %v2910_v54  ;;  %v2938_v54 = vadd.f32 %v2790_v15, %v6553_v44  ;;  %v2958_v44 = vadd.f32 %v2811_v26, %v6558_v12  ;;  %v6559_v15 = vld [vmem:[#allocation54_spill] sm:$0xff]  ;;  %v2978_v12 = vadd.f32 %v2829_v18, %v6563_v7  ;;  %v6564_v26 = vld [vmem:[#allocation65_spill] sm:$0xff]  ;;  %v2998_v7 = vadd.f32 %v2854_v23, %v6568_v33  ;;  %v6569_v18 = vld [vmem:[#allocation72_spill] sm:$0xff] }
  0x83   :  { %6546 = vst [vmem:[#allocation131_spill] sm:$0xff] %v2913_v57  ;;  %v2962_v43 = vadd.f32 %v2814_v27, %v6559_v15  ;;  %v2982_v15 = vadd.f32 %v2835_v38, %v6564_v26  ;;  %v6565_v27 = vld [vmem:[#allocation66_spill] sm:$0xff]  ;;  %v3002_v26 = vadd.f32 %v2857_v36, %v6569_v18  ;;  %v6570_v38 = vld [vmem:[#allocation77_spill] sm:$0xff]  ;;  %v3018_v33 = vadd.f32 %v2877_v47, %v6574_v45  ;;  %v6578_v36 = vld [vmem:[#allocation83_spill] sm:$0xff] }
  0x84   :  { %6547 = vst [vmem:[#allocation132_spill] sm:$0xff] %v2916_v48  ;;  %v2986_v6 = vadd.f32 %v2838_v39, %v6565_v27  ;;  %v3006_v27 = vadd.f32 %v2865_v24, %v6570_v38  ;;  %v6571_v39 = vld [vmem:[#allocation78_spill] sm:$0xff]  ;;  %v3026_v38 = vadd.f32 %v2883_v3, %v6578_v36  ;;  %v6580_v24 = vld [vmem:[#allocation84_spill] sm:$0xff]  ;;  %v3035_v58 = vadd.f32 %v2892_v1, %v6583_v22 }
  0x85   :  { %6548 = vst [vmem:[#allocation133_spill] sm:$0xff] %v2919_v30  ;;  %v3010_v13 = vadd.f32 %v2868_v35, %v6571_v39  ;;  %v6576_v23 = vld [vmem:[#allocation82_spill] sm:$0xff]  ;;  %v3030_v39 = vadd.f32 %v2889_v0, %v6580_v24  ;;  %v6582_v35 = vld [vmem:[#allocation16_spill] sm:$0xff]  ;;  %v302_v36 = vmul.f32 0.21860483, %v2543_v9  ;;  %v6591_v0 = vld [vmem:[#allocation89_spill] sm:$0xff] }
  0x86   :  { %6550 = vst [vmem:[#allocation33_spill] sm:$0xff] %v2926_v62  ;;  %v3022_v18 = vadd.f32 %v2880_v25, %v6576_v23  ;;  %v6585_v45 = vld [vmem:[#allocation86_spill] sm:$0xff]  ;;  %v6587_v23 = vld [vmem:[#allocation87_spill] sm:$0xff]  ;;  %v6589_v3 = vld [vmem:[#allocation88_spill] sm:$0xff] }
  0x87   :  { %6572 = vst [vmem:[#allocation34_spill] sm:$0xff] %v3010_v13  ;;  %v301_v13 = vmul.f32 0.21860483, %v6582_v35  ;;  %v3039_v47 = vadd.f32 %v2895_v28, %v6585_v45  ;;  %v3043_v25 = vadd.f32 %v2901_v55, %v6587_v23  ;;  %v3048_v24 = vadd.f32 %v2904_v60, %v6589_v3  ;;  %v6593_v22 = vld [vmem:[#allocation90_spill] sm:$0xff]  ;;  %v6595_v45 = vld [vmem:[#allocation20_spill] sm:$0xff]  ;;  %v6600_v3 = vld [vmem:[#allocation93_spill] sm:$0xff] }
  0x88   :  { %6575 = vst [vmem:[#allocation38_spill] sm:$0xff] %v3018_v33  ;;  %v3052_v35 = vadd.f32 %v2907_v34, %v6591_v0  ;;  %v3056_v1 = vadd.f32 %v2913_v57, %v6593_v22  ;;  %v303_v28 = vmul.f32 0.21860483, %v6595_v45  ;;  %v6598_v55 = vld [vmem:[#allocation92_spill] sm:$0xff]  ;;  %v3069_v60 = vadd.f32 %v2926_v62, %v6600_v3  ;;  %v6602_v0 = vld [vmem:[#allocation17_spill] sm:$0xff]  ;;  %v6603_v22 = vld [vmem:[#allocation19_spill] sm:$0xff] }
  0x89   :  { %6577 = vst [vmem:[#allocation39_spill] sm:$0xff] %v3022_v18  ;;  %v3065_v9 = vadd.f32 %v2919_v30, %v6598_v55  ;;  %v304_v34 = vmul.f32 0.21860483, %v6602_v0  ;;  %v306_v57 = vmul.f32 0.21860483, %v6603_v22  ;;  %v6609_v3 = vld [vmem:[#allocation24_spill] sm:$0xff]  ;;  %v3090_v30 = vadd.f32 %v302_v36, %v2784_v10 }
  0x8a   :  { %6579 = vst [vmem:[#allocation40_spill] sm:$0xff] %v3026_v38  ;;  %v3084_v55 = vmul.f32 0.21860483, %v2559_v17  ;;  %v3087_v62 = vmul.f32 0.21860483, %v6609_v3  ;;  %v6618_v17 = vld [vmem:[#allocation28_spill] sm:$0xff] }
  0x8b   :  { %6581 = vst [vmem:[#allocation46_spill] sm:$0xff] %v3030_v39  ;;  %v3108_v3 = vmul.f32 0.21860483, %v2595_v31  ;;  %v6621_v10 = vld [vmem:[#allocation30_spill] sm:$0xff]  ;;  %v6630_v31 = vld [vmem:[#allocation37_spill] sm:$0xff]  ;;  %v6678_v18 = vld [vmem:[#allocation80_spill] sm:$0xff] }
  0x8c   :  { %6584 = vst [vmem:[#allocation16_spill] sm:$0xff] %v3035_v58  ;;  %v3111_v36 = vmul.f32 0.21860483, %v6621_v10  ;;  %v6632_v10 = vld [vmem:[#allocation41_spill] sm:$0xff]  ;;  %v6676_v38 = vld [vmem:[#allocation74_spill] sm:$0xff] }
  0x8d   :  { %6586 = vst [vmem:[#allocation134_spill] sm:$0xff] %v3039_v47  ;;  %v6596_v47 = vld [vmem:[#allocation91_spill] sm:$0xff]  ;;  %v6664_v0 = vld [vmem:[#allocation57_spill] sm:$0xff]  ;;  %v3215_v33 = vmul.f32 0.21860483, %v6678_v18  ;;  %v6691_v18 = vld [vmem:[#allocation112_spill] sm:$0xff] }
  0x8e   :  { %6588 = vst [vmem:[#allocation135_spill] sm:$0xff] %v3043_v25  ;;  %v3061_v23 = vadd.f32 %v2916_v48, %v6596_v47  ;;  %v3078_v47 = vadd.f32 %v301_v13, %v2774_v4  ;;  %v3081_v48 = vmul.f32 0.21860483, %v2557_v16  ;;  %v6615_v4 = vld [vmem:[#allocation27_spill] sm:$0xff]  ;;  %v3105_v16 = vmul.f32 0.21860483, %v6618_v17 }
  0x8f   :  { %6590 = vst [vmem:[#allocation136_spill] sm:$0xff] %v3048_v24  ;;  %v3099_v13 = vmul.f32 0.21860483, %v6615_v4  ;;  %v3120_v4 = vmul.f32 0.21860483, %v2610_v37  ;;  %v6637_v37 = vld [vmem:[#allocation43_spill] sm:$0xff] }
  0x90   :  { %6592 = vst [vmem:[#allocation137_spill] sm:$0xff] %v3052_v35  ;;  %v305_v35 = vmul.f32 0.21860483, %v2547_v11  ;;  %v3129_v17 = vmul.f32 0.21860483, %v6630_v31  ;;  %v6666_v24 = vld [vmem:[#allocation123_spill] sm:$0xff] }
  0x91   :  { %6594 = vst [vmem:[#allocation138_spill] sm:$0xff] %v3056_v1  ;;  %v6604_v1 = vld [vmem:[#allocation21_spill] sm:$0xff]  ;;  %v6668_v25 = vld [vmem:[#allocation58_spill] sm:$0xff] }
  0x92   :  { %6597 = vst [vmem:[#allocation20_spill] sm:$0xff] %v3061_v23  ;;  %v3075_v45 = vmul.f32 0.21860483, %v6604_v1  ;;  %v3096_v1 = vmul.f32 0.21860483, %v2568_v21  ;;  %v6624_v21 = vld [vmem:[#allocation31_spill] sm:$0xff] }
  0x93   :  { %6599 = vst [vmem:[#allocation139_spill] sm:$0xff] %v3065_v9  ;;  %v3132_v9 = vmul.f32 0.21860483, %v6632_v10  ;;  %v6643_v10 = vld [vmem:[#allocation51_spill] sm:$0xff]  ;;  %v6672_v58 = vld [vmem:[#allocation73_spill] sm:$0xff] }
  0x94   :  { %6601 = vst [vmem:[#allocation140_spill] sm:$0xff] %v3069_v60  ;;  %v6612_v60 = vld [vmem:[#allocation25_spill] sm:$0xff]  ;;  %v3154_v31 = vmul.f32 0.21860483, %v6643_v10  ;;  %v3183_v23 = vld [vmem:[#allocation7 + $0x1a8] sm:$0x3f] }
  0x95   :  { %6605 = vst [vmem:[#allocation141_spill] sm:$0xff] %v3075_v45  ;;  %v3093_v22 = vmul.f32 0.21860483, %v6612_v60  ;;  %v3117_v60 = vmul.f32 0.21860483, %v6624_v21 }
  0x96   :  { %6606 = vst [vmem:[#allocation142_spill] sm:$0xff] %v3078_v47  ;;  %v3102_v47 = vadd.f32 %v303_v28, %v2796_v42  ;;  %v6627_v42 = vld [vmem:[#allocation36_spill] sm:$0xff]  ;;  %v3141_v21 = vmul.f32 0.21860483, %v6637_v37  ;;  %v3205_v39 = vmul.f32 0.21860483, %v6672_v58 }
  0x97   :  { %6607 = vst [vmem:[#allocation143_spill] sm:$0xff] %v3081_v48  ;;  %v3123_v28 = vmul.f32 0.21860483, %v6627_v42  ;;  %v3144_v42 = vmul.f32 0.21860483, %v2644_v51  ;;  %v3166_v51 = vld [vmem:[#allocation7 + $0x198] sm:$0xff] }
  0x98   :  { %6608 = vst [vmem:[#allocation144_spill] sm:$0xff] %v3084_v55 }
  0x99   :  { %6610 = vst [vmem:[#allocation145_spill] sm:$0xff] %v3087_v62 }
  0x9a   :  { %6611 = vst [vmem:[#allocation146_spill] sm:$0xff] %v3090_v30  ;;  %v3114_v30 = vadd.f32 %v304_v34, %v2808_v63  ;;  %v6634_v63 = vld [vmem:[#allocation42_spill] sm:$0xff] }
  0x9b   :  { %6613 = vst [vmem:[#allocation147_spill] sm:$0xff] %v3093_v22  ;;  %v3135_v34 = vmul.f32 0.21860483, %v6634_v63  ;;  %v6645_v63 = vld [vmem:[#allocation56_spill] sm:$0xff] }
  0x9c   :  { %6614 = vst [vmem:[#allocation148_spill] sm:$0xff] %v3096_v1  ;;  %v3157_v11 = vmul.f32 0.21860483, %v6645_v63  ;;  %v3179_v63 = vadd.f32 %v3084_v55, %v2874_v46  ;;  %v3199_v46 = vmul.f32 0.21860483, %v6668_v25  ;;  %v6670_v55 = vld [vmem:[#allocation64_spill] sm:$0xff] }
  0x9d   :  { %6616 = vst [vmem:[#allocation149_spill] sm:$0xff] %v3099_v13  ;;  %v6684_v25 = vld [vmem:[#allocation75_spill] sm:$0xff] }
  0x9e   :  { %6617 = vst [vmem:[#allocation150_spill] sm:$0xff] %v3102_v47  ;;  %v3126_v47 = vadd.f32 %v305_v35, %v2820_v49  ;;  %v6640_v49 = vld [vmem:[#allocation50_spill] sm:$0xff]  ;;  %v3225_v58 = vmul.f32 0.21860483, %v6684_v25 }
  0x9f   :  { %6619 = vst [vmem:[#allocation151_spill] sm:$0xff] %v3105_v16  ;;  %v3147_v35 = vmul.f32 0.21860483, %v6640_v49  ;;  %v6651_v49 = vld [vmem:[#allocation45_spill] sm:$0xff] }
  0xa0   :  { %6620 = vst [vmem:[#allocation152_spill] sm:$0xff] %v3108_v3  ;;  %v3169_v37 = vmul.f32 0.21860483, %v6651_v49 }
  0xa1   :  { %6622 = vst [vmem:[#allocation153_spill] sm:$0xff] %v3111_v36 }
  0xa2   :  { %6623 = vst [vmem:[#allocation154_spill] sm:$0xff] %v3114_v30  ;;  %v3138_v30 = vadd.f32 %v306_v57, %v2832_v40  ;;  %v6647_v57 = vld [vmem:[#allocation44_spill] sm:$0xff] }
  0xa3   :  { %6625 = vst [vmem:[#allocation155_spill] sm:$0xff] %v3117_v60  ;;  %v3160_v40 = vmul.f32 0.21860483, %v6647_v57  ;;  %v3181_v57 = vld [vmem:[#allocation7 + $0x1a0] sm:$0xff] }
  0xa4   :  { %6626 = vst [vmem:[#allocation156_spill] sm:$0xff] %v3120_v4 }
  0xa5   :  { %6628 = vst [vmem:[#allocation157_spill] sm:$0xff] %v3123_v28 }
  0xa6   :  { %6629 = vst [vmem:[#allocation158_spill] sm:$0xff] %v3126_v47  ;;  %v3151_v47 = vadd.f32 %v3075_v45, %v2844_v50  ;;  %v6653_v50 = vld [vmem:[#allocation52_spill] sm:$0xff] }
  0xa7   :  { %6631 = vst [vmem:[#allocation159_spill] sm:$0xff] %v3129_v17  ;;  %v3172_v45 = vmul.f32 0.21860483, %v6653_v50  ;;  %v3192_v50 = vmul.f32 0.21860483, %v6664_v0 }
  0xa8   :  { %6633 = vst [vmem:[#allocation160_spill] sm:$0xff] %v3132_v9  ;;  %v3212_v0 = vmul.f32 0.21860483, %v6676_v38  ;;  %v6693_v38 = vld [vmem:[#allocation116_spill] sm:$0xff] }
  0xa9   :  { %6635 = vst [vmem:[#allocation161_spill] sm:$0xff] %v3135_v34 }
  0xaa   :  { %6636 = vst [vmem:[#allocation162_spill] sm:$0xff] %v3138_v30  ;;  %v3164_v30 = vadd.f32 %v3081_v48, %v2860_v52  ;;  %v6660_v52 = vld [vmem:[#allocation63_spill] sm:$0xff] }
  0xab   :  { %6638 = vst [vmem:[#allocation163_spill] sm:$0xff] %v3141_v21  ;;  %v3186_v48 = vmul.f32 0.21860483, %v6660_v52  ;;  %v6674_v52 = vld [vmem:[#allocation127_spill] sm:$0xff] }
  0xac   :  { %6639 = vst [vmem:[#allocation164_spill] sm:$0xff] %v3144_v42 }
  0xad   :  { %6641 = vst [vmem:[#allocation165_spill] sm:$0xff] %v3147_v35 }
  0xae   :  { %6642 = vst [vmem:[#allocation166_spill] sm:$0xff] %v3151_v47  ;;  %v6655_v47 = vld [vmem:[#allocation62_spill] sm:$0xff] }
  0xaf   :  { %6644 = vst [vmem:[#allocation167_spill] sm:$0xff] %v3154_v31  ;;  %v3175_v10 = vmul.f32 0.21860483, %v6655_v47  ;;  %v3196_v47 = vadd.f32 %v3087_v62, %v6666_v24  ;;  %v6680_v24 = vld [vmem:[#allocation69_spill] sm:$0xff] }
  0xb0   :  { %6646 = vst [vmem:[#allocation168_spill] sm:$0xff] %v3157_v11  ;;  %v3218_v62 = vmul.f32 0.21860483, %v6680_v24  ;;  %v3238_v24 = vmul.f32 0.21860483, %v6691_v18 }
  0xb1   :  { %6648 = vst [vmem:[#allocation169_spill] sm:$0xff] %v3160_v40 }
  0xb2   :  { %6649 = vst [vmem:[#allocation170_spill] sm:$0xff] %v3164_v30  ;;  %v6662_v30 = vld [vmem:[#allocation68_spill] sm:$0xff] }
  0xb3   :  { %6650 = vst [vmem:[#allocation171_spill] sm:$0xff] %v3166_v51  ;;  %v3189_v49 = vmul.f32 0.21860483, %v6662_v30  ;;  %v3209_v30 = vadd.f32 %v3093_v22, %v6674_v52  ;;  %v6688_v52 = vld [vmem:[#allocation111_spill] sm:$0xff] }
  0xb4   :  { %6652 = vst [vmem:[#allocation172_spill] sm:$0xff] %v3169_v37  ;;  %v3231_v22 = vmul.f32 0.21860483, %v6688_v52  ;;  %v3254_v52 = vmul.f32 0.21860483, %v3183_v23 }
  0xb5   :  { %6654 = vst [vmem:[#allocation173_spill] sm:$0xff] %v3172_v45 }
  0xb6   :  { %6656 = vst [vmem:[#allocation174_spill] sm:$0xff] %v3175_v10 }
  0xb7   :  { %6657 = vst [vmem:[#allocation175_spill] sm:$0xff] %v3179_v63  ;;  %v3202_v63 = vmul.f32 0.21860483, %v6670_v55 }
  0xb8   :  { %6658 = vst [vmem:[#allocation176_spill] sm:$0xff] %v3181_v57 }
  0xb9   :  { %6659 = vst [vmem:[#allocation177_spill] sm:$0xff] %v3183_v23 }
  0xba   :  { %6661 = vst [vmem:[#allocation178_spill] sm:$0xff] %v3186_v48 }
  0xbb   :  { %6663 = vst [vmem:[#allocation179_spill] sm:$0xff] %v3189_v49 }
  0xbc   :  { %6665 = vst [vmem:[#allocation180_spill] sm:$0xff] %v3192_v50 }
  0xbd   :  { %6667 = vst [vmem:[#allocation123_spill] sm:$0xff] %v3196_v47  ;;  %v6682_v47 = vld [vmem:[#allocation32_spill] sm:$0xff] }
  0xbe   :  { %6669 = vst [vmem:[#allocation181_spill] sm:$0xff] %v3199_v46  ;;  %v3222_v55 = vadd.f32 %v3096_v1, %v6682_v47  ;;  %v3244_v47 = vmul.f32 0.21860483, %v3166_v51  ;;  %v3248_v1 = vadd.f32 %v3105_v16, %v2930_v2  ;;  %v3270_v2 = vadd.f32 %v3120_v4, %v2946_v8  ;;  %v6746_v4 = vld [vmem:[#allocation26_spill] sm:$0xff] }
  0xbf   :  { %6671 = vst [vmem:[#allocation182_spill] sm:$0xff] %v3202_v63  ;;  %v3274_v16 = vadd.f32 %v3123_v28, %v2950_v29  ;;  %v3290_v8 = vadd.f32 %v3141_v21, %v2966_v41  ;;  %v3294_v29 = vadd.f32 %v3144_v42, %v2970_v53  ;;  %v3310_v41 = vadd.f32 %v3160_v40, %v2986_v6  ;;  %v6706_v40 = vld [vmem:[#allocation34_spill] sm:$0xff]  ;;  %v6736_v42 = vld [vmem:[#allocation139_spill] sm:$0xff]  ;;  %v6739_v21 = vld [vmem:[#allocation21_spill] sm:$0xff] }
  0xc0   :  { %6673 = vst [vmem:[#allocation183_spill] sm:$0xff] %v3205_v39  ;;  %v6686_v39 = vld [vmem:[#allocation76_spill] sm:$0xff]  ;;  %v3314_v53 = vadd.f32 %v3169_v37, %v2990_v19  ;;  %v3330_v6 = vadd.f32 %v3189_v49, %v3006_v27  ;;  %v3334_v19 = vadd.f32 %v3192_v50, %v6706_v40  ;;  %v6717_v49 = vld [vmem:[#allocation46_spill] sm:$0xff]  ;;  %v6745_v28 = vld [vmem:[#allocation25_spill] sm:$0xff] }
  0xc1   :  { %6675 = vst [vmem:[#allocation127_spill] sm:$0xff] %v3209_v30  ;;  %v3228_v63 = vmul.f32 0.21860483, %v6686_v39  ;;  %v3235_v30 = vadd.f32 %v3099_v13, %v2923_v59  ;;  %v3258_v59 = vadd.f32 %v3108_v3, %v2934_v61  ;;  %v3262_v13 = vadd.f32 %v3111_v36, %v2938_v54  ;;  %v6719_v50 = vld [vmem:[#allocation16_spill] sm:$0xff]  ;;  %v6749_v3 = vld [vmem:[#allocation142_spill] sm:$0xff] }
  0xc2   :  { %6677 = vst [vmem:[#allocation184_spill] sm:$0xff] %v3212_v0  ;;  %v3278_v61 = vadd.f32 %v3129_v17, %v2954_v5  ;;  %v3282_v54 = vadd.f32 %v3132_v9, %v2958_v44  ;;  %v3298_v5 = vadd.f32 %v3147_v35, %v2974_v14  ;;  %v3302_v44 = vadd.f32 %v3154_v31, %v2978_v12  ;;  %v6741_v9 = vld [vmem:[#allocation140_spill] sm:$0xff] }
  0xc3   :  { %6679 = vst [vmem:[#allocation185_spill] sm:$0xff] %v3215_v33  ;;  %v3318_v14 = vadd.f32 %v3172_v45, %v2994_v20  ;;  %v3322_v12 = vadd.f32 %v3175_v10, %v2998_v7  ;;  %v3338_v20 = vadd.f32 %v3199_v46, %v3014_v32  ;;  %v6709_v45 = vld [vmem:[#allocation38_spill] sm:$0xff]  ;;  %v6712_v10 = vld [vmem:[#allocation39_spill] sm:$0xff]  ;;  %v3354_v40 = vadd.f32 %v3215_v33, %v6717_v49  ;;  %v6729_v49 = vld [vmem:[#allocation137_spill] sm:$0xff] }
  0xc4   :  { %6681 = vst [vmem:[#allocation186_spill] sm:$0xff] %v3218_v62  ;;  %v3241_v62 = vmul.f32 0.21860483, %v6693_v38  ;;  %v6722_v46 = vld [vmem:[#allocation134_spill] sm:$0xff]  ;;  %v3375_v33 = vadd.f32 %v3238_v24, %v6729_v49  ;;  %v6748_v36 = vld [vmem:[#allocation28_spill] sm:$0xff] }
  0xc5   :  { %6683 = vst [vmem:[#allocation32_spill] sm:$0xff] %v3222_v55  ;;  %v3251_v55 = vmul.f32 0.21860483, %v3181_v57  ;;  %v6740_v49 = vld [vmem:[#allocation22_spill] sm:$0xff] }
  0xc6   :  { %6685 = vst [vmem:[#allocation75_spill] sm:$0xff] %v3225_v58  ;;  %v6710_v37 = vld [vmem:[#allocation182_spill] sm:$0xff] }
  0xc7   :  { %6687 = vst [vmem:[#allocation76_spill] sm:$0xff] %v3228_v63  ;;  %v3342_v7 = vadd.f32 %v6710_v37, %v6709_v45  ;;  %v3362_v45 = vadd.f32 %v3225_v58, %v6722_v46  ;;  %v6724_v37 = vld [vmem:[#allocation135_spill] sm:$0xff]  ;;  %v6733_v46 = vld [vmem:[#allocation20_spill] sm:$0xff] }
  0xc8   :  { %6689 = vst [vmem:[#allocation187_spill] sm:$0xff] %v3231_v22  ;;  %v3383_v58 = vadd.f32 %v3244_v47, %v6733_v46  ;;  %v6744_v46 = vld [vmem:[#allocation24_spill] sm:$0xff] }
  0xc9   :  { %6690 = vst [vmem:[#allocation188_spill] sm:$0xff] %v3235_v30  ;;  %v3266_v30 = vadd.f32 %v3117_v60, %v2942_v56  ;;  %v3286_v56 = vadd.f32 %v3135_v34, %v2962_v43  ;;  %v3306_v43 = vadd.f32 %v3157_v11, %v2982_v15  ;;  %v3326_v15 = vadd.f32 %v3186_v48, %v3002_v26  ;;  %v6713_v11 = vld [vmem:[#allocation183_spill] sm:$0xff]  ;;  %v6715_v48 = vld [vmem:[#allocation40_spill] sm:$0xff] }
  0xca   :  { %6692 = vst [vmem:[#allocation189_spill] sm:$0xff] %v3238_v24  ;;  %v3346_v26 = vadd.f32 %v6713_v11, %v6712_v10  ;;  %v3350_v27 = vadd.f32 %v3212_v0, %v6715_v48  ;;  %v3366_v10 = vadd.f32 %v3228_v63, %v6724_v37  ;;  %v6726_v11 = vld [vmem:[#allocation136_spill] sm:$0xff]  ;;  %v6728_v0 = vld [vmem:[#allocation17_spill] sm:$0xff]  ;;  %v6735_v37 = vld [vmem:[#allocation18_spill] sm:$0xff]  ;;  %v400_v34 = vmul.f32 0.27513826, %v6739_v21 }
  0xcb   :  { %6694 = vst [vmem:[#allocation190_spill] sm:$0xff] %v3241_v62  ;;  %v6720_v31 = vld [vmem:[#allocation186_spill] sm:$0xff]  ;;  %v3370_v48 = vadd.f32 %v3231_v22, %v6726_v11  ;;  %v397_v35 = vmul.f32 0.27513826, %v6728_v0  ;;  %v398_v63 = vmul.f32 0.27513826, %v6735_v37  ;;  %v3388_v11 = vadd.f32 %v3251_v55, %v6736_v42 }
  0xcc   :  { %6695 = vst [vmem:[#allocation191_spill] sm:$0xff] %v3244_v47  ;;  %v3358_v32 = vadd.f32 %v6720_v31, %v6719_v50  ;;  %v6731_v50 = vld [vmem:[#allocation138_spill] sm:$0xff]  ;;  %v6738_v22 = vld [vmem:[#allocation19_spill] sm:$0xff]  ;;  %v401_v24 = vmul.f32 0.27513826, %v6740_v49  ;;  %v6751_v49 = vld [vmem:[#allocation29_spill] sm:$0xff] }
  0xcd   :  { %6696 = vst [vmem:[#allocation192_spill] sm:$0xff] %v3251_v55  ;;  %v3379_v31 = vadd.f32 %v3241_v62, %v6731_v50  ;;  %v399_v0 = vmul.f32 0.27513826, %v6738_v22  ;;  %v3395_v50 = vadd.f32 %v3254_v52, %v6741_v9  ;;  %v6743_v62 = vld [vmem:[#allocation23_spill] sm:$0xff]  ;;  %v403_v47 = vmul.f32 0.27513826, %v6744_v46 }
  0xce   :  { %6697 = vst [vmem:[#allocation193_spill] sm:$0xff] %v3254_v52  ;;  %v402_v17 = vmul.f32 0.27513826, %v6743_v62  ;;  %v404_v37 = vmul.f32 0.27513826, %v6745_v28  ;;  %v6747_v42 = vld [vmem:[#allocation27_spill] sm:$0xff]  ;;  %v3404_v21 = vadd.f32 %v397_v35, %v6749_v3 }
  0xcf   :  { %6698 = vst [vmem:[#allocation194_spill] sm:$0xff] %v3302_v44  ;;  %v405_v60 = vmul.f32 0.27513826, %v6746_v4  ;;  %v406_v55 = vmul.f32 0.27513826, %v6747_v42  ;;  %v6753_v52 = vld [vmem:[#allocation31_spill] sm:$0xff] }
  0xd0   :  { %6699 = vst [vmem:[#allocation195_spill] sm:$0xff] %v3306_v43  ;;  %v407_v22 = vmul.f32 0.27513826, %v6748_v36  ;;  %v6754_v62 = vld [vmem:[#allocation146_spill] sm:$0xff]  ;;  %v6756_v46 = vld [vmem:[#allocation35_spill] sm:$0xff]  ;;  %v6761_v3 = vld [vmem:[#allocation41_spill] sm:$0xff] }
  0xd1   :  { %6700 = vst [vmem:[#allocation196_spill] sm:$0xff] %v3310_v41  ;;  %v411_v28 = vmul.f32 0.27513826, %v6756_v46  ;;  %v414_v35 = vmul.f32 0.27513826, %v6761_v3  ;;  %v6794_v41 = vld [vmem:[#allocation69_spill] sm:$0xff] }
  0xd2   :  { %6701 = vst [vmem:[#allocation197_spill] sm:$0xff] %v3314_v53  ;;  %v6793_v53 = vld [vmem:[#allocation80_spill] sm:$0xff]  ;;  %v6795_v43 = vld [vmem:[#allocation123_spill] sm:$0xff] }
  0xd3   :  { %6702 = vst [vmem:[#allocation198_spill] sm:$0xff] %v3318_v14  ;;  %v6798_v44 = vld [vmem:[#allocation127_spill] sm:$0xff] }
  0xd4   :  { %6703 = vst [vmem:[#allocation199_spill] sm:$0xff] %v3322_v12  ;;  %v6792_v12 = vld [vmem:[#allocation175_spill] sm:$0xff] }
  0xd5   :  { %6704 = vst [vmem:[#allocation200_spill] sm:$0xff] %v3326_v15  ;;  %v6790_v15 = vld [vmem:[#allocation73_spill] sm:$0xff]  ;;  %v3458_v14 = vadd.f32 %v405_v60, %v6792_v12  ;;  %v438_v60 = vmul.f32 0.27513826, %v6693_v38  ;;  %v6800_v12 = vld [vmem:[#allocation32_spill] sm:$0xff] }
  0xd6   :  { %6705 = vst [vmem:[#allocation201_spill] sm:$0xff] %v3330_v6  ;;  %v6785_v6 = vld [vmem:[#allocation58_spill] sm:$0xff] }
  0xd7   :  { %6707 = vst [vmem:[#allocation34_spill] sm:$0xff] %v3334_v19  ;;  %v6779_v19 = vld [vmem:[#allocation166_spill] sm:$0xff] }
  0xd8   :  { %6708 = vst [vmem:[#allocation202_spill] sm:$0xff] %v3338_v20  ;;  %v6778_v20 = vld [vmem:[#allocation63_spill] sm:$0xff] }
  0xd9   :  { %6711 = vst [vmem:[#allocation38_spill] sm:$0xff] %v3342_v7  ;;  %v6774_v7 = vld [vmem:[#allocation162_spill] sm:$0xff] }
  0xda   :  { %6714 = vst [vmem:[#allocation39_spill] sm:$0xff] %v3346_v26  ;;  %v6773_v26 = vld [vmem:[#allocation45_spill] sm:$0xff] }
  0xdb   :  { %6716 = vst [vmem:[#allocation40_spill] sm:$0xff] %v3350_v27  ;;  %v6769_v27 = vld [vmem:[#allocation158_spill] sm:$0xff] }
  0xdc   :  { %6718 = vst [vmem:[#allocation46_spill] sm:$0xff] %v3354_v40  ;;  %v6768_v40 = vld [vmem:[#allocation51_spill] sm:$0xff] }
  0xdd   :  { %6721 = vst [vmem:[#allocation16_spill] sm:$0xff] %v3358_v32  ;;  %v6764_v32 = vld [vmem:[#allocation154_spill] sm:$0xff] }
  0xde   :  { %6723 = vst [vmem:[#allocation134_spill] sm:$0xff] %v3362_v45  ;;  %v6763_v45 = vld [vmem:[#allocation43_spill] sm:$0xff] }
  0xdf   :  { %6725 = vst [vmem:[#allocation135_spill] sm:$0xff] %v3366_v10  ;;  %v6759_v10 = vld [vmem:[#allocation150_spill] sm:$0xff] }
  0xe0   :  { %6727 = vst [vmem:[#allocation136_spill] sm:$0xff] %v3370_v48  ;;  %v6758_v48 = vld [vmem:[#allocation37_spill] sm:$0xff]  ;;  %v3416_v36 = vadd.f32 %v399_v0, %v6759_v10  ;;  %v6771_v10 = vld [vmem:[#allocation56_spill] sm:$0xff] }
  0xe1   :  { %6730 = vst [vmem:[#allocation17_spill] sm:$0xff] %v3375_v33  ;;  %v6757_v33 = vld [vmem:[#allocation36_spill] sm:$0xff]  ;;  %v413_v42 = vmul.f32 0.27513826, %v6758_v48  ;;  %v3428_v48 = vadd.f32 %v401_v24, %v6769_v27  ;;  %v420_v0 = vmul.f32 0.27513826, %v6771_v10 }
  0xe2   :  { %6732 = vst [vmem:[#allocation137_spill] sm:$0xff] %v3379_v31  ;;  %v3410_v31 = vadd.f32 %v398_v63, %v6754_v62  ;;  %v412_v4 = vmul.f32 0.27513826, %v6757_v33  ;;  %v6766_v63 = vld [vmem:[#allocation49_spill] sm:$0xff]  ;;  %v419_v33 = vmul.f32 0.27513826, %v6768_v40  ;;  %v3440_v40 = vadd.f32 %v403_v47, %v6779_v19 }
  0xe3   :  { %6734 = vst [vmem:[#allocation138_spill] sm:$0xff] %v3383_v58  ;;  %v6752_v58 = vld [vmem:[#allocation30_spill] sm:$0xff]  ;;  %v417_v62 = vmul.f32 0.27513826, %v6766_v63  ;;  %v3442_v24 = vld [vmem:[#allocation7 + $0x1b0] sm:$0xff]  ;;  %v3444_v27 = vld [vmem:[#allocation7 + $0x1b8] sm:$0xff] }
  0xe4   :  { %6737 = vst [vmem:[#allocation20_spill] sm:$0xff] %v3388_v11  ;;  %v408_v11 = vmul.f32 0.27513826, %v6751_v49  ;;  %v409_v9 = vmul.f32 0.27513826, %v6752_v58  ;;  %v6783_v10 = vld [vmem:[#allocation68_spill] sm:$0xff]  ;;  %v460_v38 = vadd.f32 %v412_v4, %v3262_v13 }
  0xe5   :  { %6742 = vst [vmem:[#allocation18_spill] sm:$0xff] %v3395_v50  ;;  %v410_v50 = vmul.f32 0.27513826, %v6753_v52  ;;  %v416_v58 = vmul.f32 0.27513826, %v6763_v45  ;;  %v3422_v52 = vadd.f32 %v400_v34, %v6764_v32  ;;  %v3434_v45 = vadd.f32 %v402_v17, %v6774_v7  ;;  %v6776_v34 = vld [vmem:[#allocation52_spill] sm:$0xff] }
  0xe6   :  { %6750 = vst [vmem:[#allocation139_spill] sm:$0xff] %v3404_v21  ;;  %v6762_v21 = vld [vmem:[#allocation42_spill] sm:$0xff]  ;;  %v423_v32 = vmul.f32 0.27513826, %v6776_v34  ;;  %v428_v17 = vmul.f32 0.27513826, %v6785_v6 }
  0xe7   :  { %6755 = vst [vmem:[#allocation19_spill] sm:$0xff] %v3410_v31  ;;  %v415_v49 = vmul.f32 0.27513826, %v6762_v21  ;;  %v6767_v31 = vld [vmem:[#allocation50_spill] sm:$0xff]  ;;  %v422_v21 = vmul.f32 0.27513826, %v6773_v26 }
  0xe8   :  { %6760 = vst [vmem:[#allocation21_spill] sm:$0xff] %v3416_v36  ;;  %v418_v46 = vmul.f32 0.27513826, %v6767_v31  ;;  %v6772_v36 = vld [vmem:[#allocation44_spill] sm:$0xff]  ;;  %v425_v31 = vmul.f32 0.27513826, %v6778_v20 }
  0xe9   :  { %6765 = vst [vmem:[#allocation22_spill] sm:$0xff] %v3422_v52  ;;  %v421_v3 = vmul.f32 0.27513826, %v6772_v36  ;;  %v6777_v52 = vld [vmem:[#allocation62_spill] sm:$0xff]  ;;  %v426_v36 = vmul.f32 0.27513826, %v6783_v10 }
  0xea   :  { %6770 = vst [vmem:[#allocation140_spill] sm:$0xff] %v3428_v48  ;;  %v424_v63 = vmul.f32 0.27513826, %v6777_v52  ;;  %v6784_v48 = vld [vmem:[#allocation57_spill] sm:$0xff]  ;;  %v6786_v7 = vld [vmem:[#allocation170_spill] sm:$0xff]  ;;  %v6789_v52 = vld [vmem:[#allocation64_spill] sm:$0xff] }
  0xeb   :  { %6775 = vst [vmem:[#allocation23_spill] sm:$0xff] %v3434_v45  ;;  %v427_v26 = vmul.f32 0.27513826, %v6784_v48  ;;  %v3450_v45 = vadd.f32 %v404_v37, %v6786_v7  ;;  %v3452_v34 = vld [vmem:[#allocation7 + $0x1c0] sm:$0x3f]  ;;  %v3464_v37 = vadd.f32 %v406_v55, %v6795_v43  ;;  %v6804_v4 = vld [vmem:[#allocation196_spill] sm:$0xff] }
  0xec   :  { %6780 = vst [vmem:[#allocation24_spill] sm:$0xff] %v3440_v40  ;;  %v429_v20 = vmul.f32 0.27513826, %v6789_v52  ;;  %v430_v47 = vmul.f32 0.27513826, %v6790_v15  ;;  %v6791_v19 = vld [vmem:[#allocation74_spill] sm:$0xff] }
  0xed   :  { %6781 = vst [vmem:[#allocation25_spill] sm:$0xff] %v3442_v24  ;;  %v431_v40 = vmul.f32 0.27513826, %v6791_v19  ;;  %v432_v10 = vmul.f32 0.27513826, %v6793_v53  ;;  %v3470_v19 = vadd.f32 %v407_v22, %v6798_v44  ;;  %v458_v44 = vadd.f32 %v410_v50, %v3248_v1  ;;  %v6802_v50 = vld [vmem:[#allocation194_spill] sm:$0xff] }
  0xee   :  { %6782 = vst [vmem:[#allocation26_spill] sm:$0xff] %v3444_v27  ;;  %v433_v48 = vmul.f32 0.27513826, %v6794_v41  ;;  %v434_v6 = vmul.f32 0.27513826, %v6684_v25  ;;  %v456_v25 = vadd.f32 %v408_v11, %v6800_v12  ;;  %v459_v22 = vadd.f32 %v411_v28, %v3258_v59  ;;  %v6803_v28 = vld [vmem:[#allocation195_spill] sm:$0xff] }
  0xef   :  { %6787 = vst [vmem:[#allocation27_spill] sm:$0xff] %v3450_v45  ;;  %v435_v7 = vmul.f32 0.27513826, %v6686_v39  ;;  %v6797_v45 = vld [vmem:[#allocation111_spill] sm:$0xff]  ;;  %v437_v15 = vmul.f32 0.27513826, %v6691_v18  ;;  %v462_v11 = vadd.f32 %v414_v35, %v3270_v2  ;;  %v463_v12 = vadd.f32 %v415_v49, %v3274_v16 }
  0xf0   :  { %6788 = vst [vmem:[#allocation28_spill] sm:$0xff] %v3452_v34  ;;  %v436_v52 = vmul.f32 0.27513826, %v6797_v45  ;;  %v439_v53 = vmul.f32 0.27513826, %v3166_v51  ;;  %v6801_v45 = vld [vmem:[#allocation188_spill] sm:$0xff]  ;;  %v465_v51 = vadd.f32 %v417_v62, %v3282_v54  ;;  %v468_v1 = vadd.f32 %v420_v0, %v3294_v29 }
  0xf1   :  { %6796 = vst [vmem:[#allocation142_spill] sm:$0xff] %v3464_v37  ;;  %v440_v41 = vmul.f32 0.27513826, %v3181_v57  ;;  %v441_v55 = vmul.f32 0.27513826, %v3183_v23  ;;  %v457_v37 = vadd.f32 %v409_v9, %v6801_v45  ;;  %v461_v57 = vadd.f32 %v413_v42, %v3266_v30  ;;  %v6805_v42 = vld [vmem:[#allocation197_spill] sm:$0xff] }
  0xf2   :  { %6799 = vst [vmem:[#allocation29_spill] sm:$0xff] %v3470_v19  ;;  %v442_v43 = vmul.f32 0.27513826, %v3442_v24  ;;  %v443_v39 = vmul.f32 0.27513826, %v3444_v27  ;;  %v464_v23 = vadd.f32 %v416_v58, %v3278_v61  ;;  %v466_v9 = vadd.f32 %v418_v46, %v3286_v56  ;;  %v6806_v35 = vld [vmem:[#allocation198_spill] sm:$0xff] }
  0xf3   :  { %v444_v18 = vmul.f32 0.27513826, %v3452_v34  ;;  %v467_v45 = vadd.f32 %v419_v33, %v3290_v8  ;;  %v469_v59 = vadd.f32 %v421_v3, %v3298_v5  ;;  %v470_v13 = vadd.f32 %v422_v21, %v6802_v50  ;;  %v6807_v49 = vld [vmem:[#allocation199_spill] sm:$0xff]  ;;  %v6808_v58 = vld [vmem:[#allocation200_spill] sm:$0xff]  ;;  %v6809_v62 = vld [vmem:[#allocation201_spill] sm:$0xff] }
  0xf4   :  { %v471_v30 = vadd.f32 %v423_v32, %v6803_v28  ;;  %v472_v2 = vadd.f32 %v424_v63, %v6804_v4  ;;  %v473_v16 = vadd.f32 %v425_v31, %v6805_v42  ;;  %v474_v61 = vadd.f32 %v426_v36, %v6806_v35  ;;  %v6810_v46 = vld [vmem:[#allocation34_spill] sm:$0xff]  ;;  %v3504_v21 = vld [vmem:[#allocation7 + $0x1c8] sm:$0xff]  ;;  %v6815_v50 = vld [vmem:[#allocation40_spill] sm:$0xff] }
  0xf5   :  { %v475_v54 = vadd.f32 %v427_v26, %v6807_v49  ;;  %v476_v56 = vadd.f32 %v428_v17, %v6808_v58  ;;  %v477_v8 = vadd.f32 %v429_v20, %v6809_v62  ;;  %v478_v29 = vadd.f32 %v430_v47, %v6810_v46  ;;  %v6811_v33 = vld [vmem:[#allocation202_spill] sm:$0xff]  ;;  %6813 = vst [vmem:[#allocation30_spill] sm:$0xff] %v3504_v21  ;;  %v6814_v32 = vld [vmem:[#allocation39_spill] sm:$0xff]  ;;  %v6817_v4 = vld [vmem:[#allocation16_spill] sm:$0xff] }
  0xf6   :  { %v479_v5 = vadd.f32 %v431_v40, %v6811_v33  ;;  %v6812_v0 = vld [vmem:[#allocation38_spill] sm:$0xff]  ;;  %v481_v63 = vadd.f32 %v433_v48, %v6814_v32  ;;  %v482_v31 = vadd.f32 %v434_v6, %v6815_v50  ;;  %v484_v26 = vadd.f32 %v436_v52, %v6817_v4  ;;  %v3510_v42 = vld [vmem:[#allocation7 + $0x1d0] sm:$0xff]  ;;  %v3512_v17 = vld [vmem:[#allocation7 + $0x1d8] sm:$0x3f] }
  0xf7   :  { %v480_v3 = vadd.f32 %v432_v10, %v6812_v0  ;;  %v6816_v28 = vld [vmem:[#allocation46_spill] sm:$0xff]  ;;  %6818 = vst [vmem:[#allocation31_spill] sm:$0xff] %v3510_v42  ;;  %v6821_v35 = vld [vmem:[#allocation135_spill] sm:$0xff]  ;;  %v6822_v49 = vld [vmem:[#allocation136_spill] sm:$0xff]  ;;  %v493_v52 = vmul.f32 0.21860483, %v3442_v24 }
  0xf8   :  { %v483_v36 = vadd.f32 %v435_v7, %v6816_v28  ;;  %6819 = vst [vmem:[#allocation146_spill] sm:$0xff] %v3512_v17  ;;  %v6820_v20 = vld [vmem:[#allocation134_spill] sm:$0xff]  ;;  %v486_v40 = vadd.f32 %v438_v60, %v6821_v35  ;;  %v487_v10 = vadd.f32 %v439_v53, %v6822_v49  ;;  %v6823_v58 = vld [vmem:[#allocation17_spill] sm:$0xff]  ;;  %v6826_v0 = vld [vmem:[#allocation20_spill] sm:$0xff]  ;;  %v494_v28 = vmul.f32 0.21860483, %v3444_v27 }
  0xf9   :  { %v485_v47 = vadd.f32 %v437_v15, %v6820_v20  ;;  %v488_v62 = vadd.f32 %v440_v41, %v6823_v58  ;;  %v6824_v46 = vld [vmem:[#allocation137_spill] sm:$0xff]  ;;  %v6825_v33 = vld [vmem:[#allocation138_spill] sm:$0xff]  ;;  %v491_v7 = vadd.f32 %v443_v39, %v6826_v0  ;;  %v495_v15 = vmul.f32 0.21860483, %v3452_v34  ;;  %v6831_v35 = vld [vmem:[#allocation19_spill] sm:$0xff] }
  0xfa   :  { %v489_v48 = vadd.f32 %v441_v55, %v6824_v46  ;;  %v490_v6 = vadd.f32 %v442_v43, %v6825_v33  ;;  %v6827_v32 = vld [vmem:[#allocation18_spill] sm:$0xff]  ;;  %v496_v60 = vmul.f32 0.21860483, %v3504_v21  ;;  %v497_v53 = vmul.f32 0.21860483, %v3510_v42  ;;  %v6828_v4 = vld [vmem:[#allocation141_spill] sm:$0xff] }
  0xfb   :  { %v492_v50 = vadd.f32 %v444_v18, %v6827_v32  ;;  %v498_v41 = vmul.f32 0.21860483, %v3512_v17  ;;  %v6829_v55 = vld [vmem:[#allocation139_spill] sm:$0xff]  ;;  %v6832_v49 = vld [vmem:[#allocation144_spill] sm:$0xff]  ;;  %v6833_v58 = vld [vmem:[#allocation21_spill] sm:$0xff] }
  0xfc   :  { %v499_v20 = vadd.f32 %v6829_v55, %v6828_v4  ;;  %v6830_v43 = vld [vmem:[#allocation143_spill] sm:$0xff]  ;;  %v501_v46 = vadd.f32 %v6833_v58, %v6832_v49  ;;  %v6834_v18 = vld [vmem:[#allocation145_spill] sm:$0xff]  ;;  %v6835_v33 = vld [vmem:[#allocation22_spill] sm:$0xff] }
  0xfd   :  { %v500_v39 = vadd.f32 %v6831_v35, %v6830_v43  ;;  %v3536_v0 = vadd.f32 %v6835_v33, %v6834_v18  ;;  %v6836_v32 = vld [vmem:[#allocation147_spill] sm:$0xff]  ;;  %v6837_v34 = vld [vmem:[#allocation140_spill] sm:$0xff]  ;;  %v6842_v24 = vld [vmem:[#allocation149_spill] sm:$0xff] }
  0xfe   :  { %v3540_v21 = vadd.f32 %v6837_v34, %v6836_v32  ;;  %v6839_v42 = vld [vmem:[#allocation148_spill] sm:$0xff]  ;;  %v6840_v27 = vld [vmem:[#allocation23_spill] sm:$0xff]  ;;  %v6849_v18 = vld [vmem:[#allocation153_spill] sm:$0xff] }
  0xff   :  { %v3544_v17 = vadd.f32 %v6840_v27, %v6839_v42  ;;  %v6843_v4 = vld [vmem:[#allocation24_spill] sm:$0xff]  ;;  %v6844_v43 = vld [vmem:[#allocation151_spill] sm:$0xff]  ;;  %v6850_v33 = vld [vmem:[#allocation142_spill] sm:$0xff] }
 0x100   :  { %6838 = vst [vmem:[#allocation35_spill] sm:$0xff] %v3540_v21  ;;  %v3548_v55 = vadd.f32 %v6843_v4, %v6842_v24  ;;  %v6845_v35 = vld [vmem:[#allocation27_spill] sm:$0xff]  ;;  %v6847_v49 = vld [vmem:[#allocation152_spill] sm:$0xff]  ;;  %v3560_v34 = vadd.f32 %v6850_v33, %v6849_v18  ;;  %v6852_v21 = vld [vmem:[#allocation29_spill] sm:$0xff] }
 0x101   :  { %6841 = vst [vmem:[#allocation36_spill] sm:$0xff] %v3544_v17  ;;  %v3552_v19 = vadd.f32 %v6845_v35, %v6844_v43  ;;  %v3556_v58 = vadd.f32 %v3458_v14, %v6847_v49  ;;  %v6851_v32 = vld [vmem:[#allocation155_spill] sm:$0xff]  ;;  %v6853_v42 = vld [vmem:[#allocation156_spill] sm:$0xff]  ;;  %v6854_v24 = vld [vmem:[#allocation157_spill] sm:$0xff] }
 0x102   :  { %v3564_v27 = vadd.f32 %v6852_v21, %v6851_v32  ;;  %v3567_v17 = vadd.f32 %v456_v25, %v6853_v42  ;;  %v3570_v4 = vadd.f32 %v457_v37, %v6854_v24  ;;  %v6855_v43 = vld [vmem:[#allocation159_spill] sm:$0xff]  ;;  %v6857_v49 = vld [vmem:[#allocation161_spill] sm:$0xff]  ;;  %v6859_v21 = vld [vmem:[#allocation164_spill] sm:$0xff] }
 0x103   :  { %6846 = vst [vmem:[#allocation37_spill] sm:$0xff] %v3552_v19  ;;  %v3573_v35 = vadd.f32 %v458_v44, %v6855_v43  ;;  %v6856_v19 = vld [vmem:[#allocation160_spill] sm:$0xff]  ;;  %v6858_v18 = vld [vmem:[#allocation163_spill] sm:$0xff]  ;;  %v3585_v32 = vadd.f32 %v462_v11, %v6859_v21  ;;  %v6860_v25 = vld [vmem:[#allocation165_spill] sm:$0xff] }
 0x104   :  { %6848 = vst [vmem:[#allocation150_spill] sm:$0xff] %v3556_v58  ;;  %v3576_v14 = vadd.f32 %v459_v22, %v6856_v19  ;;  %v3579_v58 = vadd.f32 %v460_v38, %v6857_v49  ;;  %v3582_v33 = vadd.f32 %v461_v57, %v6858_v18  ;;  %v3588_v42 = vadd.f32 %v463_v12, %v6860_v25  ;;  %v6861_v37 = vld [vmem:[#allocation167_spill] sm:$0xff]  ;;  %v6862_v44 = vld [vmem:[#allocation168_spill] sm:$0xff]  ;;  %v6863_v19 = vld [vmem:[#allocation169_spill] sm:$0xff] }
 0x105   :  { %v3591_v24 = vadd.f32 %v464_v23, %v6861_v37  ;;  %v3594_v43 = vadd.f32 %v465_v51, %v6862_v44  ;;  %v3597_v22 = vadd.f32 %v466_v9, %v6863_v19  ;;  %v6864_v38 = vld [vmem:[#allocation172_spill] sm:$0xff]  ;;  %v6865_v57 = vld [vmem:[#allocation173_spill] sm:$0xff]  ;;  %v6866_v11 = vld [vmem:[#allocation174_spill] sm:$0xff] }
 0x106   :  { %v3600_v49 = vadd.f32 %v467_v45, %v6864_v38  ;;  %v3603_v18 = vadd.f32 %v468_v1, %v6865_v57  ;;  %v3606_v21 = vadd.f32 %v469_v59, %v6866_v11  ;;  %v6867_v12 = vld [vmem:[#allocation178_spill] sm:$0xff]  ;;  %v6868_v23 = vld [vmem:[#allocation179_spill] sm:$0xff]  ;;  %v6869_v51 = vld [vmem:[#allocation180_spill] sm:$0xff] }
 0x107   :  { %v3609_v25 = vadd.f32 %v470_v13, %v6867_v12  ;;  %v3612_v37 = vadd.f32 %v471_v30, %v6868_v23  ;;  %v3615_v44 = vadd.f32 %v472_v2, %v6869_v51  ;;  %v6870_v9 = vld [vmem:[#allocation181_spill] sm:$0xff]  ;;  %v6871_v45 = vld [vmem:[#allocation182_spill] sm:$0xff]  ;;  %v6872_v1 = vld [vmem:[#allocation183_spill] sm:$0xff] }
 0x108   :  { %v3618_v19 = vadd.f32 %v473_v16, %v6870_v9  ;;  %v3621_v38 = vadd.f32 %v474_v61, %v6871_v45  ;;  %v3624_v57 = vadd.f32 %v475_v54, %v6872_v1  ;;  %v6873_v59 = vld [vmem:[#allocation184_spill] sm:$0xff]  ;;  %v6874_v13 = vld [vmem:[#allocation185_spill] sm:$0xff]  ;;  %v6875_v30 = vld [vmem:[#allocation186_spill] sm:$0xff] }
 0x109   :  { %v3627_v11 = vadd.f32 %v476_v56, %v6873_v59  ;;  %v3630_v12 = vadd.f32 %v477_v8, %v6874_v13  ;;  %v3633_v23 = vadd.f32 %v478_v29, %v6875_v30  ;;  %v6876_v2 = vld [vmem:[#allocation75_spill] sm:$0xff]  ;;  %v6877_v16 = vld [vmem:[#allocation76_spill] sm:$0xff]  ;;  %v6881_v54 = vld [vmem:[#allocation189_spill] sm:$0xff] }
 0x10a   :  { %v3636_v51 = vadd.f32 %v479_v5, %v6876_v2  ;;  %v3639_v9 = vadd.f32 %v480_v3, %v6877_v16  ;;  %v6879_v61 = vld [vmem:[#allocation187_spill] sm:$0xff]  ;;  %v3645_v1 = vadd.f32 %v482_v31, %v6881_v54  ;;  %v6883_v56 = vld [vmem:[#allocation190_spill] sm:$0xff]  ;;  %v6887_v29 = vld [vmem:[#allocation192_spill] sm:$0xff]  ;;  %v543_v31 = vadd.f32 %v495_v15, %v489_v48 }
 0x10b   :  { %v3642_v45 = vadd.f32 %v481_v63, %v6879_v61  ;;  %v3648_v59 = vadd.f32 %v483_v36, %v6883_v56  ;;  %v6885_v8 = vld [vmem:[#allocation191_spill] sm:$0xff]  ;;  %v3654_v30 = vadd.f32 %v485_v47, %v6887_v29  ;;  %v6889_v5 = vld [vmem:[#allocation193_spill] sm:$0xff]  ;;  %v3659_v3 = vld [vmem:[#allocation7 + $0x1e0] sm:$0xff]  ;;  %v541_v63 = vadd.f32 %v493_v52, %v487_v10 }
 0x10c   :  { %6878 = vst [vmem:[#allocation41_spill] sm:$0xff] %v3639_v9  ;;  %v3651_v13 = vadd.f32 %v484_v26, %v6885_v8  ;;  %v3657_v2 = vadd.f32 %v486_v40, %v6889_v5  ;;  %v3661_v16 = vld [vmem:[#allocation7 + $0x1e8] sm:$0xff]  ;;  %v542_v61 = vadd.f32 %v494_v28, %v488_v62  ;;  %v544_v54 = vadd.f32 %v496_v60, %v490_v6  ;;  %v6896_v29 = vld [vmem:[#allocation177_spill] sm:$0xff]  ;;  %v6900_v10 = vld [vmem:[#allocation28_spill] sm:$0xff] }
 0x10d   :  { %6880 = vst [vmem:[#allocation42_spill] sm:$0xff] %v3642_v45  ;;  %v545_v36 = vadd.f32 %v497_v53, %v491_v7  ;;  %v546_v56 = vadd.f32 %v498_v41, %v492_v50  ;;  %v6894_v26 = vld [vmem:[#allocation171_spill] sm:$0xff]  ;;  %v6897_v40 = vld [vmem:[#allocation25_spill] sm:$0xff]  ;;  %v6899_v45 = vld [vmem:[#allocation94_spill] sm:$0xff]  ;;  %v552_v62 = vmul.f32 0.10945148, %v6900_v10 }
 0x10e   :  { %6882 = vst [vmem:[#allocation43_spill] sm:$0xff] %v3645_v1  ;;  %v3663_v1 = vld [vmem:[#allocation7 + $0x1f0] sm:$0x3f]  ;;  %v547_v8 = vmul.f32 0.10945148, %v6894_v26  ;;  %v3671_v9 = vadd.f32 %v499_v20, %v6899_v45  ;;  %v6901_v48 = vld [vmem:[#allocation30_spill] sm:$0xff] }
 0x10f   :  { %6884 = vst [vmem:[#allocation154_spill] sm:$0xff] %v3648_v59  ;;  %v550_v5 = vmul.f32 0.10945148, %v6897_v40  ;;  %v553_v6 = vmul.f32 0.10945148, %v6901_v48  ;;  %v6902_v52 = vld [vmem:[#allocation31_spill] sm:$0xff] }
 0x110   :  { %6886 = vst [vmem:[#allocation49_spill] sm:$0xff] %v3651_v13  ;;  %v6895_v13 = vld [vmem:[#allocation176_spill] sm:$0xff]  ;;  %v554_v7 = vmul.f32 0.10945148, %v6902_v52  ;;  %v6903_v50 = vld [vmem:[#allocation95_spill] sm:$0xff]  ;;  %v6905_v15 = vld [vmem:[#allocation146_spill] sm:$0xff] }
 0x111   :  { %6888 = vst [vmem:[#allocation50_spill] sm:$0xff] %v3654_v30  ;;  %v548_v47 = vmul.f32 0.10945148, %v6895_v13  ;;  %v549_v30 = vmul.f32 0.10945148, %v6896_v29  ;;  %v3677_v28 = vadd.f32 %v500_v39, %v6903_v50  ;;  %v6906_v40 = vld [vmem:[#allocation96_spill] sm:$0xff] }
 0x112   :  { %6890 = vst [vmem:[#allocation51_spill] sm:$0xff] %v3657_v2  ;;  %v6898_v2 = vld [vmem:[#allocation26_spill] sm:$0xff]  ;;  %v555_v60 = vmul.f32 0.10945148, %v6905_v15  ;;  %v556_v53 = vmul.f32 0.10945148, %v3659_v3 }
 0x113   :  { %6891 = vst [vmem:[#allocation158_spill] sm:$0xff] %v3659_v3  ;;  %v551_v59 = vmul.f32 0.10945148, %v6898_v2  ;;  %v557_v41 = vmul.f32 0.10945148, %v3661_v16  ;;  %v3683_v2 = vadd.f32 %v501_v46, %v6906_v40  ;;  %v6908_v45 = vld [vmem:[#allocation97_spill] sm:$0xff] }
 0x114   :  { %6892 = vst [vmem:[#allocation56_spill] sm:$0xff] %v3661_v16  ;;  %v558_v20 = vmul.f32 0.10945148, %v3663_v1  ;;  %v3688_v10 = vadd.f32 %v3536_v0, %v6908_v45  ;;  %v6909_v48 = vld [vmem:[#allocation98_spill] sm:$0xff]  ;;  %v6910_v52 = vld [vmem:[#allocation35_spill] sm:$0xff]  ;;  %v6912_v50 = vld [vmem:[#allocation36_spill] sm:$0xff] }
 0x115   :  { %6893 = vst [vmem:[#allocation44_spill] sm:$0xff] %v3663_v1  ;;  %v3692_v29 = vadd.f32 %v6910_v52, %v6909_v48  ;;  %v6911_v39 = vld [vmem:[#allocation99_spill] sm:$0xff]  ;;  %v6913_v3 = vld [vmem:[#allocation100_spill] sm:$0xff]  ;;  %v6914_v46 = vld [vmem:[#allocation101_spill] sm:$0xff] }
 0x116   :  { %6904 = vst [vmem:[#allocation45_spill] sm:$0xff] %v3677_v28  ;;  %v3696_v15 = vadd.f32 %v6912_v50, %v6911_v39  ;;  %v3700_v16 = vadd.f32 %v3548_v55, %v6913_v3  ;;  %v6915_v40 = vld [vmem:[#allocation37_spill] sm:$0xff]  ;;  %v6916_v1 = vld [vmem:[#allocation102_spill] sm:$0xff]  ;;  %v6918_v45 = vld [vmem:[#allocation103_spill] sm:$0xff] }
 0x117   :  { %6907 = vst [vmem:[#allocation162_spill] sm:$0xff] %v3683_v2  ;;  %v3704_v2 = vadd.f32 %v6915_v40, %v6914_v46  ;;  %v6917_v28 = vld [vmem:[#allocation150_spill] sm:$0xff]  ;;  %v3712_v48 = vadd.f32 %v3560_v34, %v6918_v45  ;;  %v6919_v52 = vld [vmem:[#allocation104_spill] sm:$0xff]  ;;  %v6920_v50 = vld [vmem:[#allocation105_spill] sm:$0xff] }
 0x118   :  { %v3708_v0 = vadd.f32 %v6917_v28, %v6916_v1  ;;  %v3716_v39 = vadd.f32 %v3564_v27, %v6919_v52  ;;  %v3720_v55 = vadd.f32 %v3567_v17, %v6920_v50  ;;  %v6921_v3 = vld [vmem:[#allocation106_spill] sm:$0xff]  ;;  %v6922_v40 = vld [vmem:[#allocation107_spill] sm:$0xff]  ;;  %v6923_v28 = vld [vmem:[#allocation108_spill] sm:$0xff] }
 0x119   :  { %v3724_v46 = vadd.f32 %v3570_v4, %v6921_v3  ;;  %v3728_v1 = vadd.f32 %v3573_v35, %v6922_v40  ;;  %v3732_v34 = vadd.f32 %v3576_v14, %v6923_v28  ;;  %v6924_v45 = vld [vmem:[#allocation109_spill] sm:$0xff]  ;;  %v6925_v52 = vld [vmem:[#allocation110_spill] sm:$0xff]  ;;  %v6928_v40 = vld [vmem:[#allocation115_spill] sm:$0xff] }
 0x11a   :  { %v3736_v27 = vadd.f32 %v3579_v58, %v6924_v45  ;;  %v3740_v17 = vadd.f32 %v3582_v33, %v6925_v52  ;;  %v6926_v50 = vld [vmem:[#allocation113_spill] sm:$0xff]  ;;  %v6927_v3 = vld [vmem:[#allocation114_spill] sm:$0xff]  ;;  %v3752_v14 = vadd.f32 %v3591_v24, %v6928_v40  ;;  %v6932_v52 = vld [vmem:[#allocation119_spill] sm:$0xff] }
 0x11b   :  { %v3744_v4 = vadd.f32 %v3585_v32, %v6926_v50  ;;  %v3748_v35 = vadd.f32 %v3588_v42, %v6927_v3  ;;  %v6929_v28 = vld [vmem:[#allocation117_spill] sm:$0xff]  ;;  %v6931_v45 = vld [vmem:[#allocation118_spill] sm:$0xff]  ;;  %v3764_v32 = vadd.f32 %v3600_v49, %v6932_v52  ;;  %v6933_v50 = vld [vmem:[#allocation120_spill] sm:$0xff] }
 0x11c   :  { %v3756_v58 = vadd.f32 %v3594_v43, %v6929_v28  ;;  %v3760_v33 = vadd.f32 %v3597_v22, %v6931_v45  ;;  %v3768_v42 = vadd.f32 %v3603_v18, %v6933_v50  ;;  %v6935_v3 = vld [vmem:[#allocation121_spill] sm:$0xff]  ;;  %v6936_v40 = vld [vmem:[#allocation122_spill] sm:$0xff]  ;;  %v6937_v28 = vld [vmem:[#allocation124_spill] sm:$0xff] }
 0x11d   :  { %v3772_v24 = vadd.f32 %v3606_v21, %v6935_v3  ;;  %v3776_v43 = vadd.f32 %v3609_v25, %v6936_v40  ;;  %v3780_v22 = vadd.f32 %v3612_v37, %v6937_v28  ;;  %v6939_v45 = vld [vmem:[#allocation125_spill] sm:$0xff]  ;;  %v6940_v52 = vld [vmem:[#allocation126_spill] sm:$0xff]  ;;  %v6941_v18 = vld [vmem:[#allocation128_spill] sm:$0xff] }
 0x11e   :  { %6930 = vst [vmem:[#allocation52_spill] sm:$0xff] %v3756_v58  ;;  %v586_v49 = vadd.f32 %v3615_v44, %v6939_v45  ;;  %v587_v58 = vadd.f32 %v3618_v19, %v6940_v52  ;;  %v3788_v50 = vadd.f32 %v3621_v38, %v6941_v18  ;;  %v6943_v21 = vld [vmem:[#allocation129_spill] sm:$0xff]  ;;  %v6945_v40 = vld [vmem:[#allocation131_spill] sm:$0xff]  ;;  %v6947_v28 = vld [vmem:[#allocation132_spill] sm:$0xff] }
 0x11f   :  { %6934 = vst [vmem:[#allocation62_spill] sm:$0xff] %v3768_v42  ;;  %v589_v3 = vadd.f32 %v3624_v57, %v6943_v21  ;;  %v6944_v42 = vld [vmem:[#allocation130_spill] sm:$0xff]  ;;  %v3796_v37 = vadd.f32 %v3630_v12, %v6945_v40  ;;  %v592_v44 = vadd.f32 %v3633_v23, %v6947_v28  ;;  %v6948_v45 = vld [vmem:[#allocation133_spill] sm:$0xff]  ;;  %v6953_v57 = vld [vmem:[#allocation43_spill] sm:$0xff] }
 0x120   :  { %6938 = vst [vmem:[#allocation63_spill] sm:$0xff] %v3780_v22  ;;  %v590_v25 = vadd.f32 %v3627_v11, %v6944_v42  ;;  %v593_v19 = vadd.f32 %v3636_v51, %v6948_v45  ;;  %v6949_v52 = vld [vmem:[#allocation33_spill] sm:$0xff]  ;;  %v6952_v18 = vld [vmem:[#allocation42_spill] sm:$0xff]  ;;  %v3808_v21 = vadd.f32 %v548_v47, %v6953_v57  ;;  %v6958_v28 = vld [vmem:[#allocation51_spill] sm:$0xff]  ;;  %v3822_v45 = vadd.f32 %v553_v6, %v541_v63 }
 0x121   :  { %6942 = vst [vmem:[#allocation166_spill] sm:$0xff] %v3788_v50  ;;  %v6950_v22 = vld [vmem:[#allocation41_spill] sm:$0xff]  ;;  %v595_v50 = vadd.f32 %v547_v8, %v6952_v18  ;;  %v6954_v11 = vld [vmem:[#allocation154_spill] sm:$0xff]  ;;  %v3820_v51 = vadd.f32 %v552_v62, %v6958_v28  ;;  %v3826_v8 = vadd.f32 %v555_v60, %v543_v31  ;;  %v3828_v47 = vadd.f32 %v556_v53, %v544_v54  ;;  %v6962_v57 = vld [vmem:[#allocation111_spill] sm:$0xff] }
 0x122   :  { %6946 = vst [vmem:[#allocation68_spill] sm:$0xff] %v3796_v37  ;;  %v3804_v38 = vadd.f32 %v6950_v22, %v6949_v52  ;;  %v3811_v42 = vadd.f32 %v549_v30, %v6954_v11  ;;  %v6956_v12 = vld [vmem:[#allocation49_spill] sm:$0xff]  ;;  %v6957_v37 = vld [vmem:[#allocation50_spill] sm:$0xff]  ;;  %v3824_v22 = vadd.f32 %v554_v7, %v542_v61  ;;  %v3830_v18 = vadd.f32 %v557_v41, %v545_v36  ;;  %v124_v62 = vld [vmem:[#allocation7 + $0x208] sm:$0x3f] }
 0x123   :  { %v3814_v40 = vadd.f32 %v550_v5, %v6956_v12  ;;  %v3817_v23 = vadd.f32 %v551_v59, %v6957_v37  ;;  %6959 = vst [vmem:[#allocation170_spill] sm:$0xff] %v3820_v51  ;;  %v122_v52 = vld [vmem:[#allocation7 + $0x1f8] sm:$0xff]  ;;  %v123_v30 = vld [vmem:[#allocation7 + $0x200] sm:$0xff]  ;;  %v3832_v5 = vadd.f32 %v558_v20, %v546_v56  ;;  %v607_v59 = vmul.f32 0.034374557, %v6962_v57  ;;  %v6963_v37 = vld [vmem:[#allocation112_spill] sm:$0xff] }
 0x124   :  { %6951 = vst [vmem:[#allocation57_spill] sm:$0xff] %v3804_v38  ;;  %v608_v11 = vmul.f32 0.034374557, %v6963_v37  ;;  %v6964_v12 = vld [vmem:[#allocation116_spill] sm:$0xff]  ;;  %v610_v61 = vmul.f32 0.034374557, %v6894_v26 }
 0x125   :  { %6955 = vst [vmem:[#allocation58_spill] sm:$0xff] %v3811_v42  ;;  %v3837_v63 = vmul.f32 0.034374557, %v6964_v12  ;;  %v611_v31 = vmul.f32 0.034374557, %v6895_v13  ;;  %v6966_v54 = vld [vmem:[#allocation47_spill] sm:$0xff] }
 0x126   :  { %6960 = vst [vmem:[#allocation64_spill] sm:$0xff] %v3826_v8  ;;  %v3843_v6 = vadd.f32 %v3671_v9, %v6966_v54  ;;  %v6968_v36 = vld [vmem:[#allocation177_spill] sm:$0xff]  ;;  %v6971_v53 = vld [vmem:[#allocation26_spill] sm:$0xff]  ;;  %v6972_v20 = vld [vmem:[#allocation48_spill] sm:$0xff] }
 0x127   :  { %6961 = vst [vmem:[#allocation73_spill] sm:$0xff] %v3832_v5  ;;  %v3846_v7 = vmul.f32 0.034374557, %v6968_v36  ;;  %v6970_v56 = vld [vmem:[#allocation25_spill] sm:$0xff]  ;;  %v614_v41 = vmul.f32 0.034374557, %v6971_v53 }
 0x128   :  { %6965 = vst [vmem:[#allocation74_spill] sm:$0xff] %v3837_v63  ;;  %v613_v60 = vmul.f32 0.034374557, %v6970_v56  ;;  %v6973_v28 = vld [vmem:[#allocation45_spill] sm:$0xff]  ;;  %v6975_v37 = vld [vmem:[#allocation28_spill] sm:$0xff]  ;;  %v6977_v26 = vld [vmem:[#allocation30_spill] sm:$0xff] }
 0x129   :  { %6967 = vst [vmem:[#allocation175_spill] sm:$0xff] %v3843_v6  ;;  %v3852_v57 = vadd.f32 %v6973_v28, %v6972_v20  ;;  %v3855_v12 = vmul.f32 0.034374557, %v6975_v37  ;;  %v616_v13 = vmul.f32 0.034374557, %v6977_v26  ;;  %v6978_v5 = vld [vmem:[#allocation31_spill] sm:$0xff] }
 0x12a   :  { %6969 = vst [vmem:[#allocation80_spill] sm:$0xff] %v3846_v7  ;;  %v617_v8 = vmul.f32 0.034374557, %v6978_v5  ;;  %v6979_v9 = vld [vmem:[#allocation53_spill] sm:$0xff]  ;;  %v6980_v54 = vld [vmem:[#allocation162_spill] sm:$0xff]  ;;  %v6985_v7 = vld [vmem:[#allocation56_spill] sm:$0xff] }
 0x12b   :  { %6974 = vst [vmem:[#allocation69_spill] sm:$0xff] %v3852_v57  ;;  %v3861_v51 = vadd.f32 %v6980_v54, %v6979_v9  ;;  %v6982_v36 = vld [vmem:[#allocation146_spill] sm:$0xff]  ;;  %v620_v38 = vmul.f32 0.034374557, %v6985_v7  ;;  %v6988_v37 = vld [vmem:[#allocation44_spill] sm:$0xff]  ;;  %v6989_v63 = vld [vmem:[#allocation55_spill] sm:$0xff] }
 0x12c   :  { %6976 = vst [vmem:[#allocation123_spill] sm:$0xff] %v3855_v12  ;;  %v3864_v42 = vmul.f32 0.034374557, %v6982_v36  ;;  %v6984_v56 = vld [vmem:[#allocation158_spill] sm:$0xff]  ;;  %v3873_v12 = vmul.f32 0.034374557, %v6988_v37  ;;  %v3877_v9 = vadd.f32 %v3692_v29, %v6989_v63 }
 0x12d   :  { %6981 = vst [vmem:[#allocation127_spill] sm:$0xff] %v3861_v51  ;;  %v619_v53 = vmul.f32 0.034374557, %v6984_v56  ;;  %v6986_v20 = vld [vmem:[#allocation54_spill] sm:$0xff]  ;;  %v622_v26 = vmul.f32 0.034374557, %v122_v52 }
 0x12e   :  { %6983 = vst [vmem:[#allocation32_spill] sm:$0xff] %v3864_v42  ;;  %v3870_v28 = vadd.f32 %v3688_v10, %v6986_v20  ;;  %v623_v5 = vmul.f32 0.034374557, %v123_v30  ;;  %v3879_v54 = vmul.f32 0.034374557, %v124_v62  ;;  %v6991_v36 = vld [vmem:[#allocation59_spill] sm:$0xff] }
 0x12f   :  { %6990 = vst [vmem:[#allocation194_spill] sm:$0xff] %v3877_v9  ;;  %v3883_v56 = vadd.f32 %v3696_v15, %v6991_v36  ;;  %v6993_v7 = vld [vmem:[#allocation60_spill] sm:$0xff]  ;;  %v6995_v10 = vld [vmem:[#allocation61_spill] sm:$0xff]  ;;  %v6997_v52 = vld [vmem:[#allocation66_spill] sm:$0xff] }
 0x130   :  { %6987 = vst [vmem:[#allocation188_spill] sm:$0xff] %v3870_v28  ;;  %v3887_v42 = vadd.f32 %v3700_v16, %v6993_v7  ;;  %v3891_v20 = vadd.f32 %v3704_v2, %v6995_v10  ;;  %v3895_v30 = vadd.f32 %v3712_v48, %v6997_v52  ;;  %v6999_v29 = vld [vmem:[#allocation67_spill] sm:$0xff]  ;;  %v7003_v37 = vld [vmem:[#allocation72_spill] sm:$0xff]  ;;  %v7005_v36 = vld [vmem:[#allocation78_spill] sm:$0xff] }
 0x131   :  { %6992 = vst [vmem:[#allocation195_spill] sm:$0xff] %v3883_v56  ;;  %v3899_v62 = vadd.f32 %v3716_v39, %v6999_v29  ;;  %v7001_v63 = vld [vmem:[#allocation71_spill] sm:$0xff]  ;;  %v3907_v16 = vadd.f32 %v3728_v1, %v7003_v37  ;;  %v3911_v2 = vadd.f32 %v3736_v27, %v7005_v36  ;;  %v7009_v10 = vld [vmem:[#allocation82_spill] sm:$0xff]  ;;  %v7013_v29 = vld [vmem:[#allocation85_spill] sm:$0xff] }
 0x132   :  { %6994 = vst [vmem:[#allocation196_spill] sm:$0xff] %v3887_v42  ;;  %v3903_v15 = vadd.f32 %v3724_v46, %v7001_v63  ;;  %v7007_v7 = vld [vmem:[#allocation79_spill] sm:$0xff]  ;;  %v3919_v39 = vadd.f32 %v3748_v35, %v7009_v10  ;;  %v3927_v1 = vadd.f32 %v3760_v33, %v7013_v29  ;;  %v7015_v63 = vld [vmem:[#allocation86_spill] sm:$0xff]  ;;  %v7017_v37 = vld [vmem:[#allocation88_spill] sm:$0xff]  ;;  %v3947_v33 = vadd.f32 %v607_v59, %v589_v3 }
 0x133   :  { %6996 = vst [vmem:[#allocation197_spill] sm:$0xff] %v3891_v20  ;;  %v3915_v48 = vadd.f32 %v3740_v17, %v7007_v7  ;;  %v7011_v52 = vld [vmem:[#allocation83_spill] sm:$0xff]  ;;  %v3931_v27 = vadd.f32 %v3764_v32, %v7015_v63  ;;  %v3935_v17 = vadd.f32 %v3772_v24, %v7017_v37  ;;  %v7019_v36 = vld [vmem:[#allocation89_spill] sm:$0xff]  ;;  %v3949_v29 = vadd.f32 %v608_v11, %v590_v25 }
 0x134   :  { %6998 = vst [vmem:[#allocation198_spill] sm:$0xff] %v3895_v30  ;;  %v3923_v46 = vadd.f32 %v3752_v14, %v7011_v52  ;;  %v3939_v35 = vadd.f32 %v3776_v43, %v7019_v36  ;;  %v7021_v7 = vld [vmem:[#allocation91_spill] sm:$0xff]  ;;  %v7023_v14 = vld [vmem:[#allocation92_spill] sm:$0xff]  ;;  %v3951_v32 = vadd.f32 %v610_v61, %v592_v44  ;;  %v3953_v63 = vadd.f32 %v611_v31, %v593_v19 }
 0x135   :  { %7000 = vst [vmem:[#allocation199_spill] sm:$0xff] %v3899_v62  ;;  %v3942_v10 = vadd.f32 %v586_v49, %v7021_v7  ;;  %v3945_v52 = vadd.f32 %v587_v58, %v7023_v14  ;;  %v3956_v24 = vmul.f32 0.034374557, %v3843_v6  ;;  %v3959_v43 = vmul.f32 0.034374557, %v3852_v57 }
 0x136   :  { %7002 = vst [vmem:[#allocation200_spill] sm:$0xff] %v3903_v15  ;;  %v3961_v37 = vadd.f32 %v613_v60, %v595_v50  ;;  %v3964_v49 = vmul.f32 0.034374557, %v3870_v28  ;;  %v3967_v58 = vmul.f32 0.034374557, %v3877_v9  ;;  %v3973_v25 = vadd.f32 %v614_v41, %v3808_v21 }
 0x137   :  { %7004 = vst [vmem:[#allocation201_spill] sm:$0xff] %v3907_v16  ;;  %v3970_v3 = vmul.f32 0.034374557, %v3887_v42  ;;  %v3976_v44 = vmul.f32 0.034374557, %v3891_v20  ;;  %v3985_v59 = vadd.f32 %v616_v13, %v3814_v40  ;;  %v3997_v31 = vadd.f32 %v617_v8, %v3817_v23 }
 0x138   :  { %7006 = vst [vmem:[#allocation34_spill] sm:$0xff] %v3911_v2  ;;  %v3979_v19 = vmul.f32 0.034374557, %v3895_v30  ;;  %v3982_v50 = vmul.f32 0.034374557, %v3899_v62  ;;  %v4009_v13 = vadd.f32 %v619_v53, %v3822_v45  ;;  %v4021_v8 = vadd.f32 %v620_v38, %v3824_v22 }
 0x139   :  { %7008 = vst [vmem:[#allocation202_spill] sm:$0xff] %v3915_v48  ;;  %v3988_v11 = vmul.f32 0.034374557, %v3903_v15  ;;  %v3991_v61 = vmul.f32 0.034374557, %v3907_v16  ;;  %v4033_v53 = vadd.f32 %v622_v26, %v3828_v47  ;;  %v4045_v22 = vadd.f32 %v623_v5, %v3830_v18  ;;  %v7063_v26 = vld [vmem:[#allocation65_spill] sm:$0xff] }
 0x13a   :  { %7010 = vst [vmem:[#allocation38_spill] sm:$0xff] %v3919_v39  ;;  %v3994_v21 = vmul.f32 0.034374557, %v3911_v2  ;;  %v4000_v60 = vmul.f32 0.034374557, %v3915_v48  ;;  %v7068_v5 = vld [vmem:[#allocation70_spill] sm:$0xff] }
 0x13b   :  { %7012 = vst [vmem:[#allocation39_spill] sm:$0xff] %v3923_v46  ;;  %v4003_v41 = vmul.f32 0.034374557, %v3919_v39  ;;  %v4006_v40 = vmul.f32 0.034374557, %v3923_v46 }
 0x13c   :  { %7014 = vst [vmem:[#allocation40_spill] sm:$0xff] %v3927_v1  ;;  %v4012_v36 = vmul.f32 0.034374557, %v3927_v1  ;;  %v4015_v7 = vmul.f32 0.034374557, %v3931_v27 }
 0x13d   :  { %7016 = vst [vmem:[#allocation46_spill] sm:$0xff] %v3931_v27  ;;  %v4018_v23 = vmul.f32 0.034374557, %v3935_v17  ;;  %v4024_v14 = vmul.f32 0.034374557, %v3939_v35 }
 0x13e   :  { %7018 = vst [vmem:[#allocation16_spill] sm:$0xff] %v3935_v17  ;;  %v4030_v45 = vmul.f32 0.034374557, %v3945_v52  ;;  %v4042_v38 = vmul.f32 0.034374557, %v3951_v32 }
 0x13f   :  { %7020 = vst [vmem:[#allocation134_spill] sm:$0xff] %v3939_v35  ;;  %v4054_v47 = vmul.f32 0.034374557, %v3973_v25  ;;  %v4067_v18 = vmul.f32 0.034374557, %v4009_v13 }
 0x140   :  { %7022 = vst [vmem:[#allocation135_spill] sm:$0xff] %v3942_v10 }
 0x141   :  { %7024 = vst [vmem:[#allocation136_spill] sm:$0xff] %v3945_v52 }
 0x142   :  { %7025 = vst [vmem:[#allocation17_spill] sm:$0xff] %v3947_v33 }
 0x143   :  { %7026 = vst [vmem:[#allocation137_spill] sm:$0xff] %v3949_v29 }
 0x144   :  { %7027 = vst [vmem:[#allocation138_spill] sm:$0xff] %v3951_v32 }
 0x145   :  { %7028 = vst [vmem:[#allocation20_spill] sm:$0xff] %v3953_v63 }
 0x146   :  { %7029 = vst [vmem:[#allocation18_spill] sm:$0xff] %v3956_v24 }
 0x147   :  { %7030 = vst [vmem:[#allocation141_spill] sm:$0xff] %v3959_v43 }
 0x148   :  { %7031 = vst [vmem:[#allocation139_spill] sm:$0xff] %v3961_v37 }
 0x149   :  { %7032 = vst [vmem:[#allocation143_spill] sm:$0xff] %v3964_v49 }
 0x14a   :  { %7033 = vst [vmem:[#allocation19_spill] sm:$0xff] %v3967_v58 }
 0x14b   :  { %7034 = vst [vmem:[#allocation144_spill] sm:$0xff] %v3970_v3 }
 0x14c   :  { %7035 = vst [vmem:[#allocation21_spill] sm:$0xff] %v3973_v25 }
 0x14d   :  { %7036 = vst [vmem:[#allocation145_spill] sm:$0xff] %v3976_v44 }
 0x14e   :  { %7037 = vst [vmem:[#allocation22_spill] sm:$0xff] %v3979_v19 }
 0x14f   :  { %7038 = vst [vmem:[#allocation147_spill] sm:$0xff] %v3982_v50  ;;  %v4229_v50 = vmul.f32 0.10945148, %v3953_v63 }
 0x150   :  { %7039 = vst [vmem:[#allocation140_spill] sm:$0xff] %v3985_v59 }
 0x151   :  { %7040 = vst [vmem:[#allocation148_spill] sm:$0xff] %v3988_v11  ;;  %v4194_v11 = vmul.f32 0.10945148, %v3939_v35  ;;  %v4216_v35 = vmul.f32 0.10945148, %v3949_v29 }
 0x152   :  { %7041 = vst [vmem:[#allocation23_spill] sm:$0xff] %v3991_v61  ;;  %v4181_v61 = vmul.f32 0.10945148, %v3931_v27  ;;  %v4203_v27 = vmul.f32 0.10945148, %v3945_v52 }
 0x153   :  { %7042 = vst [vmem:[#allocation149_spill] sm:$0xff] %v3994_v21  ;;  %v4168_v21 = vmul.f32 0.10945148, %v3923_v46 }
 0x154   :  { %7043 = vst [vmem:[#allocation24_spill] sm:$0xff] %v3997_v31 }
 0x155   :  { %7044 = vst [vmem:[#allocation151_spill] sm:$0xff] %v4000_v60  ;;  %v4155_v60 = vmul.f32 0.10945148, %v3915_v48 }
 0x156   :  { %7045 = vst [vmem:[#allocation27_spill] sm:$0xff] %v4003_v41  ;;  %v4142_v41 = vmul.f32 0.10945148, %v3907_v16 }
 0x157   :  { %7046 = vst [vmem:[#allocation152_spill] sm:$0xff] %v4006_v40  ;;  %v4027_v40 = vmul.f32 0.034374557, %v3942_v10 }
 0x158   :  { %7047 = vst [vmem:[#allocation153_spill] sm:$0xff] %v4009_v13 }
 0x159   :  { %7048 = vst [vmem:[#allocation142_spill] sm:$0xff] %v4012_v36  ;;  %v4129_v36 = vmul.f32 0.10945148, %v3899_v62 }
 0x15a   :  { %7049 = vst [vmem:[#allocation155_spill] sm:$0xff] %v4015_v7  ;;  %v4036_v7 = vmul.f32 0.034374557, %v3947_v33 }
 0x15b   :  { %7050 = vst [vmem:[#allocation29_spill] sm:$0xff] %v4018_v23  ;;  %v4039_v23 = vmul.f32 0.034374557, %v3949_v29 }
 0x15c   :  { %7051 = vst [vmem:[#allocation156_spill] sm:$0xff] %v4021_v8 }
 0x15d   :  { %7052 = vst [vmem:[#allocation157_spill] sm:$0xff] %v4024_v14  ;;  %v7084_v14 = vld [vmem:[#allocation52_spill] sm:$0xff] }
 0x15e   :  { %7053 = vst [vmem:[#allocation159_spill] sm:$0xff] %v4027_v40  ;;  %v4048_v40 = vmul.f32 0.034374557, %v3953_v63  ;;  %v4251_v63 = vmul.f32 0.10945148, %v3997_v31 }
 0x15f   :  { %7054 = vst [vmem:[#allocation160_spill] sm:$0xff] %v4030_v45  ;;  %v4051_v45 = vmul.f32 0.034374557, %v3961_v37 }
 0x160   :  { %7055 = vst [vmem:[#allocation161_spill] sm:$0xff] %v4033_v53 }
 0x161   :  { %7056 = vst [vmem:[#allocation163_spill] sm:$0xff] %v4036_v7  ;;  %v4058_v7 = vadd.f32 %v3708_v0, %v7063_v26  ;;  %v4080_v0 = vmul.f32 0.034374557, %v4045_v22  ;;  %v7073_v26 = vld [vmem:[#allocation77_spill] sm:$0xff] }
 0x162   :  { %7057 = vst [vmem:[#allocation164_spill] sm:$0xff] %v4039_v23  ;;  %v4061_v23 = vmul.f32 0.034374557, %v3985_v59 }
 0x163   :  { %7058 = vst [vmem:[#allocation165_spill] sm:$0xff] %v4042_v38  ;;  %v4064_v38 = vmul.f32 0.034374557, %v3997_v31  ;;  %v4265_v31 = vmul.f32 0.10945148, %v4021_v8 }
 0x164   :  { %7059 = vst [vmem:[#allocation167_spill] sm:$0xff] %v4045_v22 }
 0x165   :  { %7060 = vst [vmem:[#allocation168_spill] sm:$0xff] %v4048_v40  ;;  %v4071_v40 = vadd.f32 %v3720_v55, %v7068_v5  ;;  %v4093_v55 = vmul.f32 0.10945148, %v3861_v51  ;;  %v7078_v5 = vld [vmem:[#allocation81_spill] sm:$0xff]  ;;  %v4113_v51 = vmul.f32 0.10945148, %v3887_v42 }
 0x166   :  { %7061 = vst [vmem:[#allocation169_spill] sm:$0xff] %v4051_v45  ;;  %v4074_v45 = vmul.f32 0.034374557, %v4021_v8  ;;  %v7096_v42 = vld [vmem:[#allocation63_spill] sm:$0xff] }
 0x167   :  { %7062 = vst [vmem:[#allocation172_spill] sm:$0xff] %v4054_v47  ;;  %v4077_v47 = vmul.f32 0.034374557, %v4033_v53  ;;  %v812_v8 = vrot.slane %v4113_v51, 1 }
 0x168   :  { %7064 = vst [vmem:[#allocation173_spill] sm:$0xff] %v4058_v7 }
 0x169   :  { %7065 = vst [vmem:[#allocation174_spill] sm:$0xff] %v4061_v23  ;;  %v4084_v23 = vadd.f32 %v3732_v34, %v7073_v26  ;;  %v4106_v34 = vmul.f32 0.10945148, %v3883_v56  ;;  %v7083_v26 = vld [vmem:[#allocation84_spill] sm:$0xff]  ;;  %v4126_v56 = vmul.f32 0.10945148, %v3895_v30 }
 0x16a   :  { %7066 = vst [vmem:[#allocation178_spill] sm:$0xff] %v4064_v38  ;;  %v4087_v38 = vmul.f32 0.10945148, %v3843_v6  ;;  %v4116_v6 = vmul.f32 0.10945148, %v3891_v20  ;;  %v7102_v30 = vld [vmem:[#allocation166_spill] sm:$0xff] }
 0x16b   :  { %7067 = vst [vmem:[#allocation179_spill] sm:$0xff] %v4067_v18  ;;  %v4090_v18 = vmul.f32 0.10945148, %v3852_v57  ;;  %v4110_v57 = vadd.f32 %v7084_v14, %v7083_v26  ;;  %v4132_v14 = vmul.f32 0.10945148, %v4071_v40  ;;  %v7095_v26 = vld [vmem:[#allocation90_spill] sm:$0xff] }
 0x16c   :  { %7069 = vst [vmem:[#allocation180_spill] sm:$0xff] %v4071_v40  ;;  %v4136_v20 = vadd.f32 %v7096_v42, %v7095_v26  ;;  %v4152_v40 = vmul.f32 0.10945148, %v3911_v2  ;;  %v7107_v26 = vld [vmem:[#allocation68_spill] sm:$0xff] }
 0x16d   :  { %7070 = vst [vmem:[#allocation181_spill] sm:$0xff] %v4074_v45  ;;  %v4097_v45 = vadd.f32 %v3744_v4, %v7078_v5  ;;  %v4119_v4 = vmul.f32 0.10945148, %v4058_v7  ;;  %v7089_v5 = vld [vmem:[#allocation87_spill] sm:$0xff]  ;;  %v4139_v7 = vmul.f32 0.10945148, %v3903_v15 }
 0x16e   :  { %7071 = vst [vmem:[#allocation182_spill] sm:$0xff] %v4077_v47  ;;  %v4100_v47 = vmul.f32 0.10945148, %v3870_v28  ;;  %v7090_v28 = vld [vmem:[#allocation62_spill] sm:$0xff]  ;;  %v7114_v2 = vld [vmem:[#allocation80_spill] sm:$0xff] }
 0x16f   :  { %7072 = vst [vmem:[#allocation183_spill] sm:$0xff] %v4080_v0  ;;  %v4103_v0 = vmul.f32 0.10945148, %v3877_v9  ;;  %v4123_v9 = vadd.f32 %v7090_v28, %v7089_v5  ;;  %v4145_v28 = vmul.f32 0.10945148, %v4084_v23  ;;  %v7101_v5 = vld [vmem:[#allocation93_spill] sm:$0xff] }
 0x170   :  { %7074 = vst [vmem:[#allocation184_spill] sm:$0xff] %v4084_v23  ;;  %v4149_v62 = vadd.f32 %v7102_v30, %v7101_v5  ;;  %v4158_v42 = vmul.f32 0.10945148, %v4097_v45  ;;  %v7108_v15 = vld [vmem:[#allocation74_spill] sm:$0xff]  ;;  %v4165_v23 = vmul.f32 0.10945148, %v3919_v39 }
 0x171   :  { %7075 = vst [vmem:[#allocation185_spill] sm:$0xff] %v4087_v38  ;;  %v4162_v16 = vadd.f32 %v7108_v15, %v7107_v26  ;;  %v4171_v30 = vmul.f32 0.10945148, %v4110_v57  ;;  %v7113_v5 = vld [vmem:[#allocation57_spill] sm:$0xff]  ;;  %v4184_v15 = vmul.f32 0.10945148, %v4123_v9 }
 0x172   :  { %7076 = vst [vmem:[#allocation186_spill] sm:$0xff] %v4090_v18  ;;  %v4175_v48 = vadd.f32 %v7114_v2, %v7113_v5  ;;  %v7119_v26 = vld [vmem:[#allocation58_spill] sm:$0xff]  ;;  %v7120_v39 = vld [vmem:[#allocation123_spill] sm:$0xff]  ;;  %v4197_v2 = vmul.f32 0.10945148, %v4136_v20 }
 0x173   :  { %7077 = vst [vmem:[#allocation75_spill] sm:$0xff] %v4093_v55  ;;  %v4188_v46 = vadd.f32 %v7120_v39, %v7119_v26  ;;  %v4200_v5 = vmul.f32 0.10945148, %v3942_v10  ;;  %v7128_v39 = vld [vmem:[#allocation170_spill] sm:$0xff]  ;;  %v7129_v26 = vld [vmem:[#allocation32_spill] sm:$0xff] }
 0x174   :  { %7079 = vst [vmem:[#allocation76_spill] sm:$0xff] %v4097_v45  ;;  %v4178_v45 = vmul.f32 0.10945148, %v3927_v1  ;;  %v4210_v1 = vadd.f32 %v7129_v26, %v7128_v39  ;;  %v7134_v10 = vld [vmem:[#allocation64_spill] sm:$0xff]  ;;  %v4232_v39 = vmul.f32 0.10945148, %v4175_v48 }
 0x175   :  { %7080 = vst [vmem:[#allocation187_spill] sm:$0xff] %v4100_v47  ;;  %v4223_v52 = vadd.f32 %v3873_v12, %v7134_v10  ;;  %v7139_v26 = vld [vmem:[#allocation73_spill] sm:$0xff]  ;;  %v4245_v12 = vmul.f32 0.10945148, %v4188_v46  ;;  %v4248_v10 = vmul.f32 0.10945148, %v3985_v59 }
 0x176   :  { %7081 = vst [vmem:[#allocation189_spill] sm:$0xff] %v4103_v0  ;;  %v4236_v29 = vadd.f32 %v3879_v54, %v7139_v26  ;;  %v803_v54 = vrot.slane %v4090_v18, 1  ;;  %v805_v26 = vrot.slane %v4093_v55, 1  ;;  %v4262_v59 = vmul.f32 0.10945148, %v4009_v13 }
 0x177   :  { %7082 = vst [vmem:[#allocation190_spill] sm:$0xff] %v4106_v34  ;;  %v4271_v18 = vmul.f32 0.10945148, %v4033_v53  ;;  %v4274_v55 = vmul.f32 0.10945148, %v4045_v22  ;;  %v810_v13 = vrot.slane %v4106_v34, 1 }
 0x178   :  { %7085 = vst [vmem:[#allocation191_spill] sm:$0xff] %v4110_v57  ;;  %v4191_v57 = vmul.f32 0.10945148, %v3935_v17  ;;  %v4213_v17 = vmul.f32 0.10945148, %v3947_v33  ;;  %v813_v53 = vrot.slane %v4116_v6, 1 }
 0x179   :  { %7086 = vst [vmem:[#allocation192_spill] sm:$0xff] %v4113_v51  ;;  %v4242_v33 = vmul.f32 0.10945148, %v3973_v25  ;;  %v808_v25 = vrot.slane %v4103_v0, 1  ;;  %v4277_v0 = vmul.f32 0.10945148, %v4236_v29 }
 0x17a   :  { %7087 = vst [vmem:[#allocation193_spill] sm:$0xff] %v4116_v6  ;;  %v815_v22 = vrot.slane %v4119_v4, 1  ;;  %v822_v34 = vrot.slane %v4139_v7, 1  ;;  %v823_v51 = vrot.slane %v4142_v41, 1  ;;  %v830_v6 = vrot.slane %v4158_v42, 1 }
 0x17b   :  { %7088 = vst [vmem:[#allocation171_spill] sm:$0xff] %v4119_v4  ;;  %v832_v4 = vrot.slane %v4165_v23, 1 }
 0x17c   :  { %7091 = vst [vmem:[#allocation176_spill] sm:$0xff] %v4123_v9  ;;  %v4206_v9 = vmul.f32 0.10945148, %v4149_v62 }
 0x17d   :  { %7092 = vst [vmem:[#allocation94_spill] sm:$0xff] %v4126_v56 }
 0x17e   :  { %7093 = vst [vmem:[#allocation95_spill] sm:$0xff] %v4129_v36 }
 0x17f   :  { %7094 = vst [vmem:[#allocation96_spill] sm:$0xff] %v4132_v14 }
 0x180   :  { %7097 = vst [vmem:[#allocation97_spill] sm:$0xff] %v4136_v20  ;;  %v4219_v20 = vmul.f32 0.10945148, %v4162_v16 }
 0x181   :  { %7098 = vst [vmem:[#allocation98_spill] sm:$0xff] %v4139_v7  ;;  %v837_v7 = vrot.slane %v4178_v45, 1 }
 0x182   :  { %7099 = vst [vmem:[#allocation35_spill] sm:$0xff] %v4142_v41  ;;  %v838_v41 = vrot.slane %v4181_v61, 1 }
 0x183   :  { %7100 = vst [vmem:[#allocation99_spill] sm:$0xff] %v4145_v28 }
 0x184   :  { %7103 = vst [vmem:[#allocation36_spill] sm:$0xff] %v4149_v62  ;;  %v4226_v62 = vmul.f32 0.10945148, %v3951_v32  ;;  %v818_v32 = vrot.slane %v4129_v36, 1  ;;  %v835_v36 = vrot.slane %v4171_v30, 1 }
 0x185   :  { %7104 = vst [vmem:[#allocation100_spill] sm:$0xff] %v4152_v40 }
 0x186   :  { %7105 = vst [vmem:[#allocation101_spill] sm:$0xff] %v4155_v60 }
 0x187   :  { %7106 = vst [vmem:[#allocation37_spill] sm:$0xff] %v4158_v42  ;;  %v842_v42 = vrot.slane %v4191_v57, 1 }
 0x188   :  { %7109 = vst [vmem:[#allocation102_spill] sm:$0xff] %v4162_v16  ;;  %v4239_v16 = vmul.f32 0.10945148, %v3961_v37  ;;  %v807_v37 = vrot.slane %v4100_v47, 1 }
 0x189   :  { %7110 = vst [vmem:[#allocation150_spill] sm:$0xff] %v4165_v23  ;;  %v843_v23 = vrot.slane %v4194_v11, 1 }
 0x18a   :  { %7111 = vst [vmem:[#allocation103_spill] sm:$0xff] %v4168_v21 }
 0x18b   :  { %7112 = vst [vmem:[#allocation104_spill] sm:$0xff] %v4171_v30 }
 0x18c   :  { %7115 = vst [vmem:[#allocation105_spill] sm:$0xff] %v4175_v48  ;;  %v802_v48 = vrot.slane %v4087_v38, 1  ;;  %v4268_v38 = vmul.f32 0.10945148, %v4223_v52 }
 0x18d   :  { %7116 = vst [vmem:[#allocation106_spill] sm:$0xff] %v4178_v45 }
 0x18e   :  { %7117 = vst [vmem:[#allocation107_spill] sm:$0xff] %v4181_v61  ;;  %v4280_v47 = vsel %vm801_vm0, %v802_v48, %v803_v54  ;;  %v820_v48 = vrot.slane %v4132_v14, 1  ;;  %v811_v14 = vsel %vm801_vm0, %v808_v25, %v810_v13 }
 0x18f   :  { %7118 = vst [vmem:[#allocation108_spill] sm:$0xff] %v4184_v15 }
 0x190   :  { %7121 = vst [vmem:[#allocation109_spill] sm:$0xff] %v4188_v46  ;;  %v4259_v46 = vmul.f32 0.10945148, %v4210_v1  ;;  %v821_v30 = vsel %vm801_vm0, %v818_v32, %v820_v48  ;;  %v850_v48 = vrot.slane %v4206_v9, 1 }
 0x191   :  { %7122 = vst [vmem:[#allocation110_spill] sm:$0xff] %v4191_v57  ;;  %v7209_v57 = vld [vmem:[#allocation201_spill] sm:$0xff] }
 0x192   :  { %7123 = vst [vmem:[#allocation113_spill] sm:$0xff] %v4194_v11  ;;  %v4476_v45 = vmul.f32 0.21860483, %v7209_v57  ;;  %v7223_v57 = vld [vmem:[#allocation38_spill] sm:$0xff] }
 0x193   :  { %7124 = vst [vmem:[#allocation114_spill] sm:$0xff] %v4197_v2 }
 0x194   :  { %7125 = vst [vmem:[#allocation115_spill] sm:$0xff] %v4200_v5 }
 0x195   :  { %7126 = vst [vmem:[#allocation117_spill] sm:$0xff] %v4203_v27 }
 0x196   :  { %7127 = vst [vmem:[#allocation118_spill] sm:$0xff] %v4206_v9  ;;  %v7205_v9 = vld [vmem:[#allocation163_spill] sm:$0xff] }
 0x197   :  { %7130 = vst [vmem:[#allocation119_spill] sm:$0xff] %v4210_v1  ;;  %v4285_v1 = vsel %vm801_vm0, %v803_v54, %v805_v26  ;;  %v825_v54 = vrot.slane %v4145_v28, 1  ;;  %v827_v26 = vrot.slane %v4152_v40, 1  ;;  %v840_v28 = vrot.slane %v4184_v15, 1 }
 0x198   :  { %7131 = vst [vmem:[#allocation120_spill] sm:$0xff] %v4213_v17  ;;  %v814_v40 = vsel %vm801_vm0, %v812_v8, %v813_v53 }
 0x199   :  { %7132 = vst [vmem:[#allocation121_spill] sm:$0xff] %v4216_v35  ;;  %v826_v13 = vsel %vm801_vm0, %v823_v51, %v825_v54  ;;  %v841_v11 = vsel %vm801_vm0, %v838_v41, %v840_v28  ;;  %v862_v28 = vrot.slane %v4239_v16, 1  ;;  %v865_v54 = vrot.slane %v4245_v12, 1 }
 0x19a   :  { %7133 = vst [vmem:[#allocation122_spill] sm:$0xff] %v4219_v20 }
 0x19b   :  { %7135 = vst [vmem:[#allocation124_spill] sm:$0xff] %v4223_v52  ;;  %v4288_v52 = vsel %vm801_vm0, %v807_v37, %v808_v25  ;;  %v828_v37 = vrot.slane %v4155_v60, 1  ;;  %v816_v60 = vsel %vm801_vm0, %v813_v53, %v815_v22  ;;  %v824_v25 = vsel %vm801_vm0, %v822_v34, %v823_v51 }
 0x19c   :  { %7136 = vst [vmem:[#allocation125_spill] sm:$0xff] %v4226_v62  ;;  %v839_v22 = vsel %vm801_vm0, %v837_v7, %v838_v41  ;;  %v844_v34 = vsel %vm801_vm0, %v842_v42, %v843_v23  ;;  %v848_v51 = vrot.slane %v4203_v27, 1  ;;  %v858_v41 = vrot.slane %v4229_v50, 1 }
 0x19d   :  { %7137 = vst [vmem:[#allocation126_spill] sm:$0xff] %v4229_v50  ;;  %v829_v61 = vsel %vm801_vm0, %v827_v26, %v828_v37  ;;  %v831_v15 = vsel %vm801_vm0, %v828_v37, %v830_v6  ;;  %v852_v6 = vrot.slane %v4213_v17, 1  ;;  %v860_v7 = vrot.slane %v4232_v39, 1 }
 0x19e   :  { %7138 = vst [vmem:[#allocation128_spill] sm:$0xff] %v4232_v39  ;;  %v863_v42 = vrot.slane %v4242_v33, 1  ;;  %v867_v26 = vrot.slane %v4248_v10, 1  ;;  %v868_v37 = vrot.slane %v4251_v63, 1  ;;  %v875_v50 = vrot.slane %v4268_v38, 1 }
 0x19f   :  { %7140 = vst [vmem:[#allocation129_spill] sm:$0xff] %v4236_v29  ;;  %v817_v29 = vrot.slane %v4126_v56, 1  ;;  %v833_v56 = vrot.slane %v4168_v21, 1  ;;  %v877_v39 = vrot.slane %v4271_v18, 1 }
 0x1a0   :  { %7141 = vst [vmem:[#allocation130_spill] sm:$0xff] %v4239_v16  ;;  %v878_v16 = vrot.slane %v4274_v55, 1 }
 0x1a1   :  { %7142 = vst [vmem:[#allocation131_spill] sm:$0xff] %v4242_v33  ;;  %v819_v21 = vsel %vm801_vm0, %v817_v29, %v818_v32  ;;  %v834_v8 = vsel %vm801_vm0, %v832_v4, %v833_v56  ;;  %v836_v53 = vsel %vm801_vm0, %v833_v56, %v835_v36  ;;  %v845_v29 = vrot.slane %v4197_v2, 1 }
 0x1a2   :  { %7143 = vst [vmem:[#allocation132_spill] sm:$0xff] %v4245_v12  ;;  %v847_v32 = vrot.slane %v4200_v5, 1  ;;  %v853_v4 = vrot.slane %v4216_v35, 1  ;;  %v855_v56 = vrot.slane %v4219_v20, 1  ;;  %v857_v36 = vrot.slane %v4226_v62, 1  ;;  %v7207_v5 = vld [vmem:[#allocation200_spill] sm:$0xff] }
 0x1a3   :  { %7144 = vst [vmem:[#allocation133_spill] sm:$0xff] %v4248_v10  ;;  %v870_v35 = vrot.slane %v4259_v46, 1  ;;  %v872_v20 = vrot.slane %v4262_v59, 1  ;;  %v873_v62 = vrot.slane %v4265_v31, 1  ;;  %v846_v33 = vsel %vm801_vm0, %v843_v23, %v845_v29 }
 0x1a4   :  { %7145 = vst [vmem:[#allocation33_spill] sm:$0xff] %v4251_v63  ;;  %v849_v12 = vsel %vm801_vm0, %v847_v32, %v848_v51  ;;  %v851_v10 = vsel %vm801_vm0, %v848_v51, %v850_v48  ;;  %v880_v63 = vrot.slane %v4277_v0, 1  ;;  %v869_v23 = vsel %vm801_vm0, %v867_v26, %v868_v37 }
 0x1a5   :  { %7146 = vst [vmem:[#allocation41_spill] sm:$0xff] %v4259_v46  ;;  %v854_v46 = vsel %vm801_vm0, %v852_v6, %v853_v4  ;;  %v4356_v29 = vsel %vm801_vm0, %v868_v37, %v870_v35  ;;  %v4359_v32 = vsel %vm801_vm0, %v872_v20, %v873_v62  ;;  %v4362_v51 = vsel %vm801_vm0, %v873_v62, %v875_v50 }
 0x1a6   :  { %7147 = vst [vmem:[#allocation42_spill] sm:$0xff] %v4262_v59  ;;  %v856_v59 = vsel %vm801_vm0, %v853_v4, %v855_v56  ;;  %v4365_v48 = vsel %vm801_vm0, %v877_v39, %v878_v16  ;;  %v4369_v6 = vadd.f32 %v4280_v47, %v3956_v24  ;;  %v4372_v4 = vsel %vm801_vm0, %v878_v16, %v880_v63  ;;  %v7155_v63 = vld [vmem:[#allocation147_spill] sm:$0xff] }
 0x1a7   :  { %7148 = vst [vmem:[#allocation43_spill] sm:$0xff] %v4265_v31  ;;  %v859_v31 = vsel %vm801_vm0, %v857_v36, %v858_v41  ;;  %v4376_v35 = vadd.f32 %v4285_v1, %v3959_v43  ;;  %v4380_v20 = vadd.f32 %v4288_v52, %v3964_v49  ;;  %v4383_v62 = vadd.f32 %v811_v14, %v3967_v58  ;;  %v7157_v1 = vld [vmem:[#allocation148_spill] sm:$0xff]  ;;  %v7159_v52 = vld [vmem:[#allocation23_spill] sm:$0xff]  ;;  %v7161_v14 = vld [vmem:[#allocation149_spill] sm:$0xff] }
 0x1a8   :  { %7149 = vst [vmem:[#allocation154_spill] sm:$0xff] %v4268_v38  ;;  %v861_v38 = vsel %vm801_vm0, %v858_v41, %v860_v7  ;;  %v4386_v50 = vadd.f32 %v814_v40, %v3970_v3  ;;  %v4389_v47 = vadd.f32 %v816_v60, %v3976_v44  ;;  %v4392_v16 = vadd.f32 %v819_v21, %v3979_v19  ;;  %v7163_v40 = vld [vmem:[#allocation151_spill] sm:$0xff]  ;;  %v7167_v21 = vld [vmem:[#allocation152_spill] sm:$0xff]  ;;  %v7193_v44 = vld [vmem:[#allocation197_spill] sm:$0xff] }
 0x1a9   :  { %7150 = vst [vmem:[#allocation49_spill] sm:$0xff] %v4271_v18  ;;  %v864_v18 = vsel %vm801_vm0, %v862_v28, %v863_v42  ;;  %v4395_v39 = vadd.f32 %v821_v30, %v7155_v63  ;;  %v4398_v56 = vadd.f32 %v824_v25, %v7157_v1  ;;  %v4401_v36 = vadd.f32 %v826_v13, %v7159_v52  ;;  %v7165_v60 = vld [vmem:[#allocation27_spill] sm:$0xff]  ;;  %v7169_v30 = vld [vmem:[#allocation142_spill] sm:$0xff]  ;;  %v7173_v13 = vld [vmem:[#allocation29_spill] sm:$0xff] }
 0x1aa   :  { %7151 = vst [vmem:[#allocation50_spill] sm:$0xff] %v4274_v55  ;;  %v866_v55 = vsel %vm801_vm0, %v863_v42, %v865_v54  ;;  %v4404_v41 = vadd.f32 %v829_v61, %v7161_v14  ;;  %v4407_v7 = vadd.f32 %v831_v15, %v7163_v40  ;;  %v4410_v28 = vadd.f32 %v834_v8, %v7165_v60  ;;  %v7171_v25 = vld [vmem:[#allocation155_spill] sm:$0xff]  ;;  %v7177_v15 = vld [vmem:[#allocation69_spill] sm:$0xff]  ;;  %v7191_v63 = vld [vmem:[#allocation196_spill] sm:$0xff] }
 0x1ab   :  { %7152 = vst [vmem:[#allocation51_spill] sm:$0xff] %v4277_v0  ;;  %v4413_v42 = vadd.f32 %v836_v53, %v7167_v21  ;;  %v4416_v54 = vadd.f32 %v839_v22, %v7169_v30  ;;  %v4419_v26 = vadd.f32 %v841_v11, %v7171_v25  ;;  %v4422_v37 = vadd.f32 %v844_v34, %v7173_v13  ;;  %v7175_v61 = vld [vmem:[#allocation175_spill] sm:$0xff]  ;;  %v7181_v53 = vld [vmem:[#allocation157_spill] sm:$0xff]  ;;  %v7183_v22 = vld [vmem:[#allocation188_spill] sm:$0xff] }
 0x1ac   :  { %7153 = vst [vmem:[#allocation111_spill] sm:$0xff] %v4389_v47  ;;  %v4425_v14 = vmul.f32 0.21860483, %v7175_v61  ;;  %v4428_v40 = vmul.f32 0.21860483, %v7177_v15  ;;  %v7179_v8 = vld [vmem:[#allocation127_spill] sm:$0xff]  ;;  %v4434_v21 = vadd.f32 %v846_v33, %v7181_v53  ;;  %v4470_v27 = vadd.f32 %v854_v46, %v7205_v9 }
 0x1ad   :  { %7154 = vst [vmem:[#allocation112_spill] sm:$0xff] %v4392_v16  ;;  %v4431_v60 = vmul.f32 0.21860483, %v7179_v8  ;;  %v4437_v30 = vmul.f32 0.21860483, %v7183_v22  ;;  %v7185_v11 = vld [vmem:[#allocation194_spill] sm:$0xff] }
 0x1ae   :  { %7156 = vst [vmem:[#allocation116_spill] sm:$0xff] %v4395_v39  ;;  %v4440_v25 = vmul.f32 0.21860483, %v7185_v11  ;;  %v7187_v34 = vld [vmem:[#allocation195_spill] sm:$0xff]  ;;  %v4449_v19 = vmul.f32 0.21860483, %v7191_v63 }
 0x1af   :  { %7158 = vst [vmem:[#allocation47_spill] sm:$0xff] %v4398_v56  ;;  %v4443_v13 = vmul.f32 0.21860483, %v7187_v34  ;;  %v7189_v52 = vld [vmem:[#allocation159_spill] sm:$0xff]  ;;  %v4452_v3 = vmul.f32 0.21860483, %v7193_v44 }
 0x1b0   :  { %7160 = vst [vmem:[#allocation177_spill] sm:$0xff] %v4401_v36  ;;  %v4446_v1 = vadd.f32 %v849_v12, %v7189_v52  ;;  %v7195_v33 = vld [vmem:[#allocation173_spill] sm:$0xff]  ;;  %v7197_v58 = vld [vmem:[#allocation160_spill] sm:$0xff]  ;;  %v7199_v43 = vld [vmem:[#allocation198_spill] sm:$0xff]  ;;  %v4473_v2 = vmul.f32 0.21860483, %v7207_v5 }
 0x1b1   :  { %7162 = vst [vmem:[#allocation25_spill] sm:$0xff] %v4404_v41  ;;  %v4455_v53 = vmul.f32 0.21860483, %v7195_v33  ;;  %v4458_v49 = vadd.f32 %v851_v10, %v7197_v58  ;;  %v4461_v24 = vmul.f32 0.21860483, %v7199_v43  ;;  %v7201_v0 = vld [vmem:[#allocation199_spill] sm:$0xff] }
 0x1b2   :  { %7164 = vst [vmem:[#allocation26_spill] sm:$0xff] %v4407_v7  ;;  %v4464_v17 = vmul.f32 0.21860483, %v7201_v0  ;;  %v7203_v12 = vld [vmem:[#allocation180_spill] sm:$0xff]  ;;  %v7215_v0 = vld [vmem:[#allocation34_spill] sm:$0xff]  ;;  %v7221_v5 = vld [vmem:[#allocation165_spill] sm:$0xff] }
 0x1b3   :  { %7166 = vst [vmem:[#allocation48_spill] sm:$0xff] %v4410_v28  ;;  %v4467_v52 = vmul.f32 0.21860483, %v7203_v12  ;;  %v7211_v10 = vld [vmem:[#allocation184_spill] sm:$0xff]  ;;  %v7217_v12 = vld [vmem:[#allocation202_spill] sm:$0xff]  ;;  %v1046_v36 = vrot.slane %v4431_v60, 2 }
 0x1b4   :  { %7168 = vst [vmem:[#allocation45_spill] sm:$0xff] %v4413_v42  ;;  %v4479_v58 = vmul.f32 0.21860483, %v7211_v10  ;;  %v7213_v43 = vld [vmem:[#allocation164_spill] sm:$0xff]  ;;  %v4488_v44 = vmul.f32 0.21860483, %v7217_v12 }
 0x1b5   :  { %7170 = vst [vmem:[#allocation28_spill] sm:$0xff] %v4416_v54  ;;  %v4482_v33 = vadd.f32 %v856_v59, %v7213_v43  ;;  %v7219_v46 = vld [vmem:[#allocation76_spill] sm:$0xff]  ;;  %v4497_v63 = vmul.f32 0.21860483, %v7223_v57  ;;  %v7225_v10 = vld [vmem:[#allocation39_spill] sm:$0xff]  ;;  %v7237_v57 = vld [vmem:[#allocation169_spill] sm:$0xff] }
 0x1b6   :  { %7172 = vst [vmem:[#allocation30_spill] sm:$0xff] %v4419_v26  ;;  %v4491_v9 = vmul.f32 0.21860483, %v7219_v46  ;;  %v4500_v34 = vmul.f32 0.21860483, %v7225_v10  ;;  %v7227_v59 = vld [vmem:[#allocation191_spill] sm:$0xff] }
 0x1b7   :  { %7174 = vst [vmem:[#allocation31_spill] sm:$0xff] %v4422_v37  ;;  %v4503_v43 = vmul.f32 0.21860483, %v7227_v59  ;;  %v7231_v12 = vld [vmem:[#allocation40_spill] sm:$0xff]  ;;  %v7233_v46 = vld [vmem:[#allocation46_spill] sm:$0xff]  ;;  %v7273_v42 = vld [vmem:[#allocation21_spill] sm:$0xff] }
 0x1b8   :  { %7176 = vst [vmem:[#allocation53_spill] sm:$0xff] %v4425_v14  ;;  %v4512_v11 = vmul.f32 0.21860483, %v7233_v46  ;;  %v7239_v10 = vld [vmem:[#allocation16_spill] sm:$0xff]  ;;  %v7241_v59 = vld [vmem:[#allocation134_spill] sm:$0xff]  ;;  %v7247_v46 = vld [vmem:[#allocation135_spill] sm:$0xff] }
 0x1b9   :  { %7178 = vst [vmem:[#allocation162_spill] sm:$0xff] %v4428_v40  ;;  %v4521_v22 = vmul.f32 0.21860483, %v7239_v10  ;;  %v4524_v8 = vmul.f32 0.21860483, %v7241_v59  ;;  %v7253_v10 = vld [vmem:[#allocation174_spill] sm:$0xff] }
 0x1ba   :  { %7180 = vst [vmem:[#allocation146_spill] sm:$0xff] %v4431_v60  ;;  %v7255_v59 = vld [vmem:[#allocation17_spill] sm:$0xff]  ;;  %v4574_v28 = vmul.f32 0.21860483, %v7273_v42  ;;  %v7281_v7 = vld [vmem:[#allocation24_spill] sm:$0xff]  ;;  %v1043_v42 = vrot.slane %v4425_v14, 2 }
 0x1bb   :  { %7182 = vst [vmem:[#allocation158_spill] sm:$0xff] %v4434_v21  ;;  %v4533_v21 = vmul.f32 0.21860483, %v7247_v46  ;;  %v4545_v61 = vmul.f32 0.21860483, %v7255_v59  ;;  %v7261_v46 = vld [vmem:[#allocation178_spill] sm:$0xff] }
 0x1bc   :  { %7184 = vst [vmem:[#allocation56_spill] sm:$0xff] %v4437_v30  ;;  %v7269_v59 = vld [vmem:[#allocation179_spill] sm:$0xff]  ;;  %v4587_v41 = vmul.f32 0.21860483, %v7281_v7  ;;  %v1051_v7 = vrot.slane %v4443_v13, 2  ;;  %v7290_v56 = vld [vmem:[#allocation124_spill] sm:$0xff] }
 0x1bd   :  { %7186 = vst [vmem:[#allocation54_spill] sm:$0xff] %v4440_v25  ;;  %v4609_v14 = vmul.f32 0.21860483, %v7290_v56  ;;  %v7294_v60 = vld [vmem:[#allocation183_spill] sm:$0xff] }
 0x1be   :  { %7188 = vst [vmem:[#allocation44_spill] sm:$0xff] %v4443_v13  ;;  %v7297_v13 = vld [vmem:[#allocation129_spill] sm:$0xff] }
 0x1bf   :  { %7190 = vst [vmem:[#allocation55_spill] sm:$0xff] %v4446_v1  ;;  %v4509_v1 = vmul.f32 0.21860483, %v7231_v12  ;;  %v7245_v12 = vld [vmem:[#allocation172_spill] sm:$0xff]  ;;  %v4622_v47 = vmul.f32 0.21860483, %v7297_v13 }
 0x1c0   :  { %7192 = vst [vmem:[#allocation59_spill] sm:$0xff] %v4449_v19  ;;  %v1058_v13 = vrot.slane %v4461_v24, 2 }
 0x1c1   :  { %7194 = vst [vmem:[#allocation60_spill] sm:$0xff] %v4452_v3 }
 0x1c2   :  { %7196 = vst [vmem:[#allocation61_spill] sm:$0xff] %v4455_v53 }
 0x1c3   :  { %7198 = vst [vmem:[#allocation66_spill] sm:$0xff] %v4458_v49  ;;  %v4485_v49 = vmul.f32 0.21860483, %v7215_v0  ;;  %v7229_v0 = vld [vmem:[#allocation168_spill] sm:$0xff] }
 0x1c4   :  { %7200 = vst [vmem:[#allocation67_spill] sm:$0xff] %v4461_v24 }
 0x1c5   :  { %7202 = vst [vmem:[#allocation71_spill] sm:$0xff] %v4464_v17 }
 0x1c6   :  { %7204 = vst [vmem:[#allocation72_spill] sm:$0xff] %v4467_v52 }
 0x1c7   :  { %7206 = vst [vmem:[#allocation78_spill] sm:$0xff] %v4470_v27  ;;  %v4494_v27 = vadd.f32 %v859_v31, %v7221_v5  ;;  %v7235_v31 = vld [vmem:[#allocation176_spill] sm:$0xff] }
 0x1c8   :  { %7208 = vst [vmem:[#allocation79_spill] sm:$0xff] %v4473_v2  ;;  %v4515_v5 = vmul.f32 0.21860483, %v7235_v31  ;;  %v7249_v31 = vld [vmem:[#allocation136_spill] sm:$0xff] }
 0x1c9   :  { %7210 = vst [vmem:[#allocation82_spill] sm:$0xff] %v4476_v45  ;;  %v4536_v15 = vmul.f32 0.21860483, %v7249_v31  ;;  %v7263_v31 = vld [vmem:[#allocation138_spill] sm:$0xff] }
 0x1ca   :  { %7212 = vst [vmem:[#allocation83_spill] sm:$0xff] %v4479_v58  ;;  %v4558_v26 = vmul.f32 0.21860483, %v7263_v31  ;;  %v7277_v31 = vld [vmem:[#allocation181_spill] sm:$0xff] }
 0x1cb   :  { %7214 = vst [vmem:[#allocation85_spill] sm:$0xff] %v4482_v33  ;;  %v4506_v33 = vadd.f32 %v861_v38, %v7229_v0  ;;  %v7243_v38 = vld [vmem:[#allocation97_spill] sm:$0xff] }
 0x1cc   :  { %7216 = vst [vmem:[#allocation86_spill] sm:$0xff] %v4485_v49  ;;  %v4527_v0 = vmul.f32 0.21860483, %v7243_v38  ;;  %v7257_v38 = vld [vmem:[#allocation137_spill] sm:$0xff] }
 0x1cd   :  { %7218 = vst [vmem:[#allocation88_spill] sm:$0xff] %v4488_v44  ;;  %v4548_v37 = vmul.f32 0.21860483, %v7257_v38  ;;  %v4568_v38 = vadd.f32 %v4359_v32, %v7269_v59  ;;  %v7283_v32 = vld [vmem:[#allocation119_spill] sm:$0xff] }
 0x1ce   :  { %7220 = vst [vmem:[#allocation89_spill] sm:$0xff] %v4491_v9  ;;  %v4590_v59 = vmul.f32 0.21860483, %v7283_v32 }
 0x1cf   :  { %7222 = vst [vmem:[#allocation91_spill] sm:$0xff] %v4494_v27  ;;  %v4518_v27 = vadd.f32 %v864_v18, %v7237_v57  ;;  %v7251_v18 = vld [vmem:[#allocation36_spill] sm:$0xff] }
 0x1d0   :  { %7224 = vst [vmem:[#allocation92_spill] sm:$0xff] %v4497_v63  ;;  %v4539_v57 = vmul.f32 0.21860483, %v7251_v18  ;;  %v7265_v18 = vld [vmem:[#allocation20_spill] sm:$0xff] }
 0x1d1   :  { %7226 = vst [vmem:[#allocation65_spill] sm:$0xff] %v4500_v34  ;;  %v4561_v54 = vmul.f32 0.21860483, %v7265_v18  ;;  %v4581_v18 = vadd.f32 %v4362_v51, %v7277_v31  ;;  %v1048_v51 = vrot.slane %v4437_v30, 2  ;;  %v1049_v31 = vrot.slane %v4440_v25, 2  ;;  %v7295_v25 = vld [vmem:[#allocation167_spill] sm:$0xff] }
 0x1d2   :  { %7228 = vst [vmem:[#allocation70_spill] sm:$0xff] %v4503_v43  ;;  %v4616_v30 = vadd.f32 %v4372_v4, %v7294_v60  ;;  %v4619_v16 = vmul.f32 0.21860483, %v7295_v25  ;;  %v1063_v25 = vrot.slane %v4473_v2, 2  ;;  %v1079_v2 = vrot.slane %v4512_v11, 2 }
 0x1d3   :  { %7230 = vst [vmem:[#allocation77_spill] sm:$0xff] %v4506_v33  ;;  %v4530_v33 = vadd.f32 %v866_v55, %v7245_v12  ;;  %v7259_v55 = vld [vmem:[#allocation102_spill] sm:$0xff]  ;;  %v4634_v4 = vsel %vm1042_vm1, %v1048_v51, %v1049_v31  ;;  %v4637_v60 = vsel %vm1042_vm1, %v1049_v31, %v1051_v7  ;;  %v1069_v51 = vrot.slane %v4488_v44, 2 }
 0x1d4   :  { %7232 = vst [vmem:[#allocation81_spill] sm:$0xff] %v4509_v1  ;;  %v4551_v12 = vmul.f32 0.21860483, %v7259_v55  ;;  %v1073_v7 = vrot.slane %v4497_v63, 2  ;;  %v1074_v31 = vrot.slane %v4500_v34, 2  ;;  %v1081_v44 = vrot.slane %v4515_v5, 2 }
 0x1d5   :  { %7234 = vst [vmem:[#allocation84_spill] sm:$0xff] %v4512_v11  ;;  %v1083_v63 = vrot.slane %v4521_v22, 2  ;;  %v1084_v34 = vrot.slane %v4524_v8, 2 }
 0x1d6   :  { %7236 = vst [vmem:[#allocation52_spill] sm:$0xff] %v4515_v5 }
 0x1d7   :  { %7238 = vst [vmem:[#allocation87_spill] sm:$0xff] %v4518_v27  ;;  %v4542_v27 = vadd.f32 %v869_v23, %v7253_v10  ;;  %v7267_v23 = vld [vmem:[#allocation105_spill] sm:$0xff] }
 0x1d8   :  { %7240 = vst [vmem:[#allocation62_spill] sm:$0xff] %v4521_v22  ;;  %v4564_v10 = vmul.f32 0.21860483, %v7267_v23 }
 0x1d9   :  { %7242 = vst [vmem:[#allocation90_spill] sm:$0xff] %v4524_v8  ;;  %v1082_v8 = vsel %vm1042_vm1, %v1079_v2, %v1081_v44 }
 0x1da   :  { %7244 = vst [vmem:[#allocation63_spill] sm:$0xff] %v4527_v0  ;;  %v1101_v44 = vrot.slane %v4564_v10, 2 }
 0x1db   :  { %7246 = vst [vmem:[#allocation93_spill] sm:$0xff] %v4530_v33  ;;  %v4555_v33 = vadd.f32 %v4356_v29, %v7261_v46  ;;  %v7275_v29 = vld [vmem:[#allocation109_spill] sm:$0xff] }
 0x1dc   :  { %7248 = vst [vmem:[#allocation166_spill] sm:$0xff] %v4533_v21  ;;  %v4577_v46 = vmul.f32 0.21860483, %v7275_v29  ;;  %v1044_v29 = vrot.slane %v4428_v40, 2  ;;  %v7292_v40 = vld [vmem:[#allocation161_spill] sm:$0xff] }
 0x1dd   :  { %7250 = vst [vmem:[#allocation68_spill] sm:$0xff] %v4536_v15  ;;  %v4612_v39 = vmul.f32 0.21860483, %v7292_v40  ;;  %v1054_v40 = vrot.slane %v4452_v3, 2  ;;  %v1071_v3 = vrot.slane %v4491_v9, 2 }
 0x1de   :  { %7252 = vst [vmem:[#allocation74_spill] sm:$0xff] %v4539_v57  ;;  %v4629_v56 = vsel %vm1042_vm1, %v1044_v29, %v1046_v36  ;;  %v1064_v36 = vrot.slane %v4476_v45, 2 }
 0x1df   :  { %7254 = vst [vmem:[#allocation57_spill] sm:$0xff] %v4542_v27  ;;  %v7271_v27 = vld [vmem:[#allocation139_spill] sm:$0xff] }
 0x1e0   :  { %7256 = vst [vmem:[#allocation80_spill] sm:$0xff] %v4545_v61  ;;  %v4571_v55 = vmul.f32 0.21860483, %v7271_v27  ;;  %v7285_v27 = vld [vmem:[#allocation153_spill] sm:$0xff] }
 0x1e1   :  { %7258 = vst [vmem:[#allocation58_spill] sm:$0xff] %v4548_v37 }
 0x1e2   :  { %7260 = vst [vmem:[#allocation123_spill] sm:$0xff] %v4551_v12 }
 0x1e3   :  { %7262 = vst [vmem:[#allocation170_spill] sm:$0xff] %v4555_v33  ;;  %v7279_v33 = vld [vmem:[#allocation140_spill] sm:$0xff] }
 0x1e4   :  { %7264 = vst [vmem:[#allocation32_spill] sm:$0xff] %v4558_v26  ;;  %v4584_v23 = vmul.f32 0.21860483, %v7279_v33  ;;  %v7287_v33 = vld [vmem:[#allocation182_spill] sm:$0xff] }
 0x1e5   :  { %7266 = vst [vmem:[#allocation64_spill] sm:$0xff] %v4561_v54  ;;  %v4603_v32 = vadd.f32 %v4365_v48, %v7287_v33  ;;  %v1053_v48 = vrot.slane %v4449_v19, 2  ;;  %v4626_v33 = vsel %vm1042_vm1, %v1043_v42, %v1044_v29  ;;  %v1059_v19 = vrot.slane %v4464_v17, 2 }
 0x1e6   :  { %7268 = vst [vmem:[#allocation73_spill] sm:$0xff] %v4564_v10  ;;  %v1061_v42 = vrot.slane %v4467_v52, 2  ;;  %v1066_v29 = vrot.slane %v4479_v58, 2  ;;  %v1076_v17 = vrot.slane %v4503_v43, 2  ;;  %v1078_v52 = vrot.slane %v4509_v1, 2 }
 0x1e7   :  { %7270 = vst [vmem:[#allocation203_spill] sm:$0xff] %v4568_v38  ;;  %v4593_v38 = vmul.f32 0.21860483, %v7285_v27  ;;  %v1055_v45 = vsel %vm1042_vm1, %v1053_v48, %v1054_v40  ;;  %v1086_v43 = vrot.slane %v4527_v0, 2  ;;  %v1065_v1 = vsel %vm1042_vm1, %v1063_v25, %v1064_v36 }
 0x1e8   :  { %7272 = vst [vmem:[#allocation204_spill] sm:$0xff] %v4571_v55  ;;  %v1062_v9 = vsel %vm1042_vm1, %v1059_v19, %v1061_v42  ;;  %v1067_v11 = vsel %vm1042_vm1, %v1064_v36, %v1066_v29  ;;  %v1088_v42 = vrot.slane %v4533_v21, 2  ;;  %v1089_v0 = vrot.slane %v4536_v15, 2 }
 0x1e9   :  { %7274 = vst [vmem:[#allocation205_spill] sm:$0xff] %v4574_v28  ;;  %v1091_v25 = vrot.slane %v4539_v57, 2  ;;  %v1093_v36 = vrot.slane %v4545_v61, 2  ;;  %v1094_v29 = vrot.slane %v4548_v37, 2 }
 0x1ea   :  { %7276 = vst [vmem:[#allocation206_spill] sm:$0xff] %v4577_v46  ;;  %v1090_v10 = vsel %vm1042_vm1, %v1088_v42, %v1089_v0 }
 0x1eb   :  { %7278 = vst [vmem:[#allocation207_spill] sm:$0xff] %v4581_v18  ;;  %v7288_v18 = vld [vmem:[#allocation156_spill] sm:$0xff] }
 0x1ec   :  { %7280 = vst [vmem:[#allocation208_spill] sm:$0xff] %v4584_v23  ;;  %v4606_v27 = vmul.f32 0.21860483, %v7288_v18  ;;  %v1056_v18 = vrot.slane %v4455_v53, 2  ;;  %v1068_v53 = vrot.slane %v4485_v49, 2  ;;  %v1060_v49 = vsel %vm1042_vm1, %v1058_v13, %v1059_v19 }
 0x1ed   :  { %7282 = vst [vmem:[#allocation209_spill] sm:$0xff] %v4587_v41  ;;  %v1075_v13 = vsel %vm1042_vm1, %v1073_v7, %v1074_v31  ;;  %v1080_v19 = vsel %vm1042_vm1, %v1078_v52, %v1079_v2  ;;  %v1098_v52 = vrot.slane %v4558_v26, 2  ;;  %v1103_v2 = vrot.slane %v4571_v55, 2 }
 0x1ee   :  { %7284 = vst [vmem:[#allocation210_spill] sm:$0xff] %v4590_v59  ;;  %v1057_v58 = vsel %vm1042_vm1, %v1054_v40, %v1056_v18  ;;  %v1070_v48 = vsel %vm1042_vm1, %v1068_v53, %v1069_v51  ;;  %v1072_v40 = vsel %vm1042_vm1, %v1069_v51, %v1071_v3  ;;  %v1077_v18 = vsel %vm1042_vm1, %v1074_v31, %v1076_v17 }
 0x1ef   :  { %7286 = vst [vmem:[#allocation211_spill] sm:$0xff] %v4593_v38  ;;  %v1085_v53 = vsel %vm1042_vm1, %v1083_v63, %v1084_v34  ;;  %v1087_v3 = vsel %vm1042_vm1, %v1084_v34, %v1086_v43  ;;  %v1096_v17 = vrot.slane %v4551_v12, 2  ;;  %v1099_v51 = vrot.slane %v4561_v54, 2 }
 0x1f0   :  { %7289 = vst [vmem:[#allocation212_spill] sm:$0xff] %v4606_v27  ;;  %v1104_v7 = vrot.slane %v4574_v28, 2  ;;  %v1106_v31 = vrot.slane %v4577_v46, 2  ;;  %v1108_v63 = vrot.slane %v4584_v23, 2  ;;  %v1109_v43 = vrot.slane %v4587_v41, 2 }
 0x1f1   :  { %7291 = vst [vmem:[#allocation213_spill] sm:$0xff] %v4609_v14  ;;  %v1111_v34 = vrot.slane %v4590_v59, 2  ;;  %v1113_v12 = vrot.slane %v4593_v38, 2  ;;  %v1114_v26 = vrot.slane %v4606_v27, 2  ;;  %v1116_v54 = vrot.slane %v4609_v14, 2 }
 0x1f2   :  { %7293 = vst [vmem:[#allocation214_spill] sm:$0xff] %v4612_v39  ;;  %v1092_v55 = vsel %vm1042_vm1, %v1089_v0, %v1091_v25  ;;  %v1118_v28 = vrot.slane %v4612_v39, 2  ;;  %v1119_v46 = vrot.slane %v4619_v16, 2  ;;  %v1095_v23 = vsel %vm1042_vm1, %v1093_v36, %v1094_v29 }
 0x1f3   :  { %7296 = vst [vmem:[#allocation215_spill] sm:$0xff] %v4619_v16  ;;  %v1097_v41 = vsel %vm1042_vm1, %v1094_v29, %v1096_v17  ;;  %v1100_v59 = vsel %vm1042_vm1, %v1098_v52, %v1099_v51  ;;  %v1121_v38 = vrot.slane %v4622_v47, 2  ;;  %v1102_v27 = vsel %vm1042_vm1, %v1099_v51, %v1101_v44 }
 0x1f4   :  { %7298 = vst [vmem:[#allocation216_spill] sm:$0xff] %v4622_v47  ;;  %v1105_v14 = vsel %vm1042_vm1, %v1103_v2, %v1104_v7  ;;  %v1107_v42 = vsel %vm1042_vm1, %v1104_v7, %v1106_v31  ;;  %v1110_v0 = vsel %vm1042_vm1, %v1108_v63, %v1109_v43  ;;  %v4702_v25 = vsel %vm1042_vm1, %v1109_v43, %v1111_v34 }
 0x1f5   :  { %v4705_v16 = vsel %vm1042_vm1, %v1113_v12, %v1114_v26  ;;  %v4708_v36 = vsel %vm1042_vm1, %v1114_v26, %v1116_v54  ;;  %v4712_v29 = vadd.f32 %v4626_v33, %v4369_v6  ;;  %v4715_v17 = vsel %vm1042_vm1, %v1118_v28, %v1119_v46  ;;  %v7299_v28 = vld [vmem:[#allocation111_spill] sm:$0xff]  ;;  %v7301_v33 = vld [vmem:[#allocation112_spill] sm:$0xff] }
 0x1f6   :  { %v4719_v52 = vadd.f32 %v4629_v56, %v4376_v35  ;;  %v4723_v51 = vadd.f32 %v4634_v4, %v4380_v20  ;;  %v4727_v12 = vadd.f32 %v4637_v60, %v4383_v62  ;;  %v4730_v54 = vsel %vm1042_vm1, %v1119_v46, %v1121_v38  ;;  %v7303_v56 = vld [vmem:[#allocation116_spill] sm:$0xff]  ;;  %v7305_v20 = vld [vmem:[#allocation47_spill] sm:$0xff]  ;;  %v7307_v62 = vld [vmem:[#allocation177_spill] sm:$0xff] }
 0x1f7   :  { %v4733_v6 = vadd.f32 %v1055_v45, %v4386_v50  ;;  %v4736_v26 = vadd.f32 %v1057_v58, %v7299_v28  ;;  %v4739_v35 = vadd.f32 %v1060_v49, %v7301_v33  ;;  %v4742_v44 = vadd.f32 %v1062_v9, %v7303_v56  ;;  %v7309_v46 = vld [vmem:[#allocation25_spill] sm:$0xff]  ;;  %v7311_v45 = vld [vmem:[#allocation26_spill] sm:$0xff]  ;;  %v7313_v58 = vld [vmem:[#allocation48_spill] sm:$0xff] }
 0x1f8   :  { %v4745_v4 = vadd.f32 %v1065_v1, %v7305_v20  ;;  %v4748_v60 = vadd.f32 %v1067_v11, %v7307_v62  ;;  %v4751_v38 = vadd.f32 %v1070_v48, %v7309_v46  ;;  %v4754_v50 = vadd.f32 %v1072_v40, %v7311_v45  ;;  %v7315_v49 = vld [vmem:[#allocation45_spill] sm:$0xff]  ;;  %v7317_v9 = vld [vmem:[#allocation28_spill] sm:$0xff]  ;;  %v7319_v1 = vld [vmem:[#allocation30_spill] sm:$0xff] }
 0x1f9   :  { %7300 = vst [vmem:[#allocation111_spill] sm:$0xff] %v4736_v26  ;;  %v4757_v2 = vadd.f32 %v1075_v13, %v7313_v58  ;;  %v4760_v7 = vadd.f32 %v1077_v18, %v7315_v49  ;;  %v4763_v31 = vadd.f32 %v1080_v19, %v7317_v9  ;;  %v4766_v63 = vadd.f32 %v1082_v8, %v7319_v1  ;;  %v7321_v11 = vld [vmem:[#allocation31_spill] sm:$0xff]  ;;  %v7324_v40 = vld [vmem:[#allocation69_spill] sm:$0xff]  ;;  %v7325_v13 = vld [vmem:[#allocation158_spill] sm:$0xff] }
 0x1fa   :  { %7302 = vst [vmem:[#allocation112_spill] sm:$0xff] %v4739_v35  ;;  %v4769_v43 = vadd.f32 %v1085_v53, %v7321_v11  ;;  %v7323_v48 = vld [vmem:[#allocation175_spill] sm:$0xff]  ;;  %v4775_v28 = vmul.f32 0.27513826, %v7324_v40  ;;  %v4778_v33 = vadd.f32 %v1087_v3, %v7325_v13  ;;  %v7328_v19 = vld [vmem:[#allocation188_spill] sm:$0xff]  ;;  %v7329_v8 = vld [vmem:[#allocation194_spill] sm:$0xff] }
 0x1fb   :  { %7304 = vst [vmem:[#allocation116_spill] sm:$0xff] %v4742_v44  ;;  %v4772_v34 = vmul.f32 0.27513826, %v7323_v48  ;;  %v7327_v18 = vld [vmem:[#allocation127_spill] sm:$0xff]  ;;  %v4784_v20 = vmul.f32 0.27513826, %v7328_v19 }
 0x1fc   :  { %7306 = vst [vmem:[#allocation47_spill] sm:$0xff] %v4745_v4  ;;  %v4781_v56 = vmul.f32 0.27513826, %v7327_v18  ;;  %v4787_v62 = vmul.f32 0.27513826, %v7329_v8  ;;  %v7330_v53 = vld [vmem:[#allocation55_spill] sm:$0xff] }
 0x1fd   :  { %7308 = vst [vmem:[#allocation177_spill] sm:$0xff] %v4748_v60  ;;  %v4790_v46 = vadd.f32 %v1090_v10, %v7330_v53  ;;  %v7332_v45 = vld [vmem:[#allocation195_spill] sm:$0xff]  ;;  %v7333_v49 = vld [vmem:[#allocation196_spill] sm:$0xff]  ;;  %v7334_v3 = vld [vmem:[#allocation197_spill] sm:$0xff] }
 0x1fe   :  { %7310 = vst [vmem:[#allocation25_spill] sm:$0xff] %v4751_v38  ;;  %v4793_v58 = vmul.f32 0.27513826, %v7332_v45  ;;  %v4796_v9 = vmul.f32 0.27513826, %v7333_v49  ;;  %v7335_v11 = vld [vmem:[#allocation66_spill] sm:$0xff] }
 0x1ff   :  { %7312 = vst [vmem:[#allocation26_spill] sm:$0xff] %v4754_v50  ;;  %v4799_v1 = vmul.f32 0.27513826, %v7334_v3  ;;  %v4802_v48 = vadd.f32 %v1092_v55, %v7335_v11  ;;  %v7337_v40 = vld [vmem:[#allocation173_spill] sm:$0xff]  ;;  %v7338_v19 = vld [vmem:[#allocation198_spill] sm:$0xff]  ;;  %v7339_v10 = vld [vmem:[#allocation199_spill] sm:$0xff] }
 0x200   :  { %7314 = vst [vmem:[#allocation48_spill] sm:$0xff] %v4757_v2  ;;  %v4805_v13 = vmul.f32 0.27513826, %v7337_v40  ;;  %v4808_v8 = vmul.f32 0.27513826, %v7338_v19  ;;  %v7340_v45 = vld [vmem:[#allocation78_spill] sm:$0xff] }
 0x201   :  { %7316 = vst [vmem:[#allocation45_spill] sm:$0xff] %v4760_v7  ;;  %v4811_v53 = vmul.f32 0.27513826, %v7339_v10  ;;  %v4814_v18 = vadd.f32 %v1095_v23, %v7340_v45  ;;  %v7342_v49 = vld [vmem:[#allocation180_spill] sm:$0xff]  ;;  %v7344_v55 = vld [vmem:[#allocation201_spill] sm:$0xff]  ;;  %v7348_v10 = vld [vmem:[#allocation34_spill] sm:$0xff] }
 0x202   :  { %7318 = vst [vmem:[#allocation28_spill] sm:$0xff] %v4763_v31  ;;  %v4817_v47 = vmul.f32 0.27513826, %v7342_v49  ;;  %v7343_v3 = vld [vmem:[#allocation200_spill] sm:$0xff]  ;;  %v4823_v11 = vmul.f32 0.27513826, %v7344_v55 }
 0x203   :  { %7320 = vst [vmem:[#allocation30_spill] sm:$0xff] %v4766_v63  ;;  %v4820_v39 = vmul.f32 0.27513826, %v7343_v3  ;;  %v7345_v40 = vld [vmem:[#allocation85_spill] sm:$0xff]  ;;  %v7347_v19 = vld [vmem:[#allocation184_spill] sm:$0xff]  ;;  %v7349_v23 = vld [vmem:[#allocation202_spill] sm:$0xff] }
 0x204   :  { %7322 = vst [vmem:[#allocation31_spill] sm:$0xff] %v4769_v43  ;;  %v4826_v37 = vadd.f32 %v1097_v41, %v7345_v40  ;;  %v4829_v61 = vmul.f32 0.27513826, %v7347_v19  ;;  %v4832_v57 = vmul.f32 0.27513826, %v7348_v10  ;;  %v7350_v49 = vld [vmem:[#allocation91_spill] sm:$0xff] }
 0x205   :  { %7326 = vst [vmem:[#allocation175_spill] sm:$0xff] %v4778_v33  ;;  %v4835_v45 = vmul.f32 0.27513826, %v7349_v23  ;;  %v4838_v15 = vadd.f32 %v1100_v59, %v7350_v49  ;;  %v7352_v3 = vld [vmem:[#allocation76_spill] sm:$0xff]  ;;  %v7353_v55 = vld [vmem:[#allocation38_spill] sm:$0xff]  ;;  %v7354_v41 = vld [vmem:[#allocation39_spill] sm:$0xff] }
 0x206   :  { %7331 = vst [vmem:[#allocation69_spill] sm:$0xff] %v4790_v46  ;;  %v4841_v21 = vmul.f32 0.27513826, %v7352_v3  ;;  %v4844_v22 = vmul.f32 0.27513826, %v7353_v55  ;;  %v7355_v19 = vld [vmem:[#allocation77_spill] sm:$0xff] }
 0x207   :  { %7336 = vst [vmem:[#allocation158_spill] sm:$0xff] %v4802_v48  ;;  %v4847_v40 = vmul.f32 0.27513826, %v7354_v41  ;;  %v4850_v5 = vadd.f32 %v1102_v27, %v7355_v19  ;;  %v7357_v10 = vld [vmem:[#allocation191_spill] sm:$0xff]  ;;  %v7358_v23 = vld [vmem:[#allocation40_spill] sm:$0xff]  ;;  %v7359_v59 = vld [vmem:[#allocation46_spill] sm:$0xff] }
 0x208   :  { %7341 = vst [vmem:[#allocation188_spill] sm:$0xff] %v4814_v18  ;;  %v4853_v24 = vmul.f32 0.27513826, %v7357_v10  ;;  %v4859_v49 = vmul.f32 0.27513826, %v7359_v59  ;;  %v7360_v3 = vld [vmem:[#allocation87_spill] sm:$0xff] }
 0x209   :  { %7346 = vst [vmem:[#allocation194_spill] sm:$0xff] %v4826_v37  ;;  %v4856_v37 = vmul.f32 0.27513826, %v7358_v23  ;;  %v7362_v55 = vld [vmem:[#allocation176_spill] sm:$0xff]  ;;  %v7364_v27 = vld [vmem:[#allocation134_spill] sm:$0xff]  ;;  %v7365_v10 = vld [vmem:[#allocation93_spill] sm:$0xff] }
 0x20a   :  { %7351 = vst [vmem:[#allocation55_spill] sm:$0xff] %v4838_v15  ;;  %v4862_v15 = vadd.f32 %v1105_v14, %v7360_v3  ;;  %v4865_v18 = vmul.f32 0.27513826, %v7362_v55  ;;  %v7363_v41 = vld [vmem:[#allocation16_spill] sm:$0xff]  ;;  %v4871_v19 = vmul.f32 0.27513826, %v7364_v27 }
 0x20b   :  { %7356 = vst [vmem:[#allocation196_spill] sm:$0xff] %v4850_v5  ;;  %v4868_v48 = vmul.f32 0.27513826, %v7363_v41  ;;  %v4874_v5 = vadd.f32 %v1107_v42, %v7365_v10  ;;  %v7367_v23 = vld [vmem:[#allocation97_spill] sm:$0xff]  ;;  %v7368_v59 = vld [vmem:[#allocation135_spill] sm:$0xff]  ;;  %v7369_v14 = vld [vmem:[#allocation136_spill] sm:$0xff] }
 0x20c   :  { %7361 = vst [vmem:[#allocation197_spill] sm:$0xff] %v4862_v15  ;;  %v4877_v46 = vmul.f32 0.27513826, %v7367_v23  ;;  %v4880_v33 = vmul.f32 0.27513826, %v7368_v59  ;;  %v7370_v55 = vld [vmem:[#allocation57_spill] sm:$0xff] }
 0x20d   :  { %7366 = vst [vmem:[#allocation66_spill] sm:$0xff] %v4874_v5  ;;  %v4883_v3 = vmul.f32 0.27513826, %v7369_v14  ;;  %v4886_v15 = vadd.f32 %v1110_v0, %v7370_v55  ;;  %v7372_v41 = vld [vmem:[#allocation36_spill] sm:$0xff]  ;;  %v7373_v27 = vld [vmem:[#allocation17_spill] sm:$0xff]  ;;  %v7375_v23 = vld [vmem:[#allocation170_spill] sm:$0xff] }
 0x20e   :  { %v4889_v43 = vmul.f32 0.27513826, %v7372_v41  ;;  %v4892_v63 = vmul.f32 0.27513826, %v7373_v27  ;;  %v7374_v42 = vld [vmem:[#allocation137_spill] sm:$0xff]  ;;  %v4899_v5 = vadd.f32 %v4702_v25, %v7375_v23  ;;  %v7377_v59 = vld [vmem:[#allocation102_spill] sm:$0xff] }
 0x20f   :  { %7371 = vst [vmem:[#allocation198_spill] sm:$0xff] %v4886_v15  ;;  %v4895_v10 = vmul.f32 0.27513826, %v7374_v42  ;;  %v4902_v31 = vmul.f32 0.27513826, %v7377_v59  ;;  %v7378_v14 = vld [vmem:[#allocation138_spill] sm:$0xff] }
 0x210   :  { %7376 = vst [vmem:[#allocation199_spill] sm:$0xff] %v4899_v5  ;;  %v4905_v7 = vmul.f32 0.27513826, %v7378_v14  ;;  %v7379_v0 = vld [vmem:[#allocation20_spill] sm:$0xff]  ;;  %v7380_v41 = vld [vmem:[#allocation203_spill] sm:$0xff]  ;;  %v7382_v15 = vld [vmem:[#allocation105_spill] sm:$0xff] }
 0x211   :  { %v4908_v55 = vmul.f32 0.27513826, %v7379_v0  ;;  %v4912_v27 = vadd.f32 %v4705_v16, %v7380_v41  ;;  %v4915_v42 = vmul.f32 0.27513826, %v7382_v15  ;;  %v7383_v2 = vld [vmem:[#allocation139_spill] sm:$0xff]  ;;  %v7384_v25 = vld [vmem:[#allocation21_spill] sm:$0xff] }
 0x212   :  { %v4918_v50 = vmul.f32 0.27513826, %v7383_v2  ;;  %v4921_v23 = vmul.f32 0.27513826, %v7384_v25  ;;  %v7385_v59 = vld [vmem:[#allocation207_spill] sm:$0xff]  ;;  %v7387_v5 = vld [vmem:[#allocation109_spill] sm:$0xff] }
 0x213   :  { %7381 = vst [vmem:[#allocation78_spill] sm:$0xff] %v4912_v27  ;;  %v4925_v14 = vadd.f32 %v4708_v36, %v7385_v59  ;;  %v4928_v0 = vmul.f32 0.27513826, %v7387_v5  ;;  %v7388_v38 = vld [vmem:[#allocation140_spill] sm:$0xff]  ;;  %v7390_v15 = vld [vmem:[#allocation119_spill] sm:$0xff]  ;;  %v1284_v2 = vrot.slane %v4772_v34, 3 }
 0x214   :  { %v4931_v60 = vmul.f32 0.27513826, %v7388_v38  ;;  %v7389_v16 = vld [vmem:[#allocation24_spill] sm:$0xff]  ;;  %v4937_v27 = vmul.f32 0.27513826, %v7390_v15  ;;  %v1285_v25 = vrot.slane %v4775_v28, 3 }
 0x215   :  { %7386 = vst [vmem:[#allocation200_spill] sm:$0xff] %v4925_v14  ;;  %v4934_v41 = vmul.f32 0.27513826, %v7389_v16  ;;  %v1287_v4 = vrot.slane %v4781_v56, 3  ;;  %v7391_v36 = vld [vmem:[#allocation153_spill] sm:$0xff]  ;;  %v1289_v5 = vrot.slane %v4784_v20, 3  ;;  %v4949_v16 = vadd.f32 %v4715_v17, %v4603_v32 }
 0x216   :  { %v4943_v59 = vmul.f32 0.27513826, %v7391_v36  ;;  %v1290_v38 = vrot.slane %v4787_v62, 3  ;;  %v7392_v15 = vld [vmem:[#allocation156_spill] sm:$0xff]  ;;  %v7394_v28 = vld [vmem:[#allocation161_spill] sm:$0xff]  ;;  %v4962_v36 = vadd.f32 %v4730_v54, %v4616_v30  ;;  %v7395_v20 = vld [vmem:[#allocation167_spill] sm:$0xff] }
 0x217   :  { %v4952_v14 = vmul.f32 0.27513826, %v7392_v15  ;;  %v7393_v34 = vld [vmem:[#allocation124_spill] sm:$0xff]  ;;  %v4958_v56 = vmul.f32 0.27513826, %v7394_v28  ;;  %v7396_v62 = vld [vmem:[#allocation129_spill] sm:$0xff]  ;;  %v4972_v15 = vsel %vm1283_vm2, %v1284_v2, %v1285_v25  ;;  %v4975_v17 = vsel %vm1283_vm2, %v1285_v25, %v1287_v4 }
 0x218   :  { %v4955_v44 = vmul.f32 0.27513826, %v7393_v34  ;;  %v4965_v35 = vmul.f32 0.27513826, %v7395_v20  ;;  %v4968_v26 = vmul.f32 0.27513826, %v7396_v62  ;;  %v4980_v30 = vsel %vm1283_vm2, %v1289_v5, %v1290_v38 }
 0x219   :  { %v1292_v32 = vrot.slane %v4793_v58, 3  ;;  %v1294_v28 = vrot.slane %v4796_v9, 3  ;;  %v1295_v34 = vrot.slane %v4799_v1, 3  ;;  %v1297_v54 = vrot.slane %v4805_v13, 3 }
 0x21a   :  { %v1299_v20 = vrot.slane %v4808_v8, 3  ;;  %v1300_v62 = vrot.slane %v4811_v53, 3  ;;  %v1302_v58 = vrot.slane %v4817_v47, 3  ;;  %v1304_v2 = vrot.slane %v4820_v39, 3 }
 0x21b   :  { %v1305_v4 = vrot.slane %v4823_v11, 3  ;;  %v1307_v25 = vrot.slane %v4829_v61, 3  ;;  %v1309_v9 = vrot.slane %v4832_v57, 3  ;;  %v1310_v1 = vrot.slane %v4835_v45, 3 }
 0x21c   :  { %v1312_v5 = vrot.slane %v4841_v21, 3  ;;  %v1314_v13 = vrot.slane %v4844_v22, 3  ;;  %v1315_v8 = vrot.slane %v4847_v40, 3  ;;  %v1317_v53 = vrot.slane %v4853_v24, 3 }
 0x21d   :  { %v1319_v47 = vrot.slane %v4856_v37, 3  ;;  %v1320_v39 = vrot.slane %v4859_v49, 3  ;;  %v1293_v11 = vsel %vm1283_vm2, %v1290_v38, %v1292_v32  ;;  %v1296_v61 = vsel %vm1283_vm2, %v1294_v28, %v1295_v34 }
 0x21e   :  { %v1298_v57 = vsel %vm1283_vm2, %v1295_v34, %v1297_v54  ;;  %v1322_v45 = vrot.slane %v4865_v18, 3  ;;  %v1301_v21 = vsel %vm1283_vm2, %v1299_v20, %v1300_v62  ;;  %v1303_v22 = vsel %vm1283_vm2, %v1300_v62, %v1302_v58 }
 0x21f   :  { %v1324_v40 = vrot.slane %v4868_v48, 3  ;;  %v1325_v24 = vrot.slane %v4871_v19, 3  ;;  %v1306_v37 = vsel %vm1283_vm2, %v1304_v2, %v1305_v4  ;;  %v1308_v49 = vsel %vm1283_vm2, %v1305_v4, %v1307_v25 }
 0x220   :  { %v1311_v38 = vsel %vm1283_vm2, %v1309_v9, %v1310_v1  ;;  %v1313_v32 = vsel %vm1283_vm2, %v1310_v1, %v1312_v5  ;;  %v1316_v34 = vsel %vm1283_vm2, %v1314_v13, %v1315_v8  ;;  %v1318_v18 = vsel %vm1283_vm2, %v1315_v8, %v1317_v53 }
 0x221   :  { %v1321_v28 = vsel %vm1283_vm2, %v1319_v47, %v1320_v39  ;;  %v1327_v62 = vrot.slane %v4877_v46, 3  ;;  %v1323_v48 = vsel %vm1283_vm2, %v1320_v39, %v1322_v45  ;;  %v1329_v19 = vrot.slane %v4880_v33, 3 }
 0x222   :  { %v1330_v54 = vrot.slane %v4883_v3, 3  ;;  %v1332_v20 = vrot.slane %v4889_v43, 3  ;;  %v1326_v58 = vsel %vm1283_vm2, %v1324_v40, %v1325_v24  ;;  %v1334_v2 = vrot.slane %v4892_v63, 3 }
 0x223   :  { %v1335_v4 = vrot.slane %v4895_v10, 3  ;;  %v1337_v25 = vrot.slane %v4902_v31, 3  ;;  %v1339_v9 = vrot.slane %v4905_v7, 3  ;;  %v1340_v46 = vrot.slane %v4908_v55, 3 }
 0x224   :  { %v1342_v1 = vrot.slane %v4915_v42, 3  ;;  %v1344_v33 = vrot.slane %v4918_v50, 3  ;;  %v1345_v3 = vrot.slane %v4921_v23, 3  ;;  %v1347_v43 = vrot.slane %v4928_v0, 3 }
 0x225   :  { %v1349_v5 = vrot.slane %v4931_v60, 3  ;;  %v1350_v63 = vrot.slane %v4934_v41, 3  ;;  %v1352_v10 = vrot.slane %v4937_v27, 3  ;;  %v1354_v31 = vrot.slane %v4943_v59, 3 }
 0x226   :  { %v1355_v7 = vrot.slane %v4952_v14, 3  ;;  %v1357_v55 = vrot.slane %v4955_v44, 3  ;;  %v1328_v42 = vsel %vm1283_vm2, %v1325_v24, %v1327_v62  ;;  %v1331_v50 = vsel %vm1283_vm2, %v1329_v19, %v1330_v54 }
 0x227   :  { %v1359_v23 = vrot.slane %v4958_v56, 3  ;;  %v1360_v0 = vrot.slane %v4965_v35, 3  ;;  %v1333_v60 = vsel %vm1283_vm2, %v1330_v54, %v1332_v20  ;;  %v1336_v41 = vsel %vm1283_vm2, %v1334_v2, %v1335_v4  ;;  %v7397_v54 = vld [vmem:[#allocation111_spill] sm:$0xff] }
 0x228   :  { %v1338_v27 = vsel %vm1283_vm2, %v1335_v4, %v1337_v25  ;;  %v1362_v59 = vrot.slane %v4968_v26, 3  ;;  %v1341_v14 = vsel %vm1283_vm2, %v1339_v9, %v1340_v46  ;;  %v1343_v44 = vsel %vm1283_vm2, %v1340_v46, %v1342_v1  ;;  %v7400_v2 = vld [vmem:[#allocation47_spill] sm:$0xff] }
 0x229   :  { %v1346_v13 = vsel %vm1283_vm2, %v1344_v33, %v1345_v3  ;;  %v1348_v8 = vsel %vm1283_vm2, %v1345_v3, %v1347_v43  ;;  %v1351_v56 = vsel %vm1283_vm2, %v1349_v5, %v1350_v63  ;;  %v1353_v35 = vsel %vm1283_vm2, %v1350_v63, %v1352_v10 }
 0x22a   :  { %v1356_v53 = vsel %vm1283_vm2, %v1354_v31, %v1355_v7  ;;  %v1358_v47 = vsel %vm1283_vm2, %v1355_v7, %v1357_v55  ;;  %v1361_v39 = vsel %vm1283_vm2, %v1359_v23, %v1360_v0  ;;  %v5052_v26 = vadd.f32 %v4972_v15, %v4712_v29  ;;  %v7398_v29 = vld [vmem:[#allocation112_spill] sm:$0xff]  ;;  %v7425_v55 = vld [vmem:[#allocation162_spill] sm:$0xff] }
 0x22b   :  { %v5056_v45 = vadd.f32 %v4975_v17, %v4719_v52  ;;  %v5060_v40 = vadd.f32 %v4980_v30, %v4723_v51  ;;  %v1363_v24 = vsel %vm1283_vm2, %v1360_v0, %v1362_v59  ;;  %v5064_v62 = vadd.f32 %v1293_v11, %v4727_v12  ;;  %v7399_v52 = vld [vmem:[#allocation116_spill] sm:$0xff]  ;;  %v7401_v30 = vld [vmem:[#allocation177_spill] sm:$0xff]  ;;  %v7426_v23 = vld [vmem:[#allocation146_spill] sm:$0xff] }
 0x22c   :  { %v5067_v19 = vadd.f32 %v1296_v61, %v4733_v6  ;;  %v5070_v20 = vadd.f32 %v1298_v57, %v7397_v54  ;;  %v5073_v15 = vadd.f32 %v1301_v21, %v7398_v29  ;;  %v5076_v17 = vadd.f32 %v1303_v22, %v7399_v52  ;;  %v7402_v12 = vld [vmem:[#allocation25_spill] sm:$0xff]  ;;  %v7403_v6 = vld [vmem:[#allocation26_spill] sm:$0xff]  ;;  %v7404_v57 = vld [vmem:[#allocation48_spill] sm:$0xff] }
 0x22d   :  { %v5079_v51 = vadd.f32 %v1306_v37, %v7400_v2  ;;  %v5082_v4 = vadd.f32 %v1308_v49, %v7401_v30  ;;  %v5085_v11 = vadd.f32 %v1311_v38, %v7402_v12  ;;  %v5088_v61 = vadd.f32 %v1313_v32, %v7403_v6  ;;  %v7405_v21 = vld [vmem:[#allocation45_spill] sm:$0xff]  ;;  %v7406_v22 = vld [vmem:[#allocation28_spill] sm:$0xff]  ;;  %v7408_v37 = vld [vmem:[#allocation30_spill] sm:$0xff] }
 0x22e   :  { %v5091_v25 = vadd.f32 %v1316_v34, %v7404_v57  ;;  %v5094_v9 = vadd.f32 %v1318_v18, %v7405_v21  ;;  %v5097_v46 = vadd.f32 %v1321_v28, %v7406_v22  ;;  %v5100_v1 = vadd.f32 %v1323_v48, %v7408_v37  ;;  %v7410_v49 = vld [vmem:[#allocation31_spill] sm:$0xff]  ;;  %v7414_v32 = vld [vmem:[#allocation69_spill] sm:$0xff]  ;;  %v7416_v34 = vld [vmem:[#allocation158_spill] sm:$0xff] }
 0x22f   :  { %v5103_v33 = vadd.f32 %v1326_v58, %v7410_v49  ;;  %v7412_v38 = vld [vmem:[#allocation175_spill] sm:$0xff]  ;;  %v5109_v43 = vadd.f32 %v1331_v50, %v7414_v32  ;;  %v5112_v5 = vadd.f32 %v1333_v60, %v7416_v34  ;;  %v7418_v18 = vld [vmem:[#allocation188_spill] sm:$0xff]  ;;  %v7420_v28 = vld [vmem:[#allocation194_spill] sm:$0xff]  ;;  %v1432_v50 = vrot.slane %v7426_v23, 4 }
 0x230   :  { %7407 = vst [vmem:[#allocation201_spill] sm:$0xff] %v5097_v46  ;;  %v5106_v3 = vadd.f32 %v1328_v42, %v7412_v38  ;;  %v5115_v63 = vadd.f32 %v1336_v41, %v7418_v18  ;;  %v5118_v10 = vadd.f32 %v1338_v27, %v7420_v28  ;;  %v7422_v48 = vld [vmem:[#allocation55_spill] sm:$0xff]  ;;  %v7424_v58 = vld [vmem:[#allocation53_spill] sm:$0xff]  ;;  %v1430_v42 = vrot.slane %v7425_v55, 4  ;;  %v7427_v0 = vld [vmem:[#allocation56_spill] sm:$0xff] }
 0x231   :  { %7409 = vst [vmem:[#allocation85_spill] sm:$0xff] %v5100_v1  ;;  %v5121_v31 = vadd.f32 %v1341_v14, %v7422_v48  ;;  %v1429_v7 = vrot.slane %v7424_v58, 4  ;;  %v1434_v59 = vrot.slane %v7427_v0, 4  ;;  %v7428_v60 = vld [vmem:[#allocation54_spill] sm:$0xff]  ;;  %v7429_v29 = vld [vmem:[#allocation44_spill] sm:$0xff]  ;;  %v7432_v27 = vld [vmem:[#allocation197_spill] sm:$0xff] }
 0x232   :  { %7411 = vst [vmem:[#allocation34_spill] sm:$0xff] %v5103_v33  ;;  %v1435_v54 = vrot.slane %v7428_v60, 4  ;;  %v1437_v41 = vrot.slane %v7429_v29, 4  ;;  %v7430_v52 = vld [vmem:[#allocation196_spill] sm:$0xff]  ;;  %v5133_v30 = vadd.f32 %v1346_v13, %v7432_v27  ;;  %v7434_v14 = vld [vmem:[#allocation66_spill] sm:$0xff]  ;;  %v7438_v21 = vld [vmem:[#allocation199_spill] sm:$0xff]  ;;  %v5154_v13 = vadd.f32 %v1363_v24, %v4962_v36 }
 0x233   :  { %7413 = vst [vmem:[#allocation202_spill] sm:$0xff] %v5106_v3  ;;  %v5130_v2 = vadd.f32 %v1343_v44, %v7430_v52  ;;  %v5136_v12 = vadd.f32 %v1348_v8, %v7434_v14  ;;  %v7436_v6 = vld [vmem:[#allocation198_spill] sm:$0xff]  ;;  %v5142_v22 = vadd.f32 %v1353_v35, %v7438_v21  ;;  %v7442_v38 = vld [vmem:[#allocation200_spill] sm:$0xff]  ;;  %v5151_v44 = vadd.f32 %v1361_v39, %v4949_v16  ;;  %v7448_v16 = vld [vmem:[#allocation61_spill] sm:$0xff] }
 0x234   :  { %7415 = vst [vmem:[#allocation91_spill] sm:$0xff] %v5109_v43  ;;  %v5139_v57 = vadd.f32 %v1351_v56, %v7436_v6  ;;  %v7440_v37 = vld [vmem:[#allocation78_spill] sm:$0xff]  ;;  %v5148_v32 = vadd.f32 %v1358_v47, %v7442_v38  ;;  %v5157_v8 = vsel %vm1428_vm3, %v1429_v7, %v1430_v42  ;;  %v7446_v56 = vld [vmem:[#allocation59_spill] sm:$0xff]  ;;  %v7447_v18 = vld [vmem:[#allocation60_spill] sm:$0xff]  ;;  %v5162_v28 = vsel %vm1428_vm3, %v1430_v42, %v1432_v50 }
 0x235   :  { %7417 = vst [vmem:[#allocation38_spill] sm:$0xff] %v5112_v5  ;;  %v5145_v49 = vadd.f32 %v1356_v53, %v7440_v37  ;;  %v1439_v34 = vrot.slane %v7446_v56, 4  ;;  %v1440_v35 = vrot.slane %v7447_v18, 4  ;;  %v5165_v53 = vsel %vm1428_vm3, %v1434_v59, %v1435_v54  ;;  %v7449_v36 = vld [vmem:[#allocation67_spill] sm:$0xff]  ;;  %v7451_v7 = vld [vmem:[#allocation72_spill] sm:$0xff]  ;;  %v7453_v60 = vld [vmem:[#allocation82_spill] sm:$0xff] }
 0x236   :  { %7419 = vst [vmem:[#allocation39_spill] sm:$0xff] %v5115_v63  ;;  %v5168_v47 = vsel %vm1428_vm3, %v1435_v54, %v1437_v41  ;;  %v1442_v39 = vrot.slane %v7448_v16, 4  ;;  %v1444_v24 = vrot.slane %v7449_v36, 4  ;;  %v7450_v48 = vld [vmem:[#allocation71_spill] sm:$0xff]  ;;  %v1447_v55 = vrot.slane %v7451_v7, 4  ;;  %v7455_v52 = vld [vmem:[#allocation86_spill] sm:$0xff] }
 0x237   :  { %7421 = vst [vmem:[#allocation77_spill] sm:$0xff] %v5118_v10  ;;  %v1445_v58 = vrot.slane %v7450_v48, 4  ;;  %v7452_v23 = vld [vmem:[#allocation79_spill] sm:$0xff]  ;;  %v1450_v29 = vrot.slane %v7453_v60, 4  ;;  %v1454_v59 = vrot.slane %v7455_v52, 4  ;;  %v7456_v27 = vld [vmem:[#allocation88_spill] sm:$0xff]  ;;  %v1441_v16 = vsel %vm1428_vm3, %v1439_v34, %v1440_v35 }
 0x238   :  { %7423 = vst [vmem:[#allocation40_spill] sm:$0xff] %v5121_v31  ;;  %v1449_v0 = vrot.slane %v7452_v23, 4  ;;  %v7454_v42 = vld [vmem:[#allocation83_spill] sm:$0xff]  ;;  %v1455_v14 = vrot.slane %v7456_v27, 4  ;;  %v7457_v54 = vld [vmem:[#allocation89_spill] sm:$0xff]  ;;  %v7458_v6 = vld [vmem:[#allocation92_spill] sm:$0xff]  ;;  %v1443_v52 = vsel %vm1428_vm3, %v1440_v35, %v1442_v39 }
 0x239   :  { %7431 = vst [vmem:[#allocation46_spill] sm:$0xff] %v5130_v2  ;;  %v1452_v50 = vrot.slane %v7454_v42, 4  ;;  %v1457_v41 = vrot.slane %v7457_v54, 4  ;;  %v1459_v21 = vrot.slane %v7458_v6, 4  ;;  %v7459_v37 = vld [vmem:[#allocation65_spill] sm:$0xff]  ;;  %v7460_v56 = vld [vmem:[#allocation70_spill] sm:$0xff]  ;;  %v1446_v27 = vsel %vm1428_vm3, %v1444_v24, %v1445_v58 }
 0x23a   :  { %7433 = vst [vmem:[#allocation87_spill] sm:$0xff] %v5133_v30  ;;  %v1460_v38 = vrot.slane %v7459_v37, 4  ;;  %v1462_v18 = vrot.slane %v7460_v56, 4  ;;  %v7461_v36 = vld [vmem:[#allocation81_spill] sm:$0xff]  ;;  %v7462_v7 = vld [vmem:[#allocation84_spill] sm:$0xff]  ;;  %v1448_v37 = vsel %vm1428_vm3, %v1445_v58, %v1447_v55  ;;  %v1451_v56 = vsel %vm1428_vm3, %v1449_v0, %v1450_v29  ;;  %v7466_v39 = vld [vmem:[#allocation63_spill] sm:$0xff] }
 0x23b   :  { %7435 = vst [vmem:[#allocation16_spill] sm:$0xff] %v5136_v12  ;;  %v1464_v48 = vrot.slane %v7461_v36, 4  ;;  %v1465_v23 = vrot.slane %v7462_v7, 4  ;;  %v7463_v60 = vld [vmem:[#allocation52_spill] sm:$0xff]  ;;  %v1453_v34 = vsel %vm1428_vm3, %v1450_v29, %v1452_v50  ;;  %v1456_v36 = vsel %vm1428_vm3, %v1454_v59, %v1455_v14  ;;  %v7469_v50 = vld [vmem:[#allocation74_spill] sm:$0xff]  ;;  %v7475_v12 = vld [vmem:[#allocation73_spill] sm:$0xff] }
 0x23c   :  { %7437 = vst [vmem:[#allocation134_spill] sm:$0xff] %v5139_v57  ;;  %v1467_v42 = vrot.slane %v7463_v60, 4  ;;  %v1458_v7 = vsel %vm1428_vm3, %v1455_v14, %v1457_v41  ;;  %v1461_v60 = vsel %vm1428_vm3, %v1459_v21, %v1460_v38  ;;  %v1463_v35 = vsel %vm1428_vm3, %v1460_v38, %v1462_v18  ;;  %v7468_v55 = vld [vmem:[#allocation68_spill] sm:$0xff]  ;;  %v7471_v41 = vld [vmem:[#allocation58_spill] sm:$0xff]  ;;  %v7477_v30 = vld [vmem:[#allocation205_spill] sm:$0xff] }
 0x23d   :  { %7439 = vst [vmem:[#allocation93_spill] sm:$0xff] %v5142_v22  ;;  %v1472_v24 = vrot.slane %v7466_v39, 4  ;;  %v1475_v0 = vrot.slane %v7468_v55, 4  ;;  %v1477_v59 = vrot.slane %v7469_v50, 4  ;;  %v1480_v21 = vrot.slane %v7471_v41, 4  ;;  %v7472_v22 = vld [vmem:[#allocation123_spill] sm:$0xff] }
 0x23e   :  { %7441 = vst [vmem:[#allocation135_spill] sm:$0xff] %v5145_v49  ;;  %v7470_v49 = vld [vmem:[#allocation80_spill] sm:$0xff]  ;;  %v1482_v38 = vrot.slane %v7472_v22, 4  ;;  %v1490_v55 = vrot.slane %v7477_v30, 4  ;;  %v7478_v2 = vld [vmem:[#allocation206_spill] sm:$0xff]  ;;  %v7480_v10 = vld [vmem:[#allocation209_spill] sm:$0xff] }
 0x23f   :  { %7443 = vst [vmem:[#allocation136_spill] sm:$0xff] %v5148_v32  ;;  %v7467_v32 = vld [vmem:[#allocation166_spill] sm:$0xff]  ;;  %v1479_v14 = vrot.slane %v7470_v49, 4  ;;  %v7473_v18 = vld [vmem:[#allocation32_spill] sm:$0xff]  ;;  %v1495_v49 = vrot.slane %v7480_v10, 4  ;;  %v7482_v5 = vld [vmem:[#allocation211_spill] sm:$0xff] }
 0x240   :  { %7444 = vst [vmem:[#allocation57_spill] sm:$0xff] %v5151_v44  ;;  %v7465_v44 = vld [vmem:[#allocation90_spill] sm:$0xff]  ;;  %v1474_v58 = vrot.slane %v7467_v32, 4  ;;  %v1484_v39 = vrot.slane %v7473_v18, 4  ;;  %v7474_v57 = vld [vmem:[#allocation64_spill] sm:$0xff]  ;;  %v1499_v22 = vrot.slane %v7482_v5, 4  ;;  %v1483_v5 = vsel %vm1428_vm3, %v1480_v21, %v1482_v38 }
 0x241   :  { %7445 = vst [vmem:[#allocation17_spill] sm:$0xff] %v5154_v13  ;;  %v7464_v13 = vld [vmem:[#allocation62_spill] sm:$0xff]  ;;  %v1470_v6 = vrot.slane %v7465_v44, 4  ;;  %v1468_v44 = vsel %vm1428_vm3, %v1465_v23, %v1467_v42  ;;  %v7476_v42 = vld [vmem:[#allocation204_spill] sm:$0xff]  ;;  %v7484_v3 = vld [vmem:[#allocation213_spill] sm:$0xff] }
 0x242   :  { %v1469_v54 = vrot.slane %v7464_v13, 4  ;;  %v1466_v13 = vsel %vm1428_vm3, %v1464_v48, %v1465_v23  ;;  %v1485_v48 = vrot.slane %v7474_v57, 4  ;;  %v1487_v23 = vrot.slane %v7475_v12, 4  ;;  %v7479_v31 = vld [vmem:[#allocation208_spill] sm:$0xff]  ;;  %v7481_v63 = vld [vmem:[#allocation210_spill] sm:$0xff]  ;;  %v7486_v1 = vld [vmem:[#allocation215_spill] sm:$0xff] }
 0x243   :  { %v1489_v32 = vrot.slane %v7476_v42, 4  ;;  %v1494_v50 = vrot.slane %v7479_v31, 4  ;;  %v1497_v41 = vrot.slane %v7481_v63, 4  ;;  %v7483_v43 = vld [vmem:[#allocation212_spill] sm:$0xff]  ;;  %v1473_v57 = vsel %vm1428_vm3, %v1470_v6, %v1472_v24  ;;  %v7485_v33 = vld [vmem:[#allocation214_spill] sm:$0xff] }
 0x244   :  { %v1471_v29 = vsel %vm1428_vm3, %v1469_v54, %v1470_v6  ;;  %v1492_v54 = vrot.slane %v7478_v2, 4  ;;  %v1500_v18 = vrot.slane %v7483_v43, 4  ;;  %v1476_v12 = vsel %vm1428_vm3, %v1474_v58, %v1475_v0  ;;  %v7487_v46 = vld [vmem:[#allocation216_spill] sm:$0xff] }
 0x245   :  { %v1478_v42 = vsel %vm1428_vm3, %v1475_v0, %v1477_v59  ;;  %v1502_v30 = vrot.slane %v7484_v3, 4  ;;  %v1481_v2 = vsel %vm1428_vm3, %v1479_v14, %v1480_v21  ;;  %v1504_v31 = vrot.slane %v7485_v33, 4 }
 0x246   :  { %v1505_v10 = vrot.slane %v7486_v1, 4  ;;  %v1507_v63 = vrot.slane %v7487_v46, 4  ;;  %v1486_v43 = vsel %vm1428_vm3, %v1484_v39, %v1485_v48  ;;  %v1488_v6 = vsel %vm1428_vm3, %v1485_v48, %v1487_v23  ;;  %v7508_v23 = vld [vmem:[#allocation186_spill] sm:$0xff] }
 0x247   :  { %v1491_v24 = vsel %vm1428_vm3, %v1489_v32, %v1490_v55  ;;  %v1493_v58 = vsel %vm1428_vm3, %v1490_v55, %v1492_v54  ;;  %v1496_v3 = vsel %vm1428_vm3, %v1494_v50, %v1495_v49  ;;  %v1498_v0 = vsel %vm1428_vm3, %v1495_v49, %v1497_v41  ;;  %v7509_v55 = vld [vmem:[#allocation75_spill] sm:$0xff]  ;;  %v7511_v41 = vld [vmem:[#allocation189_spill] sm:$0xff] }
 0x248   :  { %v1501_v33 = vsel %vm1428_vm3, %v1499_v22, %v1500_v18  ;;  %v1503_v1 = vsel %vm1428_vm3, %v1500_v18, %v1502_v30  ;;  %v5238_v46 = vadd.f32 %v5157_v8, %v5052_v26  ;;  %v5242_v59 = vadd.f32 %v5162_v28, %v5056_v45  ;;  %v7510_v50 = vld [vmem:[#allocation187_spill] sm:$0xff]  ;;  %v7516_v30 = vld [vmem:[#allocation190_spill] sm:$0xff] }
 0x249   :  { %v5246_v14 = vadd.f32 %v5165_v53, %v5060_v40  ;;  %v1506_v21 = vsel %vm1428_vm3, %v1504_v31, %v1505_v10  ;;  %v1508_v38 = vsel %vm1428_vm3, %v1505_v10, %v1507_v63  ;;  %v5252_v39 = vadd.f32 %v5168_v47, %v5064_v62  ;;  %v7512_v18 = vld [vmem:[#allocation87_spill] sm:$0xff]  ;;  %v7517_v31 = vld [vmem:[#allocation134_spill] sm:$0xff]  ;;  %v7519_v63 = vld [vmem:[#allocation93_spill] sm:$0xff] }
 0x24a   :  { %v5255_v48 = vadd.f32 %v1441_v16, %v5067_v19  ;;  %v5258_v26 = vadd.f32 %v1443_v52, %v5070_v20  ;;  %v5261_v45 = vadd.f32 %v1446_v27, %v5073_v15  ;;  %v5264_v40 = vadd.f32 %v1448_v37, %v5076_v17  ;;  %v7488_v17 = vld [vmem:[#allocation201_spill] sm:$0xff] }
 0x24b   :  { %v5267_v8 = vadd.f32 %v1451_v56, %v5079_v51  ;;  %v5270_v28 = vadd.f32 %v1453_v34, %v5082_v4  ;;  %v5273_v62 = vadd.f32 %v1456_v36, %v5085_v11  ;;  %v5276_v19 = vadd.f32 %v1458_v7, %v5088_v61  ;;  %v7489_v51 = vld [vmem:[#allocation85_spill] sm:$0xff]  ;;  %v7491_v4 = vld [vmem:[#allocation34_spill] sm:$0xff]  ;;  %v7495_v61 = vld [vmem:[#allocation91_spill] sm:$0xff] }
 0x24c   :  { %v5279_v20 = vadd.f32 %v1461_v60, %v5091_v25  ;;  %v5282_v15 = vadd.f32 %v1463_v35, %v5094_v9  ;;  %v5285_v53 = vadd.f32 %v1466_v13, %v7488_v17  ;;  %v5288_v47 = vadd.f32 %v1468_v44, %v7489_v51  ;;  %v7493_v11 = vld [vmem:[#allocation202_spill] sm:$0xff]  ;;  %v7499_v9 = vld [vmem:[#allocation39_spill] sm:$0xff]  ;;  %v7501_v34 = vld [vmem:[#allocation77_spill] sm:$0xff] }
 0x24d   :  { %v5291_v16 = vadd.f32 %v1471_v29, %v7491_v4  ;;  %v5294_v52 = vadd.f32 %v1473_v57, %v7493_v11  ;;  %v5297_v27 = vadd.f32 %v1476_v12, %v7495_v61  ;;  %v7497_v25 = vld [vmem:[#allocation38_spill] sm:$0xff]  ;;  %v5303_v56 = vadd.f32 %v1481_v2, %v7499_v9  ;;  %v7503_v7 = vld [vmem:[#allocation40_spill] sm:$0xff]  ;;  %v7507_v44 = vld [vmem:[#allocation185_spill] sm:$0xff] }
 0x24e   :  { %7490 = vst [vmem:[#allocation137_spill] sm:$0xff] %v5288_v47  ;;  %v5300_v37 = vadd.f32 %v1478_v42, %v7497_v25  ;;  %v5306_v36 = vadd.f32 %v1483_v5, %v7501_v34  ;;  %v5309_v60 = vadd.f32 %v1486_v43, %v7503_v7  ;;  %v7505_v35 = vld [vmem:[#allocation46_spill] sm:$0xff]  ;;  %v1574_v29 = vrot.slane %v7507_v44, 5  ;;  %v7514_v12 = vld [vmem:[#allocation16_spill] sm:$0xff]  ;;  %v7521_v43 = vld [vmem:[#allocation135_spill] sm:$0xff] }
 0x24f   :  { %7492 = vst [vmem:[#allocation170_spill] sm:$0xff] %v5291_v16  ;;  %v5312_v13 = vadd.f32 %v1488_v6, %v7505_v35  ;;  %v1575_v32 = vrot.slane %v7508_v23, 5  ;;  %v1577_v54 = vrot.slane %v7509_v55, 5  ;;  %v1579_v49 = vrot.slane %v7510_v50, 5  ;;  %v7523_v17 = vld [vmem:[#allocation136_spill] sm:$0xff]  ;;  %v7530_v9 = vld [vmem:[#allocation193_spill] sm:$0xff] }
 0x250   :  { %7494 = vst [vmem:[#allocation138_spill] sm:$0xff] %v5294_v52  ;;  %v1580_v22 = vrot.slane %v7511_v41, 5  ;;  %v5320_v57 = vadd.f32 %v1491_v24, %v7512_v18  ;;  %v5323_v42 = vadd.f32 %v1493_v58, %v7514_v12  ;;  %v1582_v2 = vrot.slane %v7516_v30, 5  ;;  %v7525_v24 = vld [vmem:[#allocation57_spill] sm:$0xff]  ;;  %v7529_v61 = vld [vmem:[#allocation192_spill] sm:$0xff]  ;;  %v7533_v44 = vld [vmem:[#allocation95_spill] sm:$0xff] }
 0x251   :  { %7496 = vst [vmem:[#allocation20_spill] sm:$0xff] %v5297_v27  ;;  %v5327_v10 = vadd.f32 %v1496_v3, %v7517_v31  ;;  %v5330_v5 = vadd.f32 %v1498_v0, %v7519_v63  ;;  %v5333_v6 = vadd.f32 %v1501_v33, %v7521_v43  ;;  %v5336_v51 = vadd.f32 %v1503_v1, %v7523_v17  ;;  %v7527_v58 = vld [vmem:[#allocation17_spill] sm:$0xff]  ;;  %v7531_v1 = vld [vmem:[#allocation171_spill] sm:$0xff]  ;;  %v7534_v55 = vld [vmem:[#allocation96_spill] sm:$0xff] }
 0x252   :  { %7498 = vst [vmem:[#allocation203_spill] sm:$0xff] %v5300_v37  ;;  %v5339_v4 = vadd.f32 %v1506_v21, %v7525_v24  ;;  %v5342_v11 = vadd.f32 %v1508_v38, %v7527_v58  ;;  %v1584_v25 = vrot.slane %v7529_v61, 5  ;;  %v1585_v3 = vrot.slane %v7530_v9, 5  ;;  %v7532_v38 = vld [vmem:[#allocation94_spill] sm:$0xff]  ;;  %v7536_v18 = vld [vmem:[#allocation35_spill] sm:$0xff]  ;;  %v7538_v30 = vld [vmem:[#allocation100_spill] sm:$0xff] }
 0x253   :  { %7500 = vst [vmem:[#allocation139_spill] sm:$0xff] %v5303_v56  ;;  %v5347_v34 = vsel %vm1573_vm4, %v1574_v29, %v1575_v32  ;;  %v5350_v0 = vsel %vm1573_vm4, %v1575_v32, %v1577_v54  ;;  %v5353_v33 = vsel %vm1573_vm4, %v1579_v49, %v1580_v22  ;;  %v1587_v7 = vrot.slane %v7531_v1, 5  ;;  %v7535_v41 = vld [vmem:[#allocation98_spill] sm:$0xff]  ;;  %v7537_v32 = vld [vmem:[#allocation99_spill] sm:$0xff]  ;;  %v7539_v31 = vld [vmem:[#allocation101_spill] sm:$0xff] }
 0x254   :  { %7502 = vst [vmem:[#allocation21_spill] sm:$0xff] %v5306_v36  ;;  %v5357_v21 = vsel %vm1573_vm4, %v1580_v22, %v1582_v2  ;;  %v1589_v35 = vrot.slane %v7532_v38, 5  ;;  %v1590_v23 = vrot.slane %v7533_v44, 5  ;;  %v1592_v50 = vrot.slane %v7534_v55, 5  ;;  %v7540_v43 = vld [vmem:[#allocation37_spill] sm:$0xff]  ;;  %v7541_v22 = vld [vmem:[#allocation150_spill] sm:$0xff] }
 0x255   :  { %7504 = vst [vmem:[#allocation207_spill] sm:$0xff] %v5309_v60  ;;  %v1594_v29 = vrot.slane %v7535_v41, 5  ;;  %v1595_v12 = vrot.slane %v7536_v18, 5  ;;  %v1597_v54 = vrot.slane %v7537_v32, 5  ;;  %v1599_v49 = vrot.slane %v7538_v30, 5  ;;  %v7542_v24 = vld [vmem:[#allocation103_spill] sm:$0xff] }
 0x256   :  { %7506 = vst [vmem:[#allocation140_spill] sm:$0xff] %v5312_v13  ;;  %v1600_v63 = vrot.slane %v7539_v31, 5  ;;  %v1602_v17 = vrot.slane %v7540_v43, 5  ;;  %v1604_v2 = vrot.slane %v7541_v22, 5  ;;  %v1605_v58 = vrot.slane %v7542_v24, 5  ;;  %v7543_v61 = vld [vmem:[#allocation104_spill] sm:$0xff] }
 0x257   :  { %7513 = vst [vmem:[#allocation24_spill] sm:$0xff] %v5320_v57  ;;  %v1607_v9 = vrot.slane %v7543_v61, 5  ;;  %v7544_v1 = vld [vmem:[#allocation106_spill] sm:$0xff]  ;;  %v7545_v44 = vld [vmem:[#allocation107_spill] sm:$0xff]  ;;  %v7546_v41 = vld [vmem:[#allocation108_spill] sm:$0xff]  ;;  %v1586_v32 = vsel %vm1573_vm4, %v1584_v25, %v1585_v3  ;;  %v1588_v22 = vsel %vm1573_vm4, %v1585_v3, %v1587_v7  ;;  %v1591_v24 = vsel %vm1573_vm4, %v1589_v35, %v1590_v23 }
 0x258   :  { %7515 = vst [vmem:[#allocation153_spill] sm:$0xff] %v5323_v42  ;;  %v1609_v38 = vrot.slane %v7544_v1, 5  ;;  %v1610_v55 = vrot.slane %v7545_v44, 5  ;;  %v1612_v18 = vrot.slane %v7546_v41, 5  ;;  %v1593_v61 = vsel %vm1573_vm4, %v1590_v23, %v1592_v50  ;;  %v7550_v7 = vld [vmem:[#allocation115_spill] sm:$0xff]  ;;  %v7559_v42 = vld [vmem:[#allocation130_spill] sm:$0xff] }
 0x259   :  { %7518 = vst [vmem:[#allocation156_spill] sm:$0xff] %v5327_v10  ;;  %v1596_v1 = vsel %vm1573_vm4, %v1594_v29, %v1595_v12  ;;  %v1598_v44 = vsel %vm1573_vm4, %v1595_v12, %v1597_v54  ;;  %v1601_v41 = vsel %vm1573_vm4, %v1599_v49, %v1600_v63  ;;  %v1603_v25 = vsel %vm1573_vm4, %v1600_v63, %v1602_v17  ;;  %v7551_v29 = vld [vmem:[#allocation117_spill] sm:$0xff]  ;;  %v7552_v54 = vld [vmem:[#allocation118_spill] sm:$0xff]  ;;  %v7560_v57 = vld [vmem:[#allocation131_spill] sm:$0xff] }
 0x25a   :  { %7520 = vst [vmem:[#allocation161_spill] sm:$0xff] %v5330_v5  ;;  %v1613_v3 = vsel %vm1573_vm4, %v1610_v55, %v1612_v18  ;;  %v1619_v35 = vrot.slane %v7550_v7, 5  ;;  %v1620_v12 = vrot.slane %v7551_v29, 5  ;;  %v1622_v49 = vrot.slane %v7552_v54, 5  ;;  %v7554_v17 = vld [vmem:[#allocation121_spill] sm:$0xff]  ;;  %v7555_v5 = vld [vmem:[#allocation122_spill] sm:$0xff] }
 0x25b   :  { %7522 = vst [vmem:[#allocation167_spill] sm:$0xff] %v5333_v6  ;;  %v7553_v6 = vld [vmem:[#allocation120_spill] sm:$0xff]  ;;  %v7557_v10 = vld [vmem:[#allocation126_spill] sm:$0xff]  ;;  %v7562_v13 = vld [vmem:[#allocation133_spill] sm:$0xff] }
 0x25c   :  { %7524 = vst [vmem:[#allocation111_spill] sm:$0xff] %v5336_v51  ;;  %v7549_v51 = vld [vmem:[#allocation114_spill] sm:$0xff]  ;;  %v1624_v63 = vrot.slane %v7553_v6, 5  ;;  %v7558_v18 = vld [vmem:[#allocation128_spill] sm:$0xff]  ;;  %v1639_v54 = vrot.slane %v7562_v13, 5  ;;  %v7563_v60 = vld [vmem:[#allocation33_spill] sm:$0xff] }
 0x25d   :  { %7526 = vst [vmem:[#allocation112_spill] sm:$0xff] %v5339_v4  ;;  %v7548_v4 = vld [vmem:[#allocation113_spill] sm:$0xff]  ;;  %v1617_v43 = vrot.slane %v7549_v51, 5  ;;  %v1611_v51 = vsel %vm1573_vm4, %v1609_v38, %v1610_v55  ;;  %v1630_v55 = vrot.slane %v7557_v10, 5  ;;  %v1632_v7 = vrot.slane %v7558_v18, 5  ;;  %v7565_v56 = vld [vmem:[#allocation42_spill] sm:$0xff] }
 0x25e   :  { %7528 = vst [vmem:[#allocation116_spill] sm:$0xff] %v5342_v11  ;;  %v7547_v11 = vld [vmem:[#allocation110_spill] sm:$0xff]  ;;  %v1615_v31 = vrot.slane %v7548_v4, 5  ;;  %v1608_v4 = vsel %vm1573_vm4, %v1605_v58, %v1607_v9  ;;  %v7556_v9 = vld [vmem:[#allocation125_spill] sm:$0xff]  ;;  %v1640_v6 = vrot.slane %v7563_v60, 5  ;;  %v7566_v37 = vld [vmem:[#allocation43_spill] sm:$0xff] }
 0x25f   :  { %v1614_v30 = vrot.slane %v7547_v11, 5  ;;  %v1606_v11 = vsel %vm1573_vm4, %v1604_v2, %v1605_v58  ;;  %v1625_v2 = vrot.slane %v7554_v17, 5  ;;  %v1627_v58 = vrot.slane %v7555_v5, 5  ;;  %v7564_v36 = vld [vmem:[#allocation41_spill] sm:$0xff]  ;;  %v7567_v27 = vld [vmem:[#allocation154_spill] sm:$0xff]  ;;  %v7570_v47 = vld [vmem:[#allocation51_spill] sm:$0xff] }
 0x260   :  { %v1618_v50 = vsel %vm1573_vm4, %v1615_v31, %v1617_v43  ;;  %v1629_v38 = vrot.slane %v7556_v9, 5  ;;  %v7561_v43 = vld [vmem:[#allocation132_spill] sm:$0xff]  ;;  %v1642_v17 = vrot.slane %v7564_v36, 5  ;;  %v1621_v5 = vsel %vm1573_vm4, %v1619_v35, %v1620_v12  ;;  %v7568_v52 = vld [vmem:[#allocation49_spill] sm:$0xff]  ;;  %v7569_v16 = vld [vmem:[#allocation50_spill] sm:$0xff] }
 0x261   :  { %v1616_v23 = vsel %vm1573_vm4, %v1614_v30, %v1615_v31  ;;  %v1634_v30 = vrot.slane %v7559_v42, 5  ;;  %v1635_v31 = vrot.slane %v7560_v57, 5  ;;  %v1637_v29 = vrot.slane %v7561_v43, 5 }
 0x262   :  { %v1644_v9 = vrot.slane %v7565_v56, 5  ;;  %v1645_v10 = vrot.slane %v7566_v37, 5  ;;  %v1647_v18 = vrot.slane %v7567_v27, 5  ;;  %v1623_v42 = vsel %vm1573_vm4, %v1620_v12, %v1622_v49 }
 0x263   :  { %v1649_v57 = vrot.slane %v7568_v52, 5  ;;  %v1650_v43 = vrot.slane %v7569_v16, 5  ;;  %v1652_v13 = vrot.slane %v7570_v47, 5  ;;  %v1626_v60 = vsel %vm1573_vm4, %v1624_v63, %v1625_v2 }
 0x264   :  { %v1628_v36 = vsel %vm1573_vm4, %v1625_v2, %v1627_v58  ;;  %v1631_v35 = vsel %vm1573_vm4, %v1629_v38, %v1630_v55  ;;  %v1633_v56 = vsel %vm1573_vm4, %v1630_v55, %v1632_v7  ;;  %v1636_v37 = vsel %vm1573_vm4, %v1634_v30, %v1635_v31 }
 0x265   :  { %v1638_v27 = vsel %vm1573_vm4, %v1635_v31, %v1637_v29  ;;  %v1641_v12 = vsel %vm1573_vm4, %v1639_v54, %v1640_v6  ;;  %v1643_v52 = vsel %vm1573_vm4, %v1640_v6, %v1642_v17  ;;  %v1646_v16 = vsel %vm1573_vm4, %v1644_v9, %v1645_v10  ;;  %v7593_v31 = vld [vmem:[#allocation127_spill] sm:$0xff]  ;;  %v7594_v54 = vld [vmem:[#allocation161_spill] sm:$0xff] }
 0x266   :  { %v1648_v47 = vsel %vm1573_vm4, %v1645_v10, %v1647_v18  ;;  %v5426_v49 = vadd.f32 %v5347_v34, %v5238_v46  ;;  %v5430_v63 = vadd.f32 %v5350_v0, %v5242_v59  ;;  %v1651_v2 = vsel %vm1573_vm4, %v1649_v57, %v1650_v43  ;;  %v7596_v17 = vld [vmem:[#allocation195_spill] sm:$0xff]  ;;  %v7597_v9 = vld [vmem:[#allocation173_spill] sm:$0xff]  ;;  %v7598_v18 = vld [vmem:[#allocation180_spill] sm:$0xff] }
 0x267   :  { %v1653_v58 = vsel %vm1573_vm4, %v1650_v43, %v1652_v13  ;;  %v5436_v38 = vadd.f32 %v5353_v33, %v5246_v14  ;;  %v5440_v55 = vadd.f32 %v5357_v21, %v5252_v39  ;;  %v5443_v7 = vadd.f32 %v1586_v32, %v5255_v48  ;;  %v7599_v57 = vld [vmem:[#allocation167_spill] sm:$0xff]  ;;  %v7601_v13 = vld [vmem:[#allocation184_spill] sm:$0xff] }
 0x268   :  { %v5446_v46 = vadd.f32 %v1588_v22, %v5258_v26  ;;  %v5449_v59 = vadd.f32 %v1591_v24, %v5261_v45  ;;  %v5452_v34 = vadd.f32 %v1593_v61, %v5264_v40  ;;  %v5455_v0 = vadd.f32 %v1596_v1, %v5267_v8  ;;  %v7572_v8 = vld [vmem:[#allocation137_spill] sm:$0xff] }
 0x269   :  { %7571 = vst [vmem:[#allocation47_spill] sm:$0xff] %v5440_v55  ;;  %v5458_v14 = vadd.f32 %v1598_v44, %v5270_v28  ;;  %v5461_v39 = vadd.f32 %v1601_v41, %v5273_v62  ;;  %v5464_v48 = vadd.f32 %v1603_v25, %v5276_v19  ;;  %v5467_v26 = vadd.f32 %v1606_v11, %v5279_v20  ;;  %v7573_v28 = vld [vmem:[#allocation170_spill] sm:$0xff]  ;;  %v7575_v19 = vld [vmem:[#allocation20_spill] sm:$0xff]  ;;  %v7577_v20 = vld [vmem:[#allocation203_spill] sm:$0xff] }
 0x26a   :  { %v5470_v45 = vadd.f32 %v1608_v4, %v5282_v15  ;;  %v5473_v40 = vadd.f32 %v1611_v51, %v5285_v53  ;;  %v5476_v33 = vadd.f32 %v1613_v3, %v7572_v8  ;;  %v5479_v21 = vadd.f32 %v1616_v23, %v7573_v28  ;;  %v7574_v62 = vld [vmem:[#allocation138_spill] sm:$0xff]  ;;  %v7579_v15 = vld [vmem:[#allocation139_spill] sm:$0xff]  ;;  %v7581_v53 = vld [vmem:[#allocation21_spill] sm:$0xff] }
 0x26b   :  { %v5482_v32 = vadd.f32 %v1618_v50, %v7574_v62  ;;  %v5485_v22 = vadd.f32 %v1621_v5, %v7575_v19  ;;  %v5488_v24 = vadd.f32 %v1623_v42, %v7577_v20  ;;  %v5491_v61 = vadd.f32 %v1626_v60, %v7579_v15  ;;  %v7583_v44 = vld [vmem:[#allocation207_spill] sm:$0xff]  ;;  %v7585_v25 = vld [vmem:[#allocation140_spill] sm:$0xff]  ;;  %v7589_v3 = vld [vmem:[#allocation153_spill] sm:$0xff] }
 0x26c   :  { %v5494_v1 = vadd.f32 %v1628_v36, %v7581_v53  ;;  %v5497_v41 = vadd.f32 %v1631_v35, %v7583_v44  ;;  %v5500_v11 = vadd.f32 %v1633_v56, %v7585_v25  ;;  %v7587_v4 = vld [vmem:[#allocation24_spill] sm:$0xff]  ;;  %v5506_v23 = vadd.f32 %v1638_v27, %v7589_v3  ;;  %v7603_v56 = vld [vmem:[#allocation191_spill] sm:$0xff]  ;;  %v7607_v28 = vld [vmem:[#allocation97_spill] sm:$0xff] }
 0x26d   :  { %7576 = vst [vmem:[#allocation177_spill] sm:$0xff] %v5485_v22  ;;  %v5503_v51 = vadd.f32 %v1636_v37, %v7587_v4  ;;  %v7591_v50 = vld [vmem:[#allocation156_spill] sm:$0xff]  ;;  %v1718_v29 = vmul.f32 0.034374557, %v7593_v31  ;;  %v5513_v6 = vadd.f32 %v1643_v52, %v7594_v54  ;;  %v1719_v5 = vmul.f32 0.034374557, %v7596_v17 }
 0x26e   :  { %7578 = vst [vmem:[#allocation25_spill] sm:$0xff] %v5488_v24  ;;  %v5509_v30 = vadd.f32 %v1641_v12, %v7591_v50  ;;  %v1720_v10 = vmul.f32 0.034374557, %v7597_v9  ;;  %v1721_v42 = vmul.f32 0.034374557, %v7598_v18  ;;  %v5519_v43 = vadd.f32 %v1646_v16, %v7599_v57  ;;  %v7602_v36 = vld [vmem:[#allocation76_spill] sm:$0xff] }
 0x26f   :  { %7580 = vst [vmem:[#allocation26_spill] sm:$0xff] %v5491_v61  ;;  %v1722_v60 = vmul.f32 0.034374557, %v7601_v13  ;;  %v1723_v35 = vmul.f32 0.034374557, %v7602_v36  ;;  %v7604_v27 = vld [vmem:[#allocation111_spill] sm:$0xff] }
 0x270   :  { %7582 = vst [vmem:[#allocation48_spill] sm:$0xff] %v5494_v1  ;;  %v1724_v37 = vmul.f32 0.034374557, %v7603_v56  ;;  %v5525_v12 = vadd.f32 %v1648_v47, %v7604_v27  ;;  %v7606_v52 = vld [vmem:[#allocation176_spill] sm:$0xff]  ;;  %v5529_v62 = vmul.f32 0.034374557, %v7607_v28 }
 0x271   :  { %7584 = vst [vmem:[#allocation45_spill] sm:$0xff] %v5497_v41  ;;  %v1725_v8 = vmul.f32 0.034374557, %v7606_v52  ;;  %v7608_v19 = vld [vmem:[#allocation36_spill] sm:$0xff]  ;;  %v7609_v15 = vld [vmem:[#allocation102_spill] sm:$0xff]  ;;  %v7611_v25 = vld [vmem:[#allocation141_spill] sm:$0xff] }
 0x272   :  { %7586 = vst [vmem:[#allocation28_spill] sm:$0xff] %v5500_v11  ;;  %v5532_v20 = vmul.f32 0.034374557, %v7608_v19  ;;  %v5535_v16 = vmul.f32 0.034374557, %v7609_v15  ;;  %v7610_v53 = vld [vmem:[#allocation18_spill] sm:$0xff] }
 0x273   :  { %7588 = vst [vmem:[#allocation30_spill] sm:$0xff] %v5503_v51  ;;  %v1783_v44 = vrot.slane %v7610_v53, 6  ;;  %v1784_v4 = vrot.slane %v7611_v25, 6  ;;  %v1786_v3 = vrot.slane %v1718_v29, 6  ;;  %v7612_v50 = vld [vmem:[#allocation112_spill] sm:$0xff]  ;;  %v7614_v47 = vld [vmem:[#allocation105_spill] sm:$0xff] }
 0x274   :  { %7590 = vst [vmem:[#allocation31_spill] sm:$0xff] %v5506_v23  ;;  %v5540_v31 = vadd.f32 %v1651_v2, %v7612_v50  ;;  %v5543_v54 = vmul.f32 0.034374557, %v7614_v47  ;;  %v7615_v17 = vld [vmem:[#allocation109_spill] sm:$0xff]  ;;  %v7616_v18 = vld [vmem:[#allocation116_spill] sm:$0xff]  ;;  %v7618_v13 = vld [vmem:[#allocation119_spill] sm:$0xff] }
 0x275   :  { %7592 = vst [vmem:[#allocation175_spill] sm:$0xff] %v5509_v30  ;;  %v5546_v9 = vmul.f32 0.034374557, %v7615_v17  ;;  %v5549_v57 = vadd.f32 %v1653_v58, %v7616_v18  ;;  %v5552_v36 = vmul.f32 0.034374557, %v7618_v13  ;;  %v7619_v56 = vld [vmem:[#allocation124_spill] sm:$0xff]  ;;  %v5564_v47 = vsel %vm1782_vm5, %v1783_v44, %v1784_v4 }
 0x276   :  { %7595 = vst [vmem:[#allocation69_spill] sm:$0xff] %v5513_v6  ;;  %v5555_v27 = vmul.f32 0.034374557, %v7619_v56  ;;  %v7620_v29 = vld [vmem:[#allocation129_spill] sm:$0xff]  ;;  %v7621_v2 = vld [vmem:[#allocation143_spill] sm:$0xff]  ;;  %v1791_v53 = vrot.slane %v1719_v5, 6  ;;  %v5567_v58 = vsel %vm1782_vm5, %v1784_v4, %v1786_v3 }
 0x277   :  { %7600 = vst [vmem:[#allocation158_spill] sm:$0xff] %v5519_v43  ;;  %v5558_v52 = vmul.f32 0.034374557, %v7620_v29  ;;  %v1788_v28 = vrot.slane %v7621_v2, 6  ;;  %v7622_v19 = vld [vmem:[#allocation19_spill] sm:$0xff]  ;;  %v7623_v25 = vld [vmem:[#allocation144_spill] sm:$0xff] }
 0x278   :  { %7605 = vst [vmem:[#allocation188_spill] sm:$0xff] %v5525_v12  ;;  %v1789_v15 = vrot.slane %v7622_v19, 6  ;;  %v1793_v50 = vrot.slane %v7623_v25, 6  ;;  %v7624_v17 = vld [vmem:[#allocation145_spill] sm:$0xff]  ;;  %v1796_v13 = vrot.slane %v1720_v10, 6  ;;  %v7625_v56 = vld [vmem:[#allocation22_spill] sm:$0xff] }
 0x279   :  { %7613 = vst [vmem:[#allocation194_spill] sm:$0xff] %v5540_v31  ;;  %v1794_v18 = vrot.slane %v7624_v17, 6  ;;  %v7626_v29 = vld [vmem:[#allocation147_spill] sm:$0xff]  ;;  %v1801_v12 = vrot.slane %v1721_v42, 6  ;;  %v7627_v2 = vld [vmem:[#allocation148_spill] sm:$0xff]  ;;  %v1806_v6 = vrot.slane %v1722_v60, 6 }
 0x27a   :  { %7617 = vst [vmem:[#allocation55_spill] sm:$0xff] %v5549_v57  ;;  %v1798_v57 = vrot.slane %v7625_v56, 6  ;;  %v1799_v31 = vrot.slane %v7626_v29, 6  ;;  %v1803_v43 = vrot.slane %v7627_v2, 6  ;;  %v7628_v19 = vld [vmem:[#allocation23_spill] sm:$0xff]  ;;  %v7629_v25 = vld [vmem:[#allocation149_spill] sm:$0xff]  ;;  %v5579_v56 = vsel %vm1782_vm5, %v1788_v28, %v1789_v15 }
 0x27b   :  { %v1804_v5 = vrot.slane %v7628_v19, 6  ;;  %v1808_v30 = vrot.slane %v7629_v25, 6  ;;  %v7630_v44 = vld [vmem:[#allocation151_spill] sm:$0xff]  ;;  %v1811_v51 = vrot.slane %v1723_v35, 6  ;;  %v7632_v11 = vld [vmem:[#allocation152_spill] sm:$0xff]  ;;  %v1816_v10 = vrot.slane %v1724_v37, 6 }
 0x27c   :  { %v1809_v23 = vrot.slane %v7630_v44, 6  ;;  %v7631_v4 = vld [vmem:[#allocation27_spill] sm:$0xff]  ;;  %v1814_v17 = vrot.slane %v7632_v11, 6  ;;  %v5582_v42 = vsel %vm1782_vm5, %v1789_v15, %v1791_v53  ;;  %v7634_v29 = vld [vmem:[#allocation142_spill] sm:$0xff]  ;;  %v1795_v25 = vsel %vm1782_vm5, %v1793_v50, %v1794_v18  ;;  %v7636_v50 = vld [vmem:[#allocation29_spill] sm:$0xff] }
 0x27d   :  { %v1813_v3 = vrot.slane %v7631_v4, 6  ;;  %7633 = vst [vmem:[#allocation53_spill] sm:$0xff] %v5582_v42  ;;  %v1818_v2 = vrot.slane %v7634_v29, 6  ;;  %v7635_v19 = vld [vmem:[#allocation155_spill] sm:$0xff]  ;;  %v1797_v44 = vsel %vm1782_vm5, %v1794_v18, %v1796_v13  ;;  %v1800_v35 = vsel %vm1782_vm5, %v1798_v57, %v1799_v31  ;;  %v7637_v57 = vld [vmem:[#allocation157_spill] sm:$0xff]  ;;  %v7639_v13 = vld [vmem:[#allocation160_spill] sm:$0xff] }
 0x27e   :  { %v1819_v60 = vrot.slane %v7635_v19, 6  ;;  %v1821_v4 = vrot.slane %v1725_v8, 6  ;;  %v1802_v11 = vsel %vm1782_vm5, %v1799_v31, %v1801_v12  ;;  %v1805_v37 = vsel %vm1782_vm5, %v1803_v43, %v1804_v5  ;;  %v7638_v31 = vld [vmem:[#allocation159_spill] sm:$0xff]  ;;  %v7643_v1 = vld [vmem:[#allocation168_spill] sm:$0xff]  ;;  %v7644_v61 = vld [vmem:[#allocation169_spill] sm:$0xff] }
 0x27f   :  { %v1807_v28 = vsel %vm1782_vm5, %v1804_v5, %v1806_v6  ;;  %v1810_v15 = vsel %vm1782_vm5, %v1808_v30, %v1809_v23  ;;  %v1812_v53 = vsel %vm1782_vm5, %v1809_v23, %v1811_v51  ;;  %v1815_v29 = vsel %vm1782_vm5, %v1813_v3, %v1814_v17  ;;  %v7640_v23 = vld [vmem:[#allocation163_spill] sm:$0xff]  ;;  %v7641_v3 = vld [vmem:[#allocation164_spill] sm:$0xff]  ;;  %v7647_v22 = vld [vmem:[#allocation178_spill] sm:$0xff] }
 0x280   :  { %v1817_v19 = vsel %vm1782_vm5, %v1814_v17, %v1816_v10  ;;  %v1823_v41 = vrot.slane %v7636_v50, 6  ;;  %v1820_v18 = vsel %vm1782_vm5, %v1818_v2, %v1819_v60  ;;  %v1824_v8 = vrot.slane %v7637_v57, 6  ;;  %v7642_v50 = vld [vmem:[#allocation165_spill] sm:$0xff]  ;;  %v7645_v24 = vld [vmem:[#allocation172_spill] sm:$0xff]  ;;  %v7648_v42 = vld [vmem:[#allocation179_spill] sm:$0xff] }
 0x281   :  { %v1826_v12 = vrot.slane %v5529_v62, 6  ;;  %v1828_v43 = vrot.slane %v7638_v31, 6  ;;  %v1822_v6 = vsel %vm1782_vm5, %v1819_v60, %v1821_v4  ;;  %v1829_v30 = vrot.slane %v7639_v13, 6  ;;  %v7646_v13 = vld [vmem:[#allocation174_spill] sm:$0xff]  ;;  %v7649_v55 = vld [vmem:[#allocation181_spill] sm:$0xff] }
 0x282   :  { %v1831_v51 = vrot.slane %v5532_v20, 6  ;;  %v1833_v5 = vrot.slane %v7640_v23, 6  ;;  %v1834_v17 = vrot.slane %v7641_v3, 6  ;;  %v1836_v10 = vrot.slane %v5535_v16, 6 }
 0x283   :  { %v1838_v2 = vrot.slane %v7642_v50, 6  ;;  %v1839_v57 = vrot.slane %v7643_v1, 6  ;;  %v1841_v62 = vrot.slane %v5543_v54, 6  ;;  %v1843_v31 = vrot.slane %v7644_v61, 6 }
 0x284   :  { %v1844_v60 = vrot.slane %v7645_v24, 6  ;;  %v1846_v4 = vrot.slane %v5546_v9, 6  ;;  %v1825_v20 = vsel %vm1782_vm5, %v1823_v41, %v1824_v8  ;;  %v1848_v23 = vrot.slane %v7646_v13, 6 }
 0x285   :  { %v1849_v3 = vrot.slane %v7647_v22, 6  ;;  %v1851_v16 = vrot.slane %v5552_v36, 6  ;;  %v1827_v50 = vsel %vm1782_vm5, %v1824_v8, %v1826_v12  ;;  %v1830_v1 = vsel %vm1782_vm5, %v1828_v43, %v1829_v30  ;;  %v7650_v43 = vld [vmem:[#allocation182_spill] sm:$0xff] }
 0x286   :  { %v1853_v54 = vrot.slane %v7648_v42, 6  ;;  %v1854_v61 = vrot.slane %v7649_v55, 6  ;;  %v1832_v24 = vsel %vm1782_vm5, %v1829_v30, %v1831_v51  ;;  %v1835_v9 = vsel %vm1782_vm5, %v1833_v5, %v1834_v17  ;;  %v7651_v51 = vld [vmem:[#allocation183_spill] sm:$0xff] }
 0x287   :  { %v1837_v41 = vsel %vm1782_vm5, %v1834_v17, %v1836_v10  ;;  %v1856_v13 = vrot.slane %v5555_v27, 6  ;;  %v1840_v22 = vsel %vm1782_vm5, %v1838_v2, %v1839_v57  ;;  %v1842_v36 = vsel %vm1782_vm5, %v1839_v57, %v1841_v62 }
 0x288   :  { %v1845_v8 = vsel %vm1782_vm5, %v1843_v31, %v1844_v60  ;;  %v1847_v12 = vsel %vm1782_vm5, %v1844_v60, %v1846_v4  ;;  %v5630_v42 = vsel %vm1782_vm5, %v1848_v23, %v1849_v3  ;;  %v5633_v55 = vsel %vm1782_vm5, %v1849_v3, %v1851_v16  ;;  %v7657_v23 = vld [vmem:[#allocation48_spill] sm:$0xff] }
 0x289   :  { %v1858_v30 = vrot.slane %v7650_v43, 6  ;;  %v1859_v5 = vrot.slane %v7651_v51, 6  ;;  %v5638_v27 = vsel %vm1782_vm5, %v1853_v54, %v1854_v61  ;;  %v5641_v17 = vadd.f32 %v1805_v37, %v5455_v0  ;;  %v7659_v43 = vld [vmem:[#allocation28_spill] sm:$0xff] }
 0x28a   :  { %v5644_v10 = vadd.f32 %v1807_v28, %v5458_v14  ;;  %v5647_v2 = vadd.f32 %v1810_v15, %v5461_v39  ;;  %v5650_v57 = vsel %vm1782_vm5, %v1854_v61, %v1856_v13  ;;  %v5653_v62 = vadd.f32 %v1812_v53, %v5464_v48  ;;  %v7654_v28 = vld [vmem:[#allocation177_spill] sm:$0xff] }
 0x28b   :  { %v5656_v31 = vadd.f32 %v1815_v29, %v5467_v26  ;;  %v5659_v60 = vadd.f32 %v1817_v19, %v5470_v45  ;;  %v1861_v0 = vrot.slane %v5558_v52, 6  ;;  %v5664_v14 = vadd.f32 %v5564_v47, %v5426_v49 }
 0x28c   :  { %v1959_v39 = vmax.f32 %v5647_v2, %v5641_v17  ;;  %v5669_v37 = vadd.f32 %v1820_v18, %v5473_v40  ;;  %v5672_v48 = vadd.f32 %v1795_v25, %v5443_v7  ;;  %v5675_v26 = vadd.f32 %v1797_v44, %v5446_v46 }
 0x28d   :  { %v1974_v45 = vmax.f32 %v5653_v62, %v5644_v10  ;;  %v5680_v52 = vadd.f32 %v1822_v6, %v5476_v33  ;;  %v5683_v49 = vadd.f32 %v1800_v35, %v5449_v59  ;;  %v5686_v47 = vadd.f32 %v1802_v11, %v5452_v34  ;;  %v7652_v34 = vld [vmem:[#allocation47_spill] sm:$0xff]  ;;  %v7653_v35 = vld [vmem:[#allocation53_spill] sm:$0xff] }
 0x28e   :  { %v1960_v40 = vmax.f32 %v5656_v31, %v1959_v39  ;;  %v5690_v7 = vadd.f32 %v1825_v20, %v5479_v21  ;;  %v1860_v46 = vsel %vm1782_vm5, %v1858_v30, %v1859_v5  ;;  %v5695_v25 = vadd.f32 %v5567_v58, %v5430_v63  ;;  %v7655_v58 = vld [vmem:[#allocation25_spill] sm:$0xff] }
 0x28f   :  { %v1975_v33 = vmax.f32 %v5659_v60, %v1974_v45  ;;  %v5699_v44 = vadd.f32 %v1827_v50, %v5482_v32  ;;  %v5703_v59 = vadd.f32 %v5579_v56, %v5436_v38  ;;  %v5707_v11 = vadd.f32 %v7653_v35, %v7652_v34  ;;  %v7656_v32 = vld [vmem:[#allocation26_spill] sm:$0xff] }
 0x290   :  { %v1961_v21 = vmax.f32 %v5669_v37, %v1960_v40  ;;  %v5711_v15 = vadd.f32 %v1830_v1, %v7654_v28  ;;  %v5715_v53 = vadd.f32 %v1832_v24, %v7655_v58  ;;  %v5718_v29 = vadd.f32 %v1835_v9, %v7656_v32  ;;  %v7658_v9 = vld [vmem:[#allocation45_spill] sm:$0xff]  ;;  %v7661_v40 = vld [vmem:[#allocation30_spill] sm:$0xff]  ;;  %v7665_v32 = vld [vmem:[#allocation175_spill] sm:$0xff] }
 0x291   :  { %v1976_v63 = vmax.f32 %v5680_v52, %v1975_v33  ;;  %v1927_v38 = vmin.f32 %v5664_v14, %v5672_v48  ;;  %v1928_v19 = vmin.f32 %v5703_v59, %v5683_v49  ;;  %v1942_v18 = vmin.f32 %v5695_v25, %v5675_v26 }
 0x292   :  { %v1962_v56 = vmax.f32 %v5690_v7, %v1961_v21  ;;  %v1943_v6 = vmin.f32 %v5707_v11, %v5686_v47  ;;  %v1862_v4 = vsel %vm1782_vm5, %v1859_v5, %v1861_v0  ;;  %v5732_v3 = vadd.f32 %v1837_v41, %v7657_v23 }
 0x293   :  { %v1977_v20 = vmax.f32 %v5699_v44, %v1976_v63  ;;  %v1929_v16 = vmin.f32 %v1927_v38, %v5641_v17  ;;  %v1930_v1 = vmin.f32 %v1928_v19, %v5647_v2  ;;  %v1944_v54 = vmin.f32 %v1942_v18, %v5644_v10 }
 0x294   :  { %v1963_v50 = vmax.f32 %v5711_v15, %v1962_v56  ;;  %v1945_v61 = vmin.f32 %v1943_v6, %v5653_v62  ;;  %v5741_v13 = vadd.f32 %v1840_v22, %v7658_v9  ;;  %v5744_v30 = vadd.f32 %v1842_v36, %v7659_v43  ;;  %v7663_v22 = vld [vmem:[#allocation31_spill] sm:$0xff]  ;;  %v5793_v43 = vld [vmem:[#allocation10 + $0x8] sm:$0xff] }
 0x295   :  { %v1978_v24 = vmax.f32 %v5715_v53, %v1977_v20  ;;  %v1931_v41 = vmin.f32 %v1929_v16, %v5656_v31  ;;  %v1932_v5 = vmin.f32 %v1930_v1, %v5669_v37  ;;  %v1946_v0 = vmin.f32 %v1944_v54, %v5659_v60  ;;  %v7669_v16 = vld [vmem:[#allocation158_spill] sm:$0xff]  ;;  %v7671_v1 = vld [vmem:[#allocation188_spill] sm:$0xff] }
 0x296   :  { %7660 = vst [vmem:[#allocation162_spill] sm:$0xff] %v5744_v30  ;;  %v1964_v51 = vmax.f32 %v5718_v29, %v1963_v50  ;;  %v1947_v39 = vmin.f32 %v1945_v61, %v5680_v52  ;;  %v5753_v33 = vadd.f32 %v1845_v8, %v7661_v40  ;;  %v5756_v34 = vadd.f32 %v1847_v12, %v7663_v22  ;;  %v7667_v8 = vld [vmem:[#allocation69_spill] sm:$0xff]  ;;  %v5782_v50 = vld [vmem:[#allocation10] sm:$0xff]  ;;  %v7673_v61 = vld [vmem:[#allocation194_spill] sm:$0xff] }
 0x297   :  { %v1979_v45 = vmax.f32 %v5732_v3, %v1978_v24  ;;  %v1933_v36 = vmin.f32 %v1931_v41, %v5690_v7  ;;  %v1934_v21 = vmin.f32 %v1932_v5, %v5711_v15  ;;  %v1948_v28 = vmin.f32 %v1946_v0, %v5699_v44  ;;  %v7675_v41 = vld [vmem:[#allocation55_spill] sm:$0xff]  ;;  %v5806_v22 = vld [vmem:[#allocation10 + $0x10] sm:$0xff] }
 0x298   :  { %7662 = vst [vmem:[#allocation146_spill] sm:$0xff] %v5753_v33  ;;  %v1965_v35 = vmax.f32 %v5741_v13, %v1964_v51  ;;  %v1949_v63 = vmin.f32 %v1947_v39, %v5715_v53  ;;  %v5766_v38 = vadd.f32 %v5630_v42, %v7665_v32  ;;  %v5770_v12 = vadd.f32 %v5633_v55, %v7667_v8  ;;  %v5818_v32 = vld [vmem:[#allocation10 + $0x20] sm:$0xff] }
 0x299   :  { %7664 = vst [vmem:[#allocation56_spill] sm:$0xff] %v5756_v34  ;;  %v1980_v58 = vmax.f32 %v5744_v30, %v1979_v45  ;;  %v1935_v56 = vmin.f32 %v1933_v36, %v5718_v29  ;;  %v1936_v18 = vmin.f32 %v1934_v21, %v5741_v13  ;;  %v1950_v6 = vmin.f32 %v1948_v28, %v5732_v3  ;;  %v2391_v45 = vld [vmem:[#allocation7 + $0x60] sm:$0xff]  ;;  %v2392_v21 = vld [vmem:[#allocation7 + $0x50] sm:$0xff]  ;;  %v2393_v28 = vld [vmem:[#allocation7 + $0x68] sm:$0xff] }
 0x29a   :  { %7666 = vst [vmem:[#allocation54_spill] sm:$0xff] %v5766_v38  ;;  %v1966_v19 = vmax.f32 %v5753_v33, %v1965_v35  ;;  %v1951_v20 = vmin.f32 %v1949_v63, %v5744_v30  ;;  %v5780_v42 = vadd.f32 %v5638_v27, %v7669_v16  ;;  %v5787_v54 = vadd.f32 %v5650_v57, %v7671_v1  ;;  %v2407_v30 = vld [vmem:[#allocation7 + $0xc8] sm:$0xff] }
 0x29b   :  { %7668 = vst [vmem:[#allocation44_spill] sm:$0xff] %v5770_v12  ;;  %v1981_v23 = vmax.f32 %v5756_v34, %v1980_v58  ;;  %v5790_v24 = vadd.f32 %v1860_v46, %v7673_v61  ;;  %v1937_v9 = vmin.f32 %v1935_v56, %v5753_v33  ;;  %v5796_v51 = vadd.f32 %v1862_v4, %v7675_v41  ;;  %v2390_v46 = vld [vmem:[#allocation7 + $0x48] sm:$0xff]  ;;  %v2397_v61 = vld [vmem:[#allocation7 + $0x70] sm:$0x3f]  ;;  %v5851_v33 = vld [vmem:[#allocation10 + $0x30] sm:$0xff] }
 0x29c   :  { %7670 = vst [vmem:[#allocation196_spill] sm:$0xff] %v5780_v42  ;;  %v1967_v55 = vmax.f32 %v5766_v38, %v1966_v19  ;;  %v1938_v27 = vmin.f32 %v1936_v18, %v5766_v38  ;;  %v1952_v5 = vmin.f32 %v1950_v6, %v5756_v34  ;;  %v1953_v0 = vmin.f32 %v1951_v20, %v5770_v12  ;;  %v5816_v58 = vld [vmem:[#allocation10 + $0x18] sm:$0xff]  ;;  %v2394_v18 = vld [vmem:[#allocation7 + $0x78] sm:$0xff] }
 0x29d   :  { %7672 = vst [vmem:[#allocation197_spill] sm:$0xff] %v5787_v54  ;;  %v1982_v39 = vmax.f32 %v5770_v12, %v1981_v23  ;;  %v5804_v57 = vmul.f32 %v5664_v14, %v5782_v50  ;;  %v2079_v40 = vadd.f32 %v2391_v45, %v2390_v46  ;;  %v1939_v36 = vmin.f32 %v1937_v9, %v5780_v42  ;;  %v5823_v20 = vld [vmem:[#allocation10 + $0x28] sm:$0xff]  ;;  %v2395_v23 = vld [vmem:[#allocation7 + $0x80] sm:$0xff]  ;;  %v2398_v41 = vld [vmem:[#allocation7 + $0x88] sm:$0x3f] }
 0x29e   :  { %7674 = vst [vmem:[#allocation66_spill] sm:$0xff] %v5790_v24  ;;  %v5809_v4 = vmax.f32 %v5780_v42, %v1967_v55  ;;  %v5814_v35 = vmul.f32 %v5695_v25, %v5793_v43  ;;  %v2094_v63 = vadd.f32 %v2393_v28, %v2392_v21  ;;  %v1940_v8 = vmin.f32 %v1938_v27, %v5790_v24  ;;  %v2396_v55 = vld [vmem:[#allocation7 + $0x58] sm:$0x3f] }
 0x29f   :  { %v1954_v56 = vmin.f32 %v1952_v5, %v5787_v54  ;;  %v1955_v19 = vmin.f32 %v1953_v0, %v5796_v51  ;;  %v2080_v6 = vadd.f32 %v2394_v18, %v2079_v40  ;;  %v2109_v1 = vsel %vm1042_vm1, %v2396_v55, 0.0  ;;  %v2399_v0 = vld [vmem:[#allocation7 + $0x90] sm:$0xff]  ;;  %v2404_v12 = vld [vmem:[#allocation7 + $0xb8] sm:$0x3f] }
 0x2a0   :  { %v2095_v16 = vadd.f32 %v2395_v23, %v2094_v63  ;;  %v2110_v9 = vsel %vm1042_vm1, %v2397_v61, 0.0  ;;  %v2112_v46 = vsel %vm1042_vm1, %v2398_v41, 0.0  ;;  %v1983_v27 = vmax.f32 %v5787_v54, %v1982_v39  ;;  %v2400_v63 = vld [vmem:[#allocation7 + $0x98] sm:$0xff]  ;;  %v2401_v23 = vld [vmem:[#allocation7 + $0xa0] sm:$0x3f]  ;;  %v2403_v54 = vld [vmem:[#allocation7 + $0xb0] sm:$0xff] }
 0x2a1   :  { %v5831_v5 = vmul.f32 %v5703_v59, %v5806_v22  ;;  %v2081_v45 = vadd.f32 %v2399_v0, %v2080_v6  ;;  %v2111_v40 = vadd.f32 %v2110_v9, %v2109_v1  ;;  %v5835_v21 = vmul.f32 %v5707_v11, %v5816_v58  ;;  %v2402_v1 = vld [vmem:[#allocation7 + $0xa8] sm:$0xff] }
 0x2a2   :  { %v5839_v28 = vmul.f32 %v5672_v48, %v5818_v32  ;;  %v2096_v18 = vadd.f32 %v2400_v63, %v2095_v16  ;;  %v2114_v39 = vsel %vm1042_vm1, %v2401_v23, 0.0  ;;  %v1969_v55 = vmax.f32 %v5790_v24, %v5809_v4  ;;  %v2405_v23 = vld [vmem:[#allocation7 + $0xc0] sm:$0xff]  ;;  %v2406_v4 = vld [vmem:[#allocation7 + $0xd0] sm:$0x3f] }
 0x2a3   :  { %v5846_v6 = vmul.f32 %v5675_v26, %v5823_v20  ;;  %v2082_v61 = vadd.f32 %v2402_v1, %v2081_v45  ;;  %v2113_v9 = vadd.f32 %v2112_v46, %v2111_v40  ;;  %v1941_v41 = vmin.f32 %v1939_v36, %v1940_v8  ;;  %v2408_v46 = vld [vmem:[#allocation7 + $0xe8] sm:$0x3f] }
 0x2a4   :  { %v1956_v0 = vmin.f32 %v1954_v56, %v1955_v19  ;;  %v2097_v42 = vadd.f32 %v2403_v54, %v2096_v18  ;;  %v2116_v16 = vsel %vm1042_vm1, %v2404_v12, 0.0  ;;  %v1984_v63 = vmax.f32 %v5796_v51, %v1983_v27  ;;  %v2409_v12 = vld [vmem:[#allocation7 + $0xd8] sm:$0xff]  ;;  %v2410_v18 = vld [vmem:[#allocation7 + $0xe0] sm:$0xff] }
 0x2a5   :  { %v2083_v38 = vadd.f32 %v2405_v23, %v2082_v61  ;;  %v2115_v34 = vadd.f32 %v2114_v39, %v2113_v9  ;;  %v2118_v24 = vsel %vm1042_vm1, %v2406_v4, 0.0  ;;  %v2120_v36 = vsel %vm1042_vm1, %v2408_v46, 0.0  ;;  %v5866_v9 = vld [vmem:[#allocation10 + $0x38] sm:$0xff]  ;;  %v5869_v23 = vld [vmem:[#allocation10 + $0x40] sm:$0xff] }
 0x2a6   :  { %v2098_v45 = vadd.f32 %v2407_v30, %v2097_v42  ;;  %v2140_v8 = vlaneseq  ;;  %v1957_v54 = vmax.f32 %v5664_v14, %v5672_v48  ;;  %v1958_v27 = vmax.f32 %v5703_v59, %v5683_v49  ;;  %v2411_v14 = vld [vmem:[#allocation7 + $0xf0] sm:$0xff]  ;;  %v2412_v59 = vld [vmem:[#allocation7 + $0xf8] sm:$0xff] }
 0x2a7   :  { %v2084_v56 = vadd.f32 %v2409_v12, %v2083_v38  ;;  %v2117_v19 = vadd.f32 %v2116_v16, %v2115_v34  ;;  %v1972_v40 = vmax.f32 %v5695_v25, %v5675_v26  ;;  %v1973_v42 = vmax.f32 %v5707_v11, %v5686_v47  ;;  %v2413_v26 = vld [vmem:[#allocation7 + $0x100] sm:$0x3f]  ;;  %v2414_v11 = vld [vmem:[#allocation7 + $0x108] sm:$0xff] }
 0x2a8   :  { %v2099_v39 = vadd.f32 %v2410_v18, %v2098_v45  ;;  %v2141_v1 = vand.u32 127, %v2140_v8  ;;  %v1970_v30 = vmax.f32 %v1957_v54, %v1969_v55  ;;  %v5864_v61 = vmul.f32 %v5683_v49, %v5851_v33  ;;  %v2416_v8 = vld [vmem:[#allocation7 + $0x118] sm:$0x3f] }
 0x2a9   :  { %v2085_v48 = vadd.f32 %v2411_v14, %v2084_v56  ;;  %v2119_v34 = vadd.f32 %v2118_v24, %v2117_v19  ;;  %v1985_v38 = vmax.f32 %v1972_v40, %v1984_v63  ;;  %v2122_v25 = vsel %vm1042_vm1, %v2413_v26, 0.0  ;;  %v2415_v24 = vld [vmem:[#allocation7 + $0x110] sm:$0xff]  ;;  %v5874_v19 = vld [vmem:[#allocation10 + $0x48] sm:$0xff]  ;;  %v2417_v40 = vld [vmem:[#allocation7 + $0x120] sm:$0xff] }
 0x2aa   :  { %v2100_v16 = vadd.f32 %v2412_v59, %v2099_v39  ;;  %vm2145_vm6 = vcmp.lt.s32.totalorder %v2141_v1, 2  ;;  %v1971_v55 = vmax.f32 %v1958_v27, %v1970_v30  ;;  %v2124_v54 = vsel %vm1042_vm1, %v2416_v8, 0.0  ;;  %v2418_v30 = vld [vmem:[#allocation7 + $0x128] sm:$0xff]  ;;  %v2419_v14 = vld [vmem:[#allocation7 + $0x130] sm:$0x3f] }
 0x2ab   :  { %v2086_v4 = vadd.f32 %v2414_v11, %v2085_v48  ;;  %v2121_v45 = vadd.f32 %v2120_v36, %v2119_v34  ;;  %v2146_v49 = vsel %vm2145_vm6, %v1941_v41, inf  ;;  %v2147_v46 = vsel %vm2145_vm6, %v1956_v0, inf  ;;  %v137_v8 = vld [vmem:[#allocation10 + $0x60] sm:$0xff] }
 0x2ac   :  { %v2101_v63 = vadd.f32 %v2415_v24, %v2100_v16  ;;  %v2188_v12 = vmin.f32 %v2146_v49, %v2147_v46  ;;  %v1986_v56 = vmax.f32 %v1973_v42, %v1985_v38  ;;  %v5878_v27 = vmul.f32 %v5686_v47, %v5866_v9  ;;  %v2420_v47 = vld [vmem:[#allocation7 + $0x138] sm:$0xff]  ;;  %v2422_v16 = vld [vmem:[#allocation7 + $0x148] sm:$0x3f]  ;;  %v2425_v24 = vld [vmem:[#allocation7 + $0x160] sm:$0x3f] }
 0x2ad   :  { %v2049_v36 = vadd.f32 %v5806_v22, %v5782_v50  ;;  %v2087_v41 = vadd.f32 %v2417_v40, %v2086_v4  ;;  %v2123_v18 = vadd.f32 %v2122_v25, %v2121_v45  ;;  %v5884_v0 = vmul.f32 %v5641_v17, %v5869_v23  ;;  %v135_v45 = vld [vmem:[#allocation10 + $0x50] sm:$0xff]  ;;  %v2424_v49 = vld [vmem:[#allocation7 + $0x158] sm:$0xff]  ;;  %v2429_v40 = vld [vmem:[#allocation7 + $0x170] sm:$0xff] }
 0x2ae   :  { %v2064_v39 = vadd.f32 %v5816_v58, %v5793_v43  ;;  %v2102_v42 = vadd.f32 %v2418_v30, %v2101_v63  ;;  %v2126_v48 = vsel %vm1042_vm1, %v2419_v14, 0.0  ;;  %2189 = vmin.xlane.f32.xlu0 %v2188_v12  ;;  %v2148_v50 = vsel %vm2145_vm6, %v1971_v55, -inf  ;;  %v2421_v58 = vld [vmem:[#allocation7 + $0x140] sm:$0xff]  ;;  %v2423_v55 = vld [vmem:[#allocation7 + $0x150] sm:$0xff]  ;;  %v136_v63 = vld [vmem:[#allocation10 + $0x58] sm:$0xff] }
 0x2af   :  { %v2088_v34 = vadd.f32 %v2420_v47, %v2087_v41  ;;  %v2125_v38 = vadd.f32 %v2124_v54, %v2123_v18  ;;  %v2149_v22 = vsel %vm2145_vm6, %v1986_v56, -inf  ;;  %v5893_v17 = vmul.f32 %v5644_v10, %v5874_v19  ;;  %v2426_v54 = vld [vmem:[#allocation7 + $0x168] sm:$0xff]  ;;  %v2432_v14 = vld [vmem:[#allocation7 + $0x180] sm:$0xff] }
 0x2b0   :  { %v2019_v43 = vadd.f32 %v5831_v5, %v5804_v57  ;;  %v2103_v59 = vadd.f32 %v2421_v58, %v2102_v42  ;;  %v2128_v26 = vsel %vm1042_vm1, %v2422_v16, 0.0  ;;  %v2034_v25 = vadd.f32 %v5835_v21, %v5814_v35  ;;  %v2427_v35 = vld [vmem:[#allocation7 + $0x178] sm:$0x3f]  ;;  %v2428_v21 = vld [vmem:[#allocation7 + $0x190] sm:$0x3f] }
 0x2b1   :  { %v2050_v11 = vadd.f32 %v2049_v36, %v5818_v32  ;;  %v2089_v1 = vadd.f32 %v2423_v55, %v2088_v34  ;;  %v2127_v4 = vadd.f32 %v2126_v48, %v2125_v38  ;;  %v2065_v10 = vadd.f32 %v2064_v39, %v5823_v20  ;;  %v2430_v20 = vld [vmem:[#allocation7 + $0x1a8] sm:$0x3f]  ;;  %v2431_v39 = vld [vmem:[#allocation7 + $0x1c0] sm:$0x3f]  ;;  %v138_v34 = vld [vmem:[#allocation10 + $0x68] sm:$0xff] }
 0x2b2   :  { %v2104_v46 = vadd.f32 %v2424_v49, %v2103_v59  ;;  %v2130_v57 = vsel %vm1042_vm1, %v2425_v24, 0.0  ;;  %v2200_v5 = vmax.f32 %v2148_v50, %v2149_v22  ;;  %v2132_v32 = vsel %vm1042_vm1, %v2427_v35, 0.0  ;;  %v2433_v22 = vld [vmem:[#allocation7 + $0x188] sm:$0xff] }
 0x2b3   :  { %v2090_v12 = vadd.f32 %v2426_v54, %v2089_v1  ;;  %v2129_v56 = vadd.f32 %v2128_v26, %v2127_v4  ;;  %v2134_v36 = vsel %vm1042_vm1, %v2428_v21, 0.0  ;;  %v2136_v18 = vsel %vm1042_vm1, %v2430_v20, 0.0  ;;  %v2434_v26 = vld [vmem:[#allocation7 + $0x198] sm:$0xff]  ;;  %v139_v4 = vld [vmem:[#allocation10 + $0x70] sm:$0xff] }
 0x2b4   :  { %v2105_v41 = vadd.f32 %v2429_v40, %v2104_v46  ;;  %v2138_v30 = vsel %vm1042_vm1, %v2431_v39, 0.0  ;;  %v1997_v42 = vmul.f32 %v5647_v2, %v135_v45  ;;  %v1998_v38 = vmul.f32 %v5653_v62, %v136_v63  ;;  %v2435_v62 = vld [vmem:[#allocation7 + $0x1a0] sm:$0xff] }
 0x2b5   :  { %v2091_v48 = vadd.f32 %v2432_v14, %v2090_v12  ;;  %v2131_v47 = vadd.f32 %v2130_v57, %v2129_v56  ;;  %v1999_v50 = vmul.f32 %v5656_v31, %v137_v8  ;;  %v2020_v59 = vadd.f32 %v2019_v43, %v5839_v28  ;;  %v2436_v43 = vld [vmem:[#allocation7 + $0x1b0] sm:$0xff]  ;;  %v142_v56 = vld [vmem:[#allocation10 + $0x88] sm:$0xff] }
 0x2b6   :  { %v2106_v58 = vadd.f32 %v2433_v22, %v2105_v41  ;;  %2201 = vmax.xlane.f32.xlu0 %v2200_v5  ;;  %v2035_v16 = vadd.f32 %v2034_v25, %v5846_v6  ;;  %v2508_v2 = vmov 0.0   ;;  %v2051_v49 = vadd.f32 %v2050_v11, %v5851_v33  ;;  %v140_v5 = vld [vmem:[#allocation10 + $0x78] sm:$0xff]  ;;  %v2437_v33 = vld [vmem:[#allocation7 + $0x1b8] sm:$0xff] }
 0x2b7   :  { %v2092_v55 = vadd.f32 %v2434_v26, %v2091_v48  ;;  %v2133_v1 = vadd.f32 %v2132_v32, %v2131_v47  ;;  %58 = vst [vmem:[#allocation6 + $0x8] sm:$0x3f] %v2508_v2  ;;  %v2066_v46 = vadd.f32 %v2065_v10, %v5866_v9  ;;  %v2000_v31 = vmul.f32 %v5659_v60, %v138_v34  ;;  %v144_v41 = vld [vmem:[#allocation10 + $0x98] sm:$0xff]  ;;  %v145_v48 = vld [vmem:[#allocation10 + $0xa0] sm:$0xff]  ;;  %v146_v47 = vld [vmem:[#allocation10 + $0xa8] sm:$0xff] }
 0x2b8   :  { %v2107_v24 = vadd.f32 %v2435_v62, %v2106_v58  ;;  %v2021_v57 = vadd.f32 %v2020_v59, %v5864_v61  ;;  %v2036_v28 = vadd.f32 %v2035_v16, %v5878_v27  ;;  %v2052_v54 = vadd.f32 %v2051_v49, %v5869_v23  ;;  %v141_v27 = vld [vmem:[#allocation10 + $0x80] sm:$0xff]  ;;  %v151_v62 = vld [vmem:[#allocation10 + $0xd0] sm:$0xff] }
 0x2b9   :  { %v5917_v6 = vadd.f32 %v2436_v43, %v2092_v55  ;;  %v2135_v25 = vadd.f32 %v2134_v36, %v2133_v1  ;;  %v2067_v12 = vadd.f32 %v2066_v46, %v5874_v19  ;;  %v2001_v9 = vmul.f32 %v5669_v37, %v139_v4  ;;  %v143_v19 = vld [vmem:[#allocation10 + $0x90] sm:$0xff]  ;;  %v149_v26 = vld [vmem:[#allocation10 + $0xc0] sm:$0xff]  ;;  %v150_v55 = vld [vmem:[#allocation10 + $0xc8] sm:$0xff] }
 0x2ba   :  { %v5921_v11 = vadd.f32 %v2437_v33, %v2107_v24  ;;  %v2022_v60 = vadd.f32 %v2021_v57, %v5884_v0  ;;  %v2037_v61 = vadd.f32 %v2036_v28, %v5893_v17  ;;  %v2053_v35 = vadd.f32 %v2052_v54, %v135_v45  ;;  %v152_v24 = vld [vmem:[#allocation10 + $0xd8] sm:$0xff]  ;;  %v7677_v28 = vld [vmem:[#allocation146_spill] sm:$0xff]  ;;  %v153_v33 = vld [vmem:[#allocation10 + $0xe0] sm:$0xff] }
 0x2bb   :  { %v2137_v10 = vadd.f32 %v2136_v18, %v2135_v25  ;;  %v2068_v32 = vadd.f32 %v2067_v12, %v136_v63  ;;  %v2002_v21 = vmul.f32 %v5680_v52, %v140_v5  ;;  %v2003_v37 = vmul.f32 %v5690_v7, %v141_v27  ;;  %v7678_v25 = vld [vmem:[#allocation56_spill] sm:$0xff] }
 0x2bc   :  { %v2023_v36 = vadd.f32 %v2022_v60, %v1997_v42  ;;  %v2038_v23 = vadd.f32 %v2037_v61, %v1998_v38  ;;  %v2054_v20 = vadd.f32 %v2053_v35, %v137_v8  ;;  %v2004_v0 = vmul.f32 %v5699_v44, %v142_v56  ;;  %v147_v8 = vld [vmem:[#allocation10 + $0xb0] sm:$0xff]  ;;  %v7680_v35 = vld [vmem:[#allocation44_spill] sm:$0xff] }
 0x2bd   :  { %v2139_v40 = vadd.f32 %v2138_v30, %v2137_v10  ;;  %v2069_v39 = vadd.f32 %v2068_v32, %v138_v34  ;;  %v2005_v52 = vmul.f32 %v5711_v15, %v143_v19  ;;  %v2006_v30 = vmul.f32 %v5715_v53, %v144_v41  ;;  %v148_v34 = vld [vmem:[#allocation10 + $0xb8] sm:$0xff]  ;;  %v7676_v53 = vld [vmem:[#allocation162_spill] sm:$0xff] }
 0x2be   :  { %v2024_v14 = vadd.f32 %v2023_v36, %v1999_v50  ;;  %v2039_v17 = vadd.f32 %v2038_v23, %v2000_v31  ;;  %v2176_v18 = vld [vmem:[#allocation6 + $0x8] sm:$0x3f]  ;;  %v2055_v63 = vadd.f32 %v2054_v20, %v139_v4  ;;  %v2007_v44 = vmul.f32 %v5718_v29, %v145_v48  ;;  %v155_v61 = vld [vmem:[#allocation10 + $0xf0] sm:$0xff]  ;;  %v156_v10 = vld [vmem:[#allocation10 + $0xf8] sm:$0xff] }
 0x2bf   :  { %v2179_v45 = vadd.f32 %v2176_v18, %v2139_v40  ;;  %v2070_v22 = vadd.f32 %v2069_v39, %v140_v5  ;;  %v2008_v50 = vmul.f32 %v5732_v3, %v146_v47  ;;  %v2009_v15 = vmul.f32 %v5741_v13, %v147_v8  ;;  %v154_v13 = vld [vmem:[#allocation10 + $0xe8] sm:$0xff] }
 0x2c0   :  { %v2025_v42 = vadd.f32 %v2024_v14, %v2001_v9  ;;  %v2040_v38 = vadd.f32 %v2039_v17, %v2002_v21  ;;  %v2056_v7 = vadd.f32 %v2055_v63, %v141_v27  ;;  %v2010_v2 = vmul.f32 %v7676_v53, %v148_v34  ;;  %v7679_v27 = vld [vmem:[#allocation54_spill] sm:$0xff]  ;;  %v7682_v39 = vld [vmem:[#allocation197_spill] sm:$0xff] }
 0x2c1   :  { %2182 = vst [vmem:[#allocation6 + $0x8] sm:$0x3f] %v2179_v45  ;;  %v2071_v58 = vadd.f32 %v2070_v22, %v142_v56  ;;  %v2240_v31 = vrot.slane %v5917_v6, 3  ;;  %v2241_v29 = vrot.slane %v5921_v11, 3  ;;  %v2011_v43 = vmul.f32 %v7677_v28, %v149_v26  ;;  %v7683_v17 = vld [vmem:[#allocation66_spill] sm:$0xff] }
 0x2c2   :  { %v2026_v59 = vadd.f32 %v2025_v42, %v2003_v37  ;;  %v2041_v16 = vadd.f32 %v2040_v38, %v2004_v0  ;;  %v2057_v1 = vadd.f32 %v2056_v7, %v143_v19  ;;  %v2012_v5 = vmul.f32 %v7678_v25, %v150_v55 }
 0x2c3   :  { %v2072_v4 = vadd.f32 %v2071_v58, %v144_v41  ;;  %v2013_v56 = vmul.f32 %v7679_v27, %v151_v62  ;;  %v2014_v6 = vmul.f32 %v7680_v35, %v152_v24  ;;  %v2242_v36 = vsel %vm1283_vm2, %v2240_v31, %v2241_v29  ;;  %v7681_v41 = vld [vmem:[#allocation196_spill] sm:$0xff] }
 0x2c4   :  { %v2027_v49 = vadd.f32 %v2026_v59, %v2005_v52  ;;  %v2042_v46 = vadd.f32 %v2041_v16, %v2006_v30  ;;  %v2058_v57 = vadd.f32 %v2057_v1, %v145_v48  ;;  %v2015_v20 = vmul.f32 %v7681_v41, %v153_v33 }
 0x2c5   :  { %v2073_v3 = vadd.f32 %v2072_v4, %v146_v47  ;;  %v2016_v37 = vmul.f32 %v7682_v39, %v154_v13  ;;  %v2017_v18 = vmul.f32 %v7683_v17, %v155_v61  ;;  %v2018_v48 = vmul.f32 %v5796_v51, %v156_v10 }
 0x2c6   :  { %v2028_v54 = vadd.f32 %v2027_v49, %v2007_v44  ;;  %v2043_v12 = vadd.f32 %v2042_v46, %v2008_v50  ;;  %v2059_v9 = vadd.f32 %v2058_v57, %v147_v8 }
 0x2c7   :  { %v2074_v60 = vadd.f32 %v2073_v3, %v148_v34 }
 0x2c8   :  { %v2029_v32 = vadd.f32 %v2028_v54, %v2009_v15  ;;  %v2044_v11 = vadd.f32 %v2043_v12, %v2010_v2  ;;  %v2236_v21 = vld [vmem:[#allocation6 + $0x8] sm:$0x3f]  ;;  %v2060_v40 = vadd.f32 %v2059_v9, %v149_v26 }
 0x2c9   :  { %v2243_v23 = vrot.slane %v2236_v21, 3  ;;  %v2075_v19 = vadd.f32 %v2074_v60, %v150_v55 }
 0x2ca   :  { %v2030_v0 = vadd.f32 %v2029_v32, %v2011_v43  ;;  %v2045_v14 = vadd.f32 %v2044_v11, %v2012_v5  ;;  %v2061_v45 = vadd.f32 %v2060_v40, %v151_v62 }
 0x2cb   :  { %v2244_v47 = vsel %vm1283_vm2, %v2241_v29, %v2243_v23  ;;  %v2076_v30 = vadd.f32 %v2075_v19, %v152_v24 }
 0x2cc   :  { %v2031_v63 = vadd.f32 %v2030_v0, %v2013_v56  ;;  %v2046_v22 = vadd.f32 %v2045_v14, %v2014_v6  ;;  %v2247_v52 = vadd.f32 %v2244_v47, %v2242_v36  ;;  %v2062_v7 = vadd.f32 %v2061_v45, %v153_v33 }
 0x2cd   :  { %v2077_v58 = vadd.f32 %v2076_v30, %v154_v13 }
 0x2ce   :  { %v2032_v42 = vadd.f32 %v2031_v63, %v2015_v20  ;;  %v2047_v38 = vadd.f32 %v2046_v22, %v2016_v37  ;;  %2248 = vadd.xlane.f32.xlu2 %v2247_v52  ;;  %v2063_v50 = vadd.f32 %v2062_v7, %v155_v61 }
 0x2cf   :  { %v2078_v59 = vadd.f32 %v2077_v58, %v156_v10 }
 0x2d0   :  { %v2033_v8 = vadd.f32 %v2032_v42, %v2017_v18  ;;  %v2048_v34 = vadd.f32 %v2047_v38, %v2018_v48 }
 0x2d1   :  { %v2224_v16 = vadd.f32 %v2078_v59, %v2063_v50 }
 0x2d2   :  { %v2212_v44 = vadd.f32 %v2048_v34, %v2033_v8 }
 0x2d4   :  { %2213 = vadd.xlane.f32.xlu1 %v2212_v44 }
 0x2dc   :  { %2225 = vadd.xlane.f32.xlu1 %v2224_v16 }
 0x321   :  { %v2190_v51 = vpop.xlane.xlu0 %2189 }
 0x322   :  { %v2191_v26 = vrot.slane %v2190_v51, 4 }
 0x324   :  { %v2192_v55 = vmin.f32 %v2190_v51, %v2191_v26 }
 0x326   :  { %v2193_v1 = vrot.slane %v2192_v55, 2 }
 0x328   :  { %v2194_v4 = vmin.f32 %v2192_v55, %v2193_v1 }
 0x329   :  { %v2202_v15 = vpop.xlane.xlu0 %2201 }
 0x32a   :  { %v2203_v53 = vrot.slane %v2202_v15, 4  ;;  %v2195_v2 = vrot.slane %v2194_v4, 1 }
 0x32c   :  { %v2204_v49 = vmax.f32 %v2202_v15, %v2203_v53  ;;  %v2196_v46 = vmin.f32 %v2194_v4, %v2195_v2 }
 0x32e   :  { %v2205_v62 = vrot.slane %v2204_v49, 2  ;;  %2358 = vpush %v2196_v46 }
 0x330   :  { %v2206_v24 = vmax.f32 %v2204_v49, %v2205_v62 }
 0x332   :  { %v2207_v31 = vrot.slane %v2206_v24, 1 }
 0x334   :  { %v2208_v29 = vmax.f32 %v2206_v24, %v2207_v31 }
 0x336   :  { %2360 = vpush %v2208_v29 }
 0x341   :  { %v2249_v57 = vpop.xlane.xlu2 %2248 }
 0x342   :  { %v2250_v28 = vrot.slane %v2249_v57, 4 }
 0x344   :  { %v2251_v5 = vadd.f32 %v2250_v28, %v2249_v57 }
 0x346   :  { %v2252_v33 = vrot.slane %v2251_v5, 2 }
 0x347   :  { %v2214_v3 = vpop.xlane.xlu1 %2213 }
 0x348   :  { %v2215_v43 = vrot.slane %v2214_v3, 4  ;;  %v2253_v27 = vadd.f32 %v2252_v33, %v2251_v5 }
 0x34a   :  { %v2216_v25 = vadd.f32 %v2215_v43, %v2214_v3  ;;  %v2254_v6 = vrot.slane %v2253_v27, 1 }
 0x34c   :  { %v2217_v54 = vrot.slane %v2216_v25, 2  ;;  %v2255_v21 = vadd.f32 %v2254_v6, %v2253_v27 }
 0x34e   :  { %v2218_v12 = vadd.f32 %v2217_v54, %v2216_v25 }
 0x34f   :  { %v2226_v13 = vpop.xlane.xlu1 %2225 }
 0x350   :  { %v2227_v9 = vrot.slane %v2226_v13, 4  ;;  %v2219_v60 = vrot.slane %v2218_v12, 1 }
 0x352   :  { %v2228_v61 = vadd.f32 %v2227_v9, %v2226_v13  ;;  %v2220_v10 = vadd.f32 %v2219_v60, %v2218_v12 }
 0x354   :  { %v2229_v56 = vrot.slane %v2228_v61, 2  ;;  %2362 = vpush %v2220_v10 }
 0x356   :  { %v2230_v35 = vadd.f32 %v2229_v56, %v2228_v61 }
 0x358   :  { %v2231_v32 = vrot.slane %v2230_v35, 1 }
 0x35a   :  { %v2232_v11 = vadd.f32 %v2231_v32, %v2230_v35 }
 0x35c   :  { %2364 = vpush %v2232_v11 }
 0x35d   :  { %2366 = vpush %v2255_v21 }
 0x35f   :  { %s5947_s0 = spop %2358 }
 0x367   :  { %s5949_s1 = spop %2360 }
 0x368   :  { %s2259_s21 = ssub.f32 %s5949_s1, %s5947_s0  ;;  %p2332_p0 = scmp.le.f32.partialorder %s5949_s1, %s5947_s0 }
 0x36a   :  { %v2260_v36 = vstv %s2259_s21 }
 0x36b   :  { %2382 = vrcp.f32 %v2260_v36  ;;  %v2272_v41 = vand.u32 2147483648, %v2260_v36  ;;  %v2270_v39 = vand.u32 2147483647, %v2260_v36  ;;  %vm2266_vm8 = vweird.f32 %v2260_v36 }
 0x36d   :  { %v2273_v0 = vor.u32 1.1754944e-38, %v2272_v41  ;;  %vm2271_vm10 = vcmp.eq.f32.partialorder %v2270_v39, 8.507059e+37 }
 0x371   :  { %v2383_v23 = vpop.eup %2382 }
 0x372   :  { %v2262_v40 = vmul.f32 %v2383_v23, %v2260_v36  ;;  %vm2267_vm7 = vweird.f32 %v2383_v23 }
 0x373   :  { %vm2268_vm9 = vmor %vm2266_vm8, %vm2267_vm7 }
 0x374   :  { %v2263_v19 = vsub.f32 1.0, %v2262_v40 }
 0x376   :  { %v2264_v20 = vmul.f32 %v2383_v23, %v2263_v19 }
 0x378   :  { %v2265_v37 = vadd.f32 %v2383_v23, %v2264_v20 }
 0x37a   :  { %v2269_v14 = vsel %vm2268_vm9, %v2383_v23, %v2265_v37 }
 0x37b   :  { %v2274_v17 = vsel %vm2271_vm10, %v2273_v0, %v2269_v14 }
 0x37c   :  { %2368 = vpush %v2274_v17 }
 0x385   :  { %s2363_s22 = spop %2362 }
 0x38d   :  { %s2365_s23 = spop %2364 }
 0x38e   :  { %s2257_s24 = smul.f32 %s2365_s23, %s5947_s0  ;;  %v2294_v18 = vstv %s2365_s23  ;;  %s2367_s25 = spop %2366 }
 0x38f   :  { %2384 = vrcp.f32 %v2294_v18  ;;  %v2277_v48 = vstv %s2367_s25  ;;  %p2331_p1 = scmp.le.f32.partialorder %s2367_s25, 0.0  ;;  %v2306_v42 = vand.u32 2147483648, %v2294_v18  ;;  %v2304_v34 = vand.u32 2147483647, %v2294_v18 }
 0x390   :  { %2386 = vrcp.f32 %v2277_v48  ;;  %s5956_s26 = ssub.f32 %s2363_s22, %s2257_s24  ;;  %v2289_v38 = vand.u32 2147483648, %v2277_v48  ;;  %v2287_v58 = vand.u32 2147483647, %v2277_v48  ;;  %vm2300_vm13 = vweird.f32 %v2294_v18 }
 0x391   :  { %p5961_p2 = por %p2332_p0, %p2331_p1  ;;  %vm2283_vm14 = vweird.f32 %v2277_v48  ;;  %v2307_v59 = vor.u32 1.1754944e-38, %v2306_v42  ;;  %vm2305_vm1 = vcmp.eq.f32.partialorder %v2304_v34, 8.507059e+37 }
 0x392   :  { %v2290_v16 = vor.u32 1.1754944e-38, %v2289_v38  ;;  %vm2288_vm2 = vcmp.eq.f32.partialorder %v2287_v58, 8.507059e+37 }
 0x395   :  { %v2385_v47 = vpop.eup %2384 }
 0x396   :  { %v2387_v45 = vpop.eup %2386  ;;  %v2296_v63 = vmul.f32 %v2385_v47, %v2294_v18  ;;  %vm2301_vm11 = vweird.f32 %v2385_v47 }
 0x397   :  { %v2279_v22 = vmul.f32 %v2387_v45, %v2277_v48  ;;  %vm2284_vm12 = vweird.f32 %v2387_v45  ;;  %vm2302_vm15 = vmor %vm2300_vm13, %vm2301_vm11 }
 0x398   :  { %v2297_v52 = vsub.f32 1.0, %v2296_v63  ;;  %vm2285_vm0 = vmor %vm2283_vm14, %vm2284_vm12 }
 0x399   :  { %v2280_v30 = vsub.f32 1.0, %v2279_v22 }
 0x39a   :  { %v2298_v8 = vmul.f32 %v2385_v47, %v2297_v52 }
 0x39b   :  { %v2281_v7 = vmul.f32 %v2387_v45, %v2280_v30 }
 0x39c   :  { %v2299_v44 = vadd.f32 %v2385_v47, %v2298_v8 }
 0x39d   :  { %v2282_v50 = vadd.f32 %v2387_v45, %v2281_v7 }
 0x39e   :  { %v2303_v51 = vsel %vm2302_vm15, %v2385_v47, %v2299_v44 }
 0x39f   :  { %v2286_v26 = vsel %vm2285_vm0, %v2387_v45, %v2282_v50  ;;  %v2308_v55 = vsel %vm2305_vm1, %v2307_v59, %v2303_v51 }
 0x3a0   :  { %v2291_v1 = vsel %vm2288_vm2, %v2290_v16, %v2286_v26 }
 0x3a1   :  { %2370 = vpush %v2291_v1 }
 0x3a2   :  { %2372 = vpush %v2308_v55 }
 0x3ad   :  { %s2369_s28 = spop %2368 }
 0x3ae   :  { %s2276_s29 = smul.f32 %s2369_s28, %s5956_s26 }
 0x3b0   :  { %p2334_p3 = scmp.ne.f32.partialorder %s2276_s29, %s2276_s29  ;;  %p2335_p4 = scmp.eq.f32.partialorder %s2276_s29, 0.0 }
 0x3b2   :  { %p5966_p5 = por %p2335_p4, %p2334_p3 }
 0x3b4   :  { %p2337_p6 = por %p5966_p5, %p5961_p2 }
 0x3d2   :  { %s2371_s3 = spop %2370 }
 0x3d3   :  { %s2293_s4 = smul.f32 %s2371_s3, %s2276_s29  ;;  %s2373_s5 = spop %2372 }
 0x3d4   :  { %s2310_s6 = smul.f32 %s2373_s5, %s2276_s29 }
 0x3d6   :  { %s2311_s7 = smul.f32 %s2310_s6, %s2293_s4  ;;  %s2313_s8 = sadd.f32 %s2310_s6, %s2293_s4 }
 0x3d8   :  { %v2314_v4 = vstv %s2313_s8  ;;  %s2312_s9 = smul.f32 2.0, %s2311_s7 }
 0x3d9   :  { %2388 = vrcp.f32 %v2314_v4  ;;  %v2326_v49 = vand.u32 2147483648, %v2314_v4  ;;  %v2324_v62 = vand.u32 2147483647, %v2314_v4  ;;  %vm2320_vm4 = vweird.f32 %v2314_v4 }
 0x3db   :  { %v2327_v31 = vor.u32 1.1754944e-38, %v2326_v49  ;;  %vm2325_vm6 = vcmp.eq.f32.partialorder %v2324_v62, 8.507059e+37 }
 0x3df   :  { %v2389_v15 = vpop.eup %2388 }
 0x3e0   :  { %v2316_v53 = vmul.f32 %v2389_v15, %v2314_v4  ;;  %vm2321_vm3 = vweird.f32 %v2389_v15 }
 0x3e1   :  { %vm2322_vm5 = vmor %vm2320_vm4, %vm2321_vm3 }
 0x3e2   :  { %v2317_v2 = vsub.f32 1.0, %v2316_v53 }
 0x3e4   :  { %v2318_v46 = vmul.f32 %v2389_v15, %v2317_v2 }
 0x3e6   :  { %v2319_v24 = vadd.f32 %v2389_v15, %v2318_v46 }
 0x3e8   :  { %v2323_v29 = vsel %vm2322_vm5, %v2389_v15, %v2319_v24 }
 0x3e9   :  { %v2328_v57 = vsel %vm2325_vm6, %v2327_v31, %v2323_v29 }
 0x3ea   :  { %2374 = vpush %v2328_v57 }
 0x41b   :  { %s2375_s13 = spop %2374 }
 0x41c   :  { %s2330_s14 = smul.f32 %s2375_s13, %s2312_s9 }
 0x41e   :  { %s7687_s14 = smov (%p2337_p6, %s2330_s14), 0.0 }
 0x41f   :  { %2340 = sst [smem:[#allocation12]] %s7687_s14 }
 0x420   :  { %2349 = dma.smem_to_hbm %s2509_s15, 16, %s2347_s12, [#allocation9]  }
 0x421   :  { %2502 = dma.done.wait [#allocation9], 16  }
 0x422   :  { %2503 = vsyncadd [#allocation9], 4294967280 }
 0x423   :  { %2354 = sfence }
 0x424   :  { %2355 = vsyncpa [#allocation8], 1 }
 0x425   :  { %2356 = vsyncpa [#allocation11], 1 }
 0x426   :  { %2357 = vsyncpa [#allocation9], 1 }

</bundles_post_ra>
